<compile_context>
chip_gen: v7x
topology: tpu7x:2x2x1
jax: 0.10.0
libtpu: 0.0.40
codegen_flags: <defaults>
</compile_context>

<pallas_src>
import functools

import jax
import jax.numpy as jnp
from jax.experimental import pallas as pl
from jax.experimental.pallas import tpu as pltpu


# ----------------------------------------------------------------------------
# helpers
# ----------------------------------------------------------------------------
def _const_spec(shape):
    """Full-array block, identical for every grid point (shared weights)."""
    n = len(shape)
    return pl.BlockSpec(shape, lambda *_: (0,) * n)


def _branch_spec(shape):
    """Per-branch block: leading axis indexed by the branch grid coordinate."""
    zeros = (0,) * (len(shape) - 1)
    return pl.BlockSpec((1,) + tuple(shape[1:]), lambda i: (i,) + zeros)


def _conv_bn(key, cin, cout, eps=1e-5):
    """Deterministic conv(k=1) weight + folded eval-mode BatchNorm scale/shift."""
    kw, kb, kg, kbe, km, kv = jax.random.split(key, 6)
    w = jax.random.normal(kw, (cin, cout), jnp.float32) * 0.1
    b = jax.random.normal(kb, (cout,), jnp.float32) * 0.1
    gamma = 1.0 + 0.1 * jax.random.normal(kg, (cout,), jnp.float32)
    beta = 0.1 * jax.random.normal(kbe, (cout,), jnp.float32)
    mean = 0.1 * jax.random.normal(km, (cout,), jnp.float32)
    var = 1.0 + 0.1 * jax.random.uniform(kv, (cout,), jnp.float32)
    scale = gamma / jnp.sqrt(var + eps)
    shift = beta + scale * (b - mean)
    return w, scale[None, :], shift[None, :]


def _conv(key, cin, cout):
    kw, kb = jax.random.split(key)
    w = jax.random.normal(kw, (cin, cout), jnp.float32) * 0.1
    b = jax.random.normal(kb, (cout,), jnp.float32) * 0.1
    return w, b[None, :]


# ----------------------------------------------------------------------------
# call 1: fused PointNet encoder + per-branch fc1
#   grid=(num_branch,): PointNet is recomputed per branch (trivial at these sizes)
#   so the branch axis can stay "parallel" (one branch per TensorCore on v7x).
# ----------------------------------------------------------------------------
def _encoder_kernel(x_ref, w1, s1, h1, w2, s2, h2, w3, s3, h3, wfc, bfc, o_ref,
                    *, B, P):
    # PointNet, channels-last: kernel_size=1 convs are per-point matmuls over (B*P) rows.
    a = jnp.maximum(jnp.dot(x_ref[...], w1[...],
                            preferred_element_type=jnp.float32) * s1[...] + h1[...], 0.0)
    a = jnp.maximum(jnp.dot(a, w2[...],
                            preferred_element_type=jnp.float32) * s2[...] + h2[...], 0.0)
    a = jnp.dot(a, w3[...], preferred_element_type=jnp.float32) * s3[...] + h3[...]  # (B*P, K1)
    # max over the points of each batch element (static, sublane-aligned slices)
    feat = jnp.concatenate(
        [jnp.max(a[b * P:(b + 1) * P], axis=0, keepdims=True) for b in range(B)],
        axis=0)                                                                       # (B, K1)
    # per-branch fc1 folded in; output stays lane-dense (N*K2 = 512 lanes)
    o_ref[0] = jnp.dot(feat, wfc[0], preferred_element_type=jnp.float32) + bfc[0]


# ----------------------------------------------------------------------------
# call 2: per-branch AXform decoder (batch collapsed into the block)
# ----------------------------------------------------------------------------
def _decoder_kernel(xb_ref, w1, s1, h1, w2, s2, h2, w3, b3, w4t, b4t, o_ref,
                    *, B, N):
    x2 = xb_ref[0]                                                  # (B*N, K2) = x_base
    # shared conv1/conv2 over all B*N points of this branch (bigger MXU tiles)
    a = jnp.maximum(jnp.dot(x2, w1[0],
                            preferred_element_type=jnp.float32) * s1[0] + h1[0], 0.0)
    a = jnp.maximum(jnp.dot(a, w2[0],
                            preferred_element_type=jnp.float32) * s2[0] + h2[0], 0.0)
    # per-batch tail keeps only one (N, M) softmax tile live at a time (vreg budget)
    for b in range(B):
        lg = jnp.dot(a[b * N:(b + 1) * N], w3[0],
                     preferred_element_type=jnp.float32) + b3[0]    # (N, M) logits
        # softmax over N (== PyTorch Softmax(dim=2) on (B, M, N))
        lg = lg - jnp.max(lg, axis=0, keepdims=True)
        e = jnp.exp(lg)
        wgt = e * pl.reciprocal(jnp.sum(e, axis=0, keepdims=True), approx=True)
        # bmm(x_weights, x_base) computed transposed: (K2, M) = x_base^T @ weights
        yT = jax.lax.dot_general(x2[b * N:(b + 1) * N], wgt,
                                 (((0,), (0,)), ((), ())),
                                 preferred_element_type=jnp.float32)                 # (K2, M)
        # conv4 applied channels-first -> (3, M): lane-dense (M-wide) store
        o_ref[0, b] = jnp.dot(w4t[0], yT, preferred_element_type=jnp.float32) + b4t[0]


# ----------------------------------------------------------------------------
# full network forward
# ----------------------------------------------------------------------------
def network_forward(x, pn, axp, *, K2, N, M):
    B, P, _ = x.shape
    nb, K1, NK2 = axp["wfc"].shape

    # ---- call 1: PointNet + fc1 (all branches) -> (nb, B, N*K2) -------------
    enc_weights = (pn["w1"], pn["s1"], pn["sh1"], pn["w2"], pn["s2"], pn["sh2"],
                   pn["w3"], pn["s3"], pn["sh3"])
    xb = pl.pallas_call(
        functools.partial(_encoder_kernel, B=B, P=P),
        out_shape=jax.ShapeDtypeStruct((nb, B, NK2), jnp.float32),
        grid=(nb,),
        in_specs=[pl.BlockSpec((B * P, 3), lambda i: (0, 0))]
                 + [_const_spec(a.shape) for a in enc_weights]
                 + [_branch_spec(axp["wfc"].shape), _branch_spec(axp["bfc"].shape)],
        out_specs=pl.BlockSpec((1, B, NK2), lambda i: (i, 0, 0)),
        compiler_params=pltpu.CompilerParams(dimension_semantics=("parallel",)),
    )(x.reshape(B * P, 3), *enc_weights, axp["wfc"], axp["bfc"])

    # torch `x.view(-1, N, K2)`: contiguous split -> free XLA metadata reshape.
    xb = xb.reshape(nb, B * N, K2)

    # ---- call 2: AXform decoders -> (nb, B, 3, M) ----------------------------
    w4t = jnp.transpose(axp["w4"], (0, 2, 1))    # (nb, 3, K2)  conv4, channels-first
    b4t = jnp.transpose(axp["b4"], (0, 2, 1))    # (nb, 3, 1)
    dec_weights = (axp["w1"], axp["s1"], axp["sh1"], axp["w2"], axp["s2"], axp["sh2"],
                   axp["w3"], axp["b3"], w4t, b4t)
    out = pl.pallas_call(
        functools.partial(_decoder_kernel, B=B, N=N),
        out_shape=jax.ShapeDtypeStruct((nb, B, 3, M), jnp.float32),
        grid=(nb,),
        in_specs=[pl.BlockSpec((1, B * N, K2), lambda i: (i, 0, 0))]
                 + [_branch_spec(a.shape) for a in dec_weights],
        out_specs=pl.BlockSpec((1, B, 3, M), lambda i: (i, 0, 0, 0)),
        compiler_params=pltpu.CompilerParams(dimension_semantics=("parallel",)),
    )(xb, *dec_weights)

    # (nb, B, 3, M) -> (B, nb*M, 3)  == torch.cat over branches along dim=1
    out = jnp.transpose(out, (1, 0, 3, 2)).reshape(B, nb * M, 3)
    return [out]


# ----------------------------------------------------------------------------
# parameter init
# ----------------------------------------------------------------------------
def init_pointnet_params(key, K1):
    k1, k2, k3 = jax.random.split(key, 3)
    w1, s1, sh1 = _conv_bn(k1, 3, 64)
    w2, s2, sh2 = _conv_bn(k2, 64, 128)
    w3, s3, sh3 = _conv_bn(k3, 128, K1)
    return dict(w1=w1, s1=s1, sh1=sh1, w2=w2, s2=s2, sh2=sh2,
                w3=w3, s3=s3, sh3=sh3)


def init_axform_params(key, K1, K2, N, num_branch):
    M = 2048 // num_branch
    per = []
    for i in range(num_branch):
        kf, k1, k2, k3, k4 = jax.random.split(jax.random.fold_in(key, i), 5)
        wfc, bfc = _conv(kf, K1, N * K2)
        w1, s1, sh1 = _conv_bn(k1, K2, 64)
        w2, s2, sh2 = _conv_bn(k2, 64, 128)
        w3, b3 = _conv(k3, 128, M)
        w4, b4 = _conv(k4, K2, 3)
        per.append(dict(wfc=wfc, bfc=bfc, w1=w1, s1=s1, sh1=sh1,
                        w2=w2, s2=s2, sh2=sh2, w3=w3, b3=b3, w4=w4, b4=b4))
    stacked = {k: jnp.stack([p[k] for p in per]) for k in per[0]}
    return stacked, M


# ----------------------------------------------------------------------------
# pure-JAX reference (same math, f32 HIGHEST precision) for verification
# ----------------------------------------------------------------------------
def network_reference(x, pn, axp, K2, N, M):
    hi = jax.lax.Precision.HIGHEST
    ein = functools.partial(jnp.einsum, precision=hi)
    h = jax.nn.relu(ein("bpc,cd->bpd", x, pn["w1"]) * pn["s1"] + pn["sh1"])
    h = jax.nn.relu(ein("bpc,cd->bpd", h, pn["w2"]) * pn["s2"] + pn["sh2"])
    h = ein("bpc,cd->bpd", h, pn["w3"]) * pn["s3"] + pn["sh3"]
    feat = jnp.max(h, axis=1)                                           # (B, K1)
    B = x.shape[0]
    nb = axp["wfc"].shape[0]
    outs = []
    for i in range(nb):
        xb = (jnp.dot(feat, axp["wfc"][i], precision=hi) + axp["bfc"][i]).reshape(B, N, K2)
        a = jax.nn.relu(ein("bnk,kc->bnc", xb, axp["w1"][i]) * axp["s1"][i] + axp["sh1"][i])
        a = jax.nn.relu(ein("bnc,cd->bnd", a, axp["w2"][i]) * axp["s2"][i] + axp["sh2"][i])
        a = ein("bnd,dm->bnm", a, axp["w3"][i]) + axp["b3"][i]          # (B, N, M)
        w = jax.nn.softmax(a, axis=1)                                   # over N
        y = ein("bnm,bnk->bmk", w, xb)                                  # (B, M, K2)
        y = ein("bmk,kc->bmc", y, axp["w4"][i]) + axp["b4"][i]          # (B, M, 3)
        outs.append(y)
    return jnp.concatenate(outs, axis=1)


if __name__ == "__main__":
    # opt.hparas = (K1, K2, N), opt.num_branch
    B, P = 2, 16
    K1, K2, N = 32, 16, 32
    num_branch = 2

    key = jax.random.PRNGKey(0)
    kx, kpn, kax = jax.random.split(key, 3)
    x = jax.random.normal(kx, (B, P, 3), jnp.float32)      # point cloud (B, num_points, 3)

    pn_params = init_pointnet_params(kpn, K1)
    ax_params, M = init_axform_params(kax, K1, K2, N, num_branch)

    fwd = jax.jit(functools.partial(network_forward, K2=K2, N=N, M=M))
    out = fwd(x, pn_params, ax_params)[0]
    out = jax.block_until_ready(out)

    # Reference at HIGHEST f32 precision; the kernel uses default MXU precision
    # (per perf review), so the tolerance allows for bf16-pass matmul error.
    ref = network_reference(x, pn_params, ax_params, K2, N, M)
    assert out.shape == (B, num_branch * M, 3), out.shape
    if not jnp.allclose(out, ref, atol=1e-2, rtol=1e-2):
        raise AssertionError(
            f"mismatch vs reference, max abs err {float(jnp.max(jnp.abs(out - ref)))}")
    print("KERNEL_OK")
</pallas_src>

<mosaic_0001>
module attributes {stable_mosaic.version = 11 : i64} {
  func.func @_decoder_kernel(%arg0: i32, %arg1: memref<1x64x16xf32, #tpu.memory_space<vmem>>, %arg2: memref<1x16x64xf32, #tpu.memory_space<vmem>>, %arg3: memref<1x1x64xf32, #tpu.memory_space<vmem>>, %arg4: memref<1x1x64xf32, #tpu.memory_space<vmem>>, %arg5: memref<1x64x128xf32, #tpu.memory_space<vmem>>, %arg6: memref<1x1x128xf32, #tpu.memory_space<vmem>>, %arg7: memref<1x1x128xf32, #tpu.memory_space<vmem>>, %arg8: memref<1x128x1024xf32, #tpu.memory_space<vmem>>, %arg9: memref<1x1x1024xf32, #tpu.memory_space<vmem>>, %arg10: memref<1x3x16xf32, #tpu.memory_space<vmem>>, %arg11: memref<1x3x1xf32, #tpu.memory_space<vmem>>, %arg12: memref<1x2x3x1024xf32, #tpu.memory_space<vmem>>) attributes {dimension_semantics = [#tpu.dimension_semantics<parallel>], iteration_bounds = array<i64: 2>, scalar_prefetch = 0 : i64, scratch_operands = 0 : i64, tpu.core_type = #tpu.core_type<tc>, window_params = [{transform_indices = @transform_0, window_bounds = array<i64: 1, 64, 16>}, {transform_indices = @transform_1, window_bounds = array<i64: 1, 16, 64>}, {transform_indices = @transform_2, window_bounds = array<i64: 1, 1, 64>}, {transform_indices = @transform_3, window_bounds = array<i64: 1, 1, 64>}, {transform_indices = @transform_4, window_bounds = array<i64: 1, 64, 128>}, {transform_indices = @transform_5, window_bounds = array<i64: 1, 1, 128>}, {transform_indices = @transform_6, window_bounds = array<i64: 1, 1, 128>}, {transform_indices = @transform_7, window_bounds = array<i64: 1, 128, 1024>}, {transform_indices = @transform_8, window_bounds = array<i64: 1, 1, 1024>}, {transform_indices = @transform_9, window_bounds = array<i64: 1, 3, 16>}, {transform_indices = @transform_10, window_bounds = array<i64: 1, 3, 1>}, {transform_indices = @transform_11, window_bounds = array<i64: 1, 2, 3, 1024>}]} {
    %c0 = arith.constant 0 : index
    %c0_0 = arith.constant 0 : index
    %c0_1 = arith.constant 0 : index
    %0 = vector.load %arg1[%c0, %c0_0, %c0_1] : memref<1x64x16xf32, #tpu.memory_space<vmem>>, vector<1x64x16xf32>
    %1 = vector.shape_cast %0 : vector<1x64x16xf32> to vector<64x16xf32>
    %c0_2 = arith.constant 0 : index
    %c0_3 = arith.constant 0 : index
    %c0_4 = arith.constant 0 : index
    %2 = vector.load %arg2[%c0_2, %c0_3, %c0_4] : memref<1x16x64xf32, #tpu.memory_space<vmem>>, vector<1x16x64xf32>
    %3 = vector.shape_cast %2 : vector<1x16x64xf32> to vector<16x64xf32>
    %cst = arith.constant dense<0.000000e+00> : vector<64x64xf32>
    %4 = tpu.matmul %1, %3, %cst {dimension_numbers = #tpu.dot_dimension_numbers<[1], [0], [0], [1], [0, 0, 1, 1], [], []>} : vector<64x16xf32>, vector<16x64xf32>, vector<64x64xf32> -> vector<64x64xf32>
    %c0_5 = arith.constant 0 : index
    %c0_6 = arith.constant 0 : index
    %c0_7 = arith.constant 0 : index
    %5 = vector.load %arg3[%c0_5, %c0_6, %c0_7] : memref<1x1x64xf32, #tpu.memory_space<vmem>>, vector<1x1x64xf32>
    %6 = vector.shape_cast %5 : vector<1x1x64xf32> to vector<1x64xf32>
    %7 = vector.broadcast %6 : vector<1x64xf32> to vector<64x64xf32>
    %8 = arith.mulf %4, %7 : vector<64x64xf32>
    %c0_8 = arith.constant 0 : index
    %c0_9 = arith.constant 0 : index
    %c0_10 = arith.constant 0 : index
    %9 = vector.load %arg4[%c0_8, %c0_9, %c0_10] : memref<1x1x64xf32, #tpu.memory_space<vmem>>, vector<1x1x64xf32>
    %10 = vector.shape_cast %9 : vector<1x1x64xf32> to vector<1x64xf32>
    %11 = vector.broadcast %10 : vector<1x64xf32> to vector<64x64xf32>
    %12 = arith.addf %8, %11 : vector<64x64xf32>
    %cst_11 = arith.constant 0.000000e+00 : f32
    %13 = vector.broadcast %cst_11 : f32 to vector<64x64xf32>
    %14 = arith.maximumf %12, %13 : vector<64x64xf32>
    %c0_12 = arith.constant 0 : index
    %c0_13 = arith.constant 0 : index
    %c0_14 = arith.constant 0 : index
    %15 = vector.load %arg5[%c0_12, %c0_13, %c0_14] : memref<1x64x128xf32, #tpu.memory_space<vmem>>, vector<1x64x128xf32>
    %16 = vector.shape_cast %15 : vector<1x64x128xf32> to vector<64x128xf32>
    %cst_15 = arith.constant dense<0.000000e+00> : vector<64x128xf32>
    %17 = tpu.matmul %14, %16, %cst_15 {dimension_numbers = #tpu.dot_dimension_numbers<[1], [0], [0], [1], [0, 0, 1, 1], [], []>} : vector<64x64xf32>, vector<64x128xf32>, vector<64x128xf32> -> vector<64x128xf32>
    %c0_16 = arith.constant 0 : index
    %c0_17 = arith.constant 0 : index
    %c0_18 = arith.constant 0 : index
    %18 = vector.load %arg6[%c0_16, %c0_17, %c0_18] : memref<1x1x128xf32, #tpu.memory_space<vmem>>, vector<1x1x128xf32>
    %19 = vector.shape_cast %18 : vector<1x1x128xf32> to vector<1x128xf32>
    %20 = vector.broadcast %19 : vector<1x128xf32> to vector<64x128xf32>
    %21 = arith.mulf %17, %20 : vector<64x128xf32>
    %c0_19 = arith.constant 0 : index
    %c0_20 = arith.constant 0 : index
    %c0_21 = arith.constant 0 : index
    %22 = vector.load %arg7[%c0_19, %c0_20, %c0_21] : memref<1x1x128xf32, #tpu.memory_space<vmem>>, vector<1x1x128xf32>
    %23 = vector.shape_cast %22 : vector<1x1x128xf32> to vector<1x128xf32>
    %24 = vector.broadcast %23 : vector<1x128xf32> to vector<64x128xf32>
    %25 = arith.addf %21, %24 : vector<64x128xf32>
    %cst_22 = arith.constant 0.000000e+00 : f32
    %26 = vector.broadcast %cst_22 : f32 to vector<64x128xf32>
    %27 = arith.maximumf %25, %26 : vector<64x128xf32>
    %28 = vector.extract_strided_slice %27 {offsets = [0, 0], sizes = [32, 128], strides = [1, 1]} : vector<64x128xf32> to vector<32x128xf32>
    %c0_23 = arith.constant 0 : index
    %c0_24 = arith.constant 0 : index
    %c0_25 = arith.constant 0 : index
    %29 = vector.load %arg8[%c0_23, %c0_24, %c0_25] : memref<1x128x1024xf32, #tpu.memory_space<vmem>>, vector<1x128x1024xf32>
    %30 = vector.shape_cast %29 : vector<1x128x1024xf32> to vector<128x1024xf32>
    %cst_26 = arith.constant dense<0.000000e+00> : vector<32x1024xf32>
    %31 = tpu.matmul %28, %30, %cst_26 {dimension_numbers = #tpu.dot_dimension_numbers<[1], [0], [0], [1], [0, 0, 1, 1], [], []>} : vector<32x128xf32>, vector<128x1024xf32>, vector<32x1024xf32> -> vector<32x1024xf32>
    %c0_27 = arith.constant 0 : index
    %c0_28 = arith.constant 0 : index
    %c0_29 = arith.constant 0 : index
    %32 = vector.load %arg9[%c0_27, %c0_28, %c0_29] : memref<1x1x1024xf32, #tpu.memory_space<vmem>>, vector<1x1x1024xf32>
    %33 = vector.shape_cast %32 : vector<1x1x1024xf32> to vector<1x1024xf32>
    %34 = vector.broadcast %33 : vector<1x1024xf32> to vector<32x1024xf32>
    %35 = arith.addf %31, %34 : vector<32x1024xf32>
    %cst_30 = arith.constant dense<0xFF800000> : vector<1024xf32>
    %36 = vector.multi_reduction <maximumf>, %35, %cst_30 [0] : vector<32x1024xf32> to vector<1024xf32>
    %37 = vector.shape_cast %36 : vector<1024xf32> to vector<1x1024xf32>
    %38 = vector.broadcast %37 : vector<1x1024xf32> to vector<32x1024xf32>
    %39 = arith.subf %35, %38 : vector<32x1024xf32>
    %40 = math.exp %39 : vector<32x1024xf32>
    %cst_31 = arith.constant dense<0.000000e+00> : vector<1024xf32>
    %41 = vector.multi_reduction <add>, %40, %cst_31 [0] : vector<32x1024xf32> to vector<1024xf32>
    %42 = vector.shape_cast %41 : vector<1024xf32> to vector<1x1024xf32>
    %43 = tpu.reciprocal %42 {approx = true} : vector<1x1024xf32> -> vector<1x1024xf32>
    %44 = vector.broadcast %43 : vector<1x1024xf32> to vector<32x1024xf32>
    %45 = arith.mulf %40, %44 : vector<32x1024xf32>
    %46 = vector.extract_strided_slice %1 {offsets = [0, 0], sizes = [32, 16], strides = [1, 1]} : vector<64x16xf32> to vector<32x16xf32>
    %cst_32 = arith.constant dense<0.000000e+00> : vector<16x1024xf32>
    %47 = tpu.matmul %46, %45, %cst_32 {dimension_numbers = #tpu.dot_dimension_numbers<[0], [0], [1], [1], [0, 1, 1, 1], [], []>} : vector<32x16xf32>, vector<32x1024xf32>, vector<16x1024xf32> -> vector<16x1024xf32>
    %c0_33 = arith.constant 0 : index
    %c0_34 = arith.constant 0 : index
    %c0_35 = arith.constant 0 : index
    %48 = vector.load %arg10[%c0_33, %c0_34, %c0_35] : memref<1x3x16xf32, #tpu.memory_space<vmem>>, vector<1x3x16xf32>
    %49 = vector.shape_cast %48 : vector<1x3x16xf32> to vector<3x16xf32>
    %cst_36 = arith.constant dense<0.000000e+00> : vector<3x1024xf32>
    %50 = tpu.matmul %49, %47, %cst_36 {dimension_numbers = #tpu.dot_dimension_numbers<[1], [0], [0], [1], [0, 0, 1, 1], [], []>} : vector<3x16xf32>, vector<16x1024xf32>, vector<3x1024xf32> -> vector<3x1024xf32>
    %c0_37 = arith.constant 0 : index
    %c0_38 = arith.constant 0 : index
    %c0_39 = arith.constant 0 : index
    %51 = vector.load %arg11[%c0_37, %c0_38, %c0_39] : memref<1x3x1xf32, #tpu.memory_space<vmem>>, vector<1x3x1xf32>
    %52 = vector.shape_cast %51 : vector<1x3x1xf32> to vector<3x1xf32>
    %53 = vector.broadcast %52 : vector<3x1xf32> to vector<3x1024xf32>
    %54 = arith.addf %50, %53 : vector<3x1024xf32>
    %c0_40 = arith.constant 0 : index
    %c0_41 = arith.constant 0 : index
    %c0_42 = arith.constant 0 : index
    %c0_43 = arith.constant 0 : index
    %55 = vector.load %arg12[%c0_40, %c0_41, %c0_42, %c0_43] : memref<1x2x3x1024xf32, #tpu.memory_space<vmem>>, vector<1x1x3x1024xf32>
    %56 = vector.shape_cast %55 : vector<1x1x3x1024xf32> to vector<3x1024xf32>
    %57 = vector.shape_cast %54 : vector<3x1024xf32> to vector<1x1x3x1024xf32>
    tpu.vector_store %arg12[%c0_40, %c0_41, %c0_42, %c0_43], %57 {strides = array<i32>} : memref<1x2x3x1024xf32, #tpu.memory_space<vmem>>, vector<1x1x3x1024xf32>,
    %58 = vector.extract_strided_slice %27 {offsets = [32, 0], sizes = [32, 128], strides = [1, 1]} : vector<64x128xf32> to vector<32x128xf32>
    %c0_44 = arith.constant 0 : index
    %c0_45 = arith.constant 0 : index
    %c0_46 = arith.constant 0 : index
    %59 = vector.load %arg8[%c0_44, %c0_45, %c0_46] : memref<1x128x1024xf32, #tpu.memory_space<vmem>>, vector<1x128x1024xf32>
    %60 = vector.shape_cast %59 : vector<1x128x1024xf32> to vector<128x1024xf32>
    %cst_47 = arith.constant dense<0.000000e+00> : vector<32x1024xf32>
    %61 = tpu.matmul %58, %60, %cst_47 {dimension_numbers = #tpu.dot_dimension_numbers<[1], [0], [0], [1], [0, 0, 1, 1], [], []>} : vector<32x128xf32>, vector<128x1024xf32>, vector<32x1024xf32> -> vector<32x1024xf32>
    %c0_48 = arith.constant 0 : index
    %c0_49 = arith.constant 0 : index
    %c0_50 = arith.constant 0 : index
    %62 = vector.load %arg9[%c0_48, %c0_49, %c0_50] : memref<1x1x1024xf32, #tpu.memory_space<vmem>>, vector<1x1x1024xf32>
    %63 = vector.shape_cast %62 : vector<1x1x1024xf32> to vector<1x1024xf32>
    %64 = vector.broadcast %63 : vector<1x1024xf32> to vector<32x1024xf32>
    %65 = arith.addf %61, %64 : vector<32x1024xf32>
    %cst_51 = arith.constant dense<0xFF800000> : vector<1024xf32>
    %66 = vector.multi_reduction <maximumf>, %65, %cst_51 [0] : vector<32x1024xf32> to vector<1024xf32>
    %67 = vector.shape_cast %66 : vector<1024xf32> to vector<1x1024xf32>
    %68 = vector.broadcast %67 : vector<1x1024xf32> to vector<32x1024xf32>
    %69 = arith.subf %65, %68 : vector<32x1024xf32>
    %70 = math.exp %69 : vector<32x1024xf32>
    %cst_52 = arith.constant dense<0.000000e+00> : vector<1024xf32>
    %71 = vector.multi_reduction <add>, %70, %cst_52 [0] : vector<32x1024xf32> to vector<1024xf32>
    %72 = vector.shape_cast %71 : vector<1024xf32> to vector<1x1024xf32>
    %73 = tpu.reciprocal %72 {approx = true} : vector<1x1024xf32> -> vector<1x1024xf32>
    %74 = vector.broadcast %73 : vector<1x1024xf32> to vector<32x1024xf32>
    %75 = arith.mulf %70, %74 : vector<32x1024xf32>
    %76 = vector.extract_strided_slice %1 {offsets = [32, 0], sizes = [32, 16], strides = [1, 1]} : vector<64x16xf32> to vector<32x16xf32>
    %cst_53 = arith.constant dense<0.000000e+00> : vector<16x1024xf32>
    %77 = tpu.matmul %76, %75, %cst_53 {dimension_numbers = #tpu.dot_dimension_numbers<[0], [0], [1], [1], [0, 1, 1, 1], [], []>} : vector<32x16xf32>, vector<32x1024xf32>, vector<16x1024xf32> -> vector<16x1024xf32>
    %c0_54 = arith.constant 0 : index
    %c0_55 = arith.constant 0 : index
    %c0_56 = arith.constant 0 : index
    %78 = vector.load %arg10[%c0_54, %c0_55, %c0_56] : memref<1x3x16xf32, #tpu.memory_space<vmem>>, vector<1x3x16xf32>
    %79 = vector.shape_cast %78 : vector<1x3x16xf32> to vector<3x16xf32>
    %cst_57 = arith.constant dense<0.000000e+00> : vector<3x1024xf32>
    %80 = tpu.matmul %79, %77, %cst_57 {dimension_numbers = #tpu.dot_dimension_numbers<[1], [0], [0], [1], [0, 0, 1, 1], [], []>} : vector<3x16xf32>, vector<16x1024xf32>, vector<3x1024xf32> -> vector<3x1024xf32>
    %c0_58 = arith.constant 0 : index
    %c0_59 = arith.constant 0 : index
    %c0_60 = arith.constant 0 : index
    %81 = vector.load %arg11[%c0_58, %c0_59, %c0_60] : memref<1x3x1xf32, #tpu.memory_space<vmem>>, vector<1x3x1xf32>
    %82 = vector.shape_cast %81 : vector<1x3x1xf32> to vector<3x1xf32>
    %83 = vector.broadcast %82 : vector<3x1xf32> to vector<3x1024xf32>
    %84 = arith.addf %80, %83 : vector<3x1024xf32>
    %c0_61 = arith.constant 0 : index
    %c1 = arith.constant 1 : index
    %c0_62 = arith.constant 0 : index
    %c0_63 = arith.constant 0 : index
    %85 = vector.load %arg12[%c0_61, %c1, %c0_62, %c0_63] : memref<1x2x3x1024xf32, #tpu.memory_space<vmem>>, vector<1x1x3x1024xf32>
    %86 = vector.shape_cast %85 : vector<1x1x3x1024xf32> to vector<3x1024xf32>
    %87 = vector.shape_cast %84 : vector<3x1024xf32> to vector<1x1x3x1024xf32>
    tpu.vector_store %arg12[%c0_61, %c1, %c0_62, %c0_63], %87 {strides = array<i32>} : memref<1x2x3x1024xf32, #tpu.memory_space<vmem>>, vector<1x1x3x1024xf32>,
    return
  }
  func.func @transform_0(%arg0: i32) -> (i32, i32, i32) {
    %c0_i32 = arith.constant 0 : i32
    %c0_i32_0 = arith.constant 0 : i32
    %c0_i32_1 = arith.constant 0 : i32
    return %arg0, %c0_i32, %c0_i32_0 : i32, i32, i32
  }
  func.func @transform_1(%arg0: i32) -> (i32, i32, i32) {
    %c0_i32 = arith.constant 0 : i32
    %c0_i32_0 = arith.constant 0 : i32
    %c0_i32_1 = arith.constant 0 : i32
    return %arg0, %c0_i32, %c0_i32_0 : i32, i32, i32
  }
  func.func @transform_2(%arg0: i32) -> (i32, i32, i32) {
    %c0_i32 = arith.constant 0 : i32
    %c0_i32_0 = arith.constant 0 : i32
    %c0_i32_1 = arith.constant 0 : i32
    return %arg0, %c0_i32, %c0_i32_0 : i32, i32, i32
  }
  func.func @transform_3(%arg0: i32) -> (i32, i32, i32) {
    %c0_i32 = arith.constant 0 : i32
    %c0_i32_0 = arith.constant 0 : i32
    %c0_i32_1 = arith.constant 0 : i32
    return %arg0, %c0_i32, %c0_i32_0 : i32, i32, i32
  }
  func.func @transform_4(%arg0: i32) -> (i32, i32, i32) {
    %c0_i32 = arith.constant 0 : i32
    %c0_i32_0 = arith.constant 0 : i32
    %c0_i32_1 = arith.constant 0 : i32
    return %arg0, %c0_i32, %c0_i32_0 : i32, i32, i32
  }
  func.func @transform_5(%arg0: i32) -> (i32, i32, i32) {
    %c0_i32 = arith.constant 0 : i32
    %c0_i32_0 = arith.constant 0 : i32
    %c0_i32_1 = arith.constant 0 : i32
    return %arg0, %c0_i32, %c0_i32_0 : i32, i32, i32
  }
  func.func @transform_6(%arg0: i32) -> (i32, i32, i32) {
    %c0_i32 = arith.constant 0 : i32
    %c0_i32_0 = arith.constant 0 : i32
    %c0_i32_1 = arith.constant 0 : i32
    return %arg0, %c0_i32, %c0_i32_0 : i32, i32, i32
  }
  func.func @transform_7(%arg0: i32) -> (i32, i32, i32) {
    %c0_i32 = arith.constant 0 : i32
    %c0_i32_0 = arith.constant 0 : i32
    %c0_i32_1 = arith.constant 0 : i32
    return %arg0, %c0_i32, %c0_i32_0 : i32, i32, i32
  }
  func.func @transform_8(%arg0: i32) -> (i32, i32, i32) {
    %c0_i32 = arith.constant 0 : i32
    %c0_i32_0 = arith.constant 0 : i32
    %c0_i32_1 = arith.constant 0 : i32
    return %arg0, %c0_i32, %c0_i32_0 : i32, i32, i32
  }
  func.func @transform_9(%arg0: i32) -> (i32, i32, i32) {
    %c0_i32 = arith.constant 0 : i32
    %c0_i32_0 = arith.constant 0 : i32
    %c0_i32_1 = arith.constant 0 : i32
    return %arg0, %c0_i32, %c0_i32_0 : i32, i32, i32
  }
  func.func @transform_10(%arg0: i32) -> (i32, i32, i32) {
    %c0_i32 = arith.constant 0 : i32
    %c0_i32_0 = arith.constant 0 : i32
    %c0_i32_1 = arith.constant 0 : i32
    return %arg0, %c0_i32, %c0_i32_0 : i32, i32, i32
  }
  func.func @transform_11(%arg0: i32) -> (i32, i32, i32, i32) {
    %c0_i32 = arith.constant 0 : i32
    %c0_i32_0 = arith.constant 0 : i32
    %c0_i32_1 = arith.constant 0 : i32
    %c0_i32_2 = arith.constant 0 : i32
    return %arg0, %c0_i32, %c0_i32_0, %c0_i32_1 : i32, i32, i32, i32
  }
}

module attributes {stable_mosaic.version = 11 : i64} {
  func.func @_encoder_kernel(%arg0: i32, %arg1: memref<32x3xf32, #tpu.memory_space<vmem>>, %arg2: memref<3x64xf32, #tpu.memory_space<vmem>>, %arg3: memref<1x64xf32, #tpu.memory_space<vmem>>, %arg4: memref<1x64xf32, #tpu.memory_space<vmem>>, %arg5: memref<64x128xf32, #tpu.memory_space<vmem>>, %arg6: memref<1x128xf32, #tpu.memory_space<vmem>>, %arg7: memref<1x128xf32, #tpu.memory_space<vmem>>, %arg8: memref<128x32xf32, #tpu.memory_space<vmem>>, %arg9: memref<1x32xf32, #tpu.memory_space<vmem>>, %arg10: memref<1x32xf32, #tpu.memory_space<vmem>>, %arg11: memref<1x32x512xf32, #tpu.memory_space<vmem>>, %arg12: memref<1x1x512xf32, #tpu.memory_space<vmem>>, %arg13: memref<1x2x512xf32, #tpu.memory_space<vmem>>) attributes {dimension_semantics = [#tpu.dimension_semantics<parallel>], iteration_bounds = array<i64: 2>, scalar_prefetch = 0 : i64, scratch_operands = 0 : i64, tpu.core_type = #tpu.core_type<tc>, window_params = [{pipeline_mode = #tpu.pipeline_mode<synchronous>, transform_indices = @transform_0, window_bounds = array<i64: 32, 3>}, {pipeline_mode = #tpu.pipeline_mode<synchronous>, transform_indices = @transform_1, window_bounds = array<i64: 3, 64>}, {pipeline_mode = #tpu.pipeline_mode<synchronous>, transform_indices = @transform_2, window_bounds = array<i64: 1, 64>}, {pipeline_mode = #tpu.pipeline_mode<synchronous>, transform_indices = @transform_3, window_bounds = array<i64: 1, 64>}, {pipeline_mode = #tpu.pipeline_mode<synchronous>, transform_indices = @transform_4, window_bounds = array<i64: 64, 128>}, {pipeline_mode = #tpu.pipeline_mode<synchronous>, transform_indices = @transform_5, window_bounds = array<i64: 1, 128>}, {pipeline_mode = #tpu.pipeline_mode<synchronous>, transform_indices = @transform_6, window_bounds = array<i64: 1, 128>}, {pipeline_mode = #tpu.pipeline_mode<synchronous>, transform_indices = @transform_7, window_bounds = array<i64: 128, 32>}, {pipeline_mode = #tpu.pipeline_mode<synchronous>, transform_indices = @transform_8, window_bounds = array<i64: 1, 32>}, {pipeline_mode = #tpu.pipeline_mode<synchronous>, transform_indices = @transform_9, window_bounds = array<i64: 1, 32>}, {transform_indices = @transform_10, window_bounds = array<i64: 1, 32, 512>}, {transform_indices = @transform_11, window_bounds = array<i64: 1, 1, 512>}, {transform_indices = @transform_12, window_bounds = array<i64: 1, 2, 512>}]} {
    %c0 = arith.constant 0 : index
    %c0_0 = arith.constant 0 : index
    %0 = vector.load %arg1[%c0, %c0_0] : memref<32x3xf32, #tpu.memory_space<vmem>>, vector<32x3xf32>
    %c0_1 = arith.constant 0 : index
    %c0_2 = arith.constant 0 : index
    %1 = vector.load %arg2[%c0_1, %c0_2] : memref<3x64xf32, #tpu.memory_space<vmem>>, vector<3x64xf32>
    %cst = arith.constant dense<0.000000e+00> : vector<32x64xf32>
    %2 = tpu.matmul %0, %1, %cst {dimension_numbers = #tpu.dot_dimension_numbers<[1], [0], [0], [1], [0, 0, 1, 1], [], []>} : vector<32x3xf32>, vector<3x64xf32>, vector<32x64xf32> -> vector<32x64xf32>
    %c0_3 = arith.constant 0 : index
    %c0_4 = arith.constant 0 : index
    %3 = vector.load %arg3[%c0_3, %c0_4] : memref<1x64xf32, #tpu.memory_space<vmem>>, vector<1x64xf32>
    %4 = vector.broadcast %3 : vector<1x64xf32> to vector<32x64xf32>
    %5 = arith.mulf %2, %4 : vector<32x64xf32>
    %c0_5 = arith.constant 0 : index
    %c0_6 = arith.constant 0 : index
    %6 = vector.load %arg4[%c0_5, %c0_6] : memref<1x64xf32, #tpu.memory_space<vmem>>, vector<1x64xf32>
    %7 = vector.broadcast %6 : vector<1x64xf32> to vector<32x64xf32>
    %8 = arith.addf %5, %7 : vector<32x64xf32>
    %cst_7 = arith.constant 0.000000e+00 : f32
    %9 = vector.broadcast %cst_7 : f32 to vector<32x64xf32>
    %10 = arith.maximumf %8, %9 : vector<32x64xf32>
    %c0_8 = arith.constant 0 : index
    %c0_9 = arith.constant 0 : index
    %11 = vector.load %arg5[%c0_8, %c0_9] : memref<64x128xf32, #tpu.memory_space<vmem>>, vector<64x128xf32>
    %cst_10 = arith.constant dense<0.000000e+00> : vector<32x128xf32>
    %12 = tpu.matmul %10, %11, %cst_10 {dimension_numbers = #tpu.dot_dimension_numbers<[1], [0], [0], [1], [0, 0, 1, 1], [], []>} : vector<32x64xf32>, vector<64x128xf32>, vector<32x128xf32> -> vector<32x128xf32>
    %c0_11 = arith.constant 0 : index
    %c0_12 = arith.constant 0 : index
    %13 = vector.load %arg6[%c0_11, %c0_12] : memref<1x128xf32, #tpu.memory_space<vmem>>, vector<1x128xf32>
    %14 = vector.broadcast %13 : vector<1x128xf32> to vector<32x128xf32>
    %15 = arith.mulf %12, %14 : vector<32x128xf32>
    %c0_13 = arith.constant 0 : index
    %c0_14 = arith.constant 0 : index
    %16 = vector.load %arg7[%c0_13, %c0_14] : memref<1x128xf32, #tpu.memory_space<vmem>>, vector<1x128xf32>
    %17 = vector.broadcast %16 : vector<1x128xf32> to vector<32x128xf32>
    %18 = arith.addf %15, %17 : vector<32x128xf32>
    %cst_15 = arith.constant 0.000000e+00 : f32
    %19 = vector.broadcast %cst_15 : f32 to vector<32x128xf32>
    %20 = arith.maximumf %18, %19 : vector<32x128xf32>
    %c0_16 = arith.constant 0 : index
    %c0_17 = arith.constant 0 : index
    %21 = vector.load %arg8[%c0_16, %c0_17] : memref<128x32xf32, #tpu.memory_space<vmem>>, vector<128x32xf32>
    %cst_18 = arith.constant dense<0.000000e+00> : vector<32x32xf32>
    %22 = tpu.matmul %20, %21, %cst_18 {dimension_numbers = #tpu.dot_dimension_numbers<[1], [0], [0], [1], [0, 0, 1, 1], [], []>} : vector<32x128xf32>, vector<128x32xf32>, vector<32x32xf32> -> vector<32x32xf32>
    %c0_19 = arith.constant 0 : index
    %c0_20 = arith.constant 0 : index
    %23 = vector.load %arg9[%c0_19, %c0_20] : memref<1x32xf32, #tpu.memory_space<vmem>>, vector<1x32xf32>
    %24 = vector.broadcast %23 : vector<1x32xf32> to vector<32x32xf32>
    %25 = arith.mulf %22, %24 : vector<32x32xf32>
    %c0_21 = arith.constant 0 : index
    %c0_22 = arith.constant 0 : index
    %26 = vector.load %arg10[%c0_21, %c0_22] : memref<1x32xf32, #tpu.memory_space<vmem>>, vector<1x32xf32>
    %27 = vector.broadcast %26 : vector<1x32xf32> to vector<32x32xf32>
    %28 = arith.addf %25, %27 : vector<32x32xf32>
    %29 = vector.extract_strided_slice %28 {offsets = [0, 0], sizes = [16, 32], strides = [1, 1]} : vector<32x32xf32> to vector<16x32xf32>
    %cst_23 = arith.constant dense<0xFF800000> : vector<32xf32>
    %30 = vector.multi_reduction <maximumf>, %29, %cst_23 [0] : vector<16x32xf32> to vector<32xf32>
    %31 = vector.shape_cast %30 : vector<32xf32> to vector<1x32xf32>
    %32 = vector.extract_strided_slice %28 {offsets = [16, 0], sizes = [16, 32], strides = [1, 1]} : vector<32x32xf32> to vector<16x32xf32>
    %cst_24 = arith.constant dense<0xFF800000> : vector<32xf32>
    %33 = vector.multi_reduction <maximumf>, %32, %cst_24 [0] : vector<16x32xf32> to vector<32xf32>
    %34 = vector.shape_cast %33 : vector<32xf32> to vector<1x32xf32>
    %35 = tpu.concatenate %31, %34 in 0 : vector<1x32xf32>, vector<1x32xf32> -> vector<2x32xf32>
    %c0_25 = arith.constant 0 : index
    %c0_26 = arith.constant 0 : index
    %c0_27 = arith.constant 0 : index
    %36 = vector.load %arg11[%c0_25, %c0_26, %c0_27] : memref<1x32x512xf32, #tpu.memory_space<vmem>>, vector<1x32x512xf32>
    %37 = vector.shape_cast %36 : vector<1x32x512xf32> to vector<32x512xf32>
    %cst_28 = arith.constant dense<0.000000e+00> : vector<2x512xf32>
    %38 = tpu.matmul %35, %37, %cst_28 {dimension_numbers = #tpu.dot_dimension_numbers<[1], [0], [0], [1], [0, 0, 1, 1], [], []>} : vector<2x32xf32>, vector<32x512xf32>, vector<2x512xf32> -> vector<2x512xf32>
    %c0_29 = arith.constant 0 : index
    %c0_30 = arith.constant 0 : index
    %c0_31 = arith.constant 0 : index
    %39 = vector.load %arg12[%c0_29, %c0_30, %c0_31] : memref<1x1x512xf32, #tpu.memory_space<vmem>>, vector<1x1x512xf32>
    %40 = vector.shape_cast %39 : vector<1x1x512xf32> to vector<1x512xf32>
    %41 = vector.broadcast %40 : vector<1x512xf32> to vector<2x512xf32>
    %42 = arith.addf %38, %41 : vector<2x512xf32>
    %c0_32 = arith.constant 0 : index
    %c0_33 = arith.constant 0 : index
    %c0_34 = arith.constant 0 : index
    %43 = vector.load %arg13[%c0_32, %c0_33, %c0_34] : memref<1x2x512xf32, #tpu.memory_space<vmem>>, vector<1x2x512xf32>
    %44 = vector.shape_cast %43 : vector<1x2x512xf32> to vector<2x512xf32>
    %45 = vector.shape_cast %42 : vector<2x512xf32> to vector<1x2x512xf32>
    tpu.vector_store %arg13[%c0_32, %c0_33, %c0_34], %45 {strides = array<i32>} : memref<1x2x512xf32, #tpu.memory_space<vmem>>, vector<1x2x512xf32>,
    return
  }
  func.func @transform_0(%arg0: i32) -> (i32, i32) {
    %c0_i32 = arith.constant 0 : i32
    %c0_i32_0 = arith.constant 0 : i32
    %c0_i32_1 = arith.constant 0 : i32
    return %c0_i32, %c0_i32_0 : i32, i32
  }
  func.func @transform_1(%arg0: i32) -> (i32, i32) {
    %c0_i32 = arith.constant 0 : i32
    %c0_i32_0 = arith.constant 0 : i32
    %c0_i32_1 = arith.constant 0 : i32
    return %c0_i32, %c0_i32_0 : i32, i32
  }
  func.func @transform_2(%arg0: i32) -> (i32, i32) {
    %c0_i32 = arith.constant 0 : i32
    %c0_i32_0 = arith.constant 0 : i32
    %c0_i32_1 = arith.constant 0 : i32
    return %c0_i32, %c0_i32_0 : i32, i32
  }
  func.func @transform_3(%arg0: i32) -> (i32, i32) {
    %c0_i32 = arith.constant 0 : i32
    %c0_i32_0 = arith.constant 0 : i32
    %c0_i32_1 = arith.constant 0 : i32
    return %c0_i32, %c0_i32_0 : i32, i32
  }
  func.func @transform_4(%arg0: i32) -> (i32, i32) {
    %c0_i32 = arith.constant 0 : i32
    %c0_i32_0 = arith.constant 0 : i32
    %c0_i32_1 = arith.constant 0 : i32
    return %c0_i32, %c0_i32_0 : i32, i32
  }
  func.func @transform_5(%arg0: i32) -> (i32, i32) {
    %c0_i32 = arith.constant 0 : i32
    %c0_i32_0 = arith.constant 0 : i32
    %c0_i32_1 = arith.constant 0 : i32
    return %c0_i32, %c0_i32_0 : i32, i32
  }
  func.func @transform_6(%arg0: i32) -> (i32, i32) {
    %c0_i32 = arith.constant 0 : i32
    %c0_i32_0 = arith.constant 0 : i32
    %c0_i32_1 = arith.constant 0 : i32
    return %c0_i32, %c0_i32_0 : i32, i32
  }
  func.func @transform_7(%arg0: i32) -> (i32, i32) {
    %c0_i32 = arith.constant 0 : i32
    %c0_i32_0 = arith.constant 0 : i32
    %c0_i32_1 = arith.constant 0 : i32
    return %c0_i32, %c0_i32_0 : i32, i32
  }
  func.func @transform_8(%arg0: i32) -> (i32, i32) {
    %c0_i32 = arith.constant 0 : i32
    %c0_i32_0 = arith.constant 0 : i32
    %c0_i32_1 = arith.constant 0 : i32
    return %c0_i32, %c0_i32_0 : i32, i32
  }
  func.func @transform_9(%arg0: i32) -> (i32, i32) {
    %c0_i32 = arith.constant 0 : i32
    %c0_i32_0 = arith.constant 0 : i32
    %c0_i32_1 = arith.constant 0 : i32
    return %c0_i32, %c0_i32_0 : i32, i32
  }
  func.func @transform_10(%arg0: i32) -> (i32, i32, i32) {
    %c0_i32 = arith.constant 0 : i32
    %c0_i32_0 = arith.constant 0 : i32
    %c0_i32_1 = arith.constant 0 : i32
    return %arg0, %c0_i32, %c0_i32_0 : i32, i32, i32
  }
  func.func @transform_11(%arg0: i32) -> (i32, i32, i32) {
    %c0_i32 = arith.constant 0 : i32
    %c0_i32_0 = arith.constant 0 : i32
    %c0_i32_1 = arith.constant 0 : i32
    return %arg0, %c0_i32, %c0_i32_0 : i32, i32, i32
  }
  func.func @transform_12(%arg0: i32) -> (i32, i32, i32) {
    %c0_i32 = arith.constant 0 : i32
    %c0_i32_0 = arith.constant 0 : i32
    %c0_i32_1 = arith.constant 0 : i32
    return %arg0, %c0_i32, %c0_i32_0 : i32, i32, i32
  }
}

</mosaic_0001>

<bundles_post_ra>
// kernel: network_forward.2
= control target key start
LH: loop header
LB: loop body
LE: loop exit
PB: predicated region body
PF: predicated region fallthrough
CT: control target
= control target key end

     0   :  { %17 = vsyncpa [#allocation3], 0  ;;  %s1475_s21 = smov 0   ;;  %s1648_s0 = inlined_call_operand.vmem [shape: f32[32,3], index: 0, kind: input, shape index: {}]   ;;  %s1649_s1 = inlined_call_operand.vmem [shape: f32[3,64], index: 1, kind: input, shape index: {}]   ;;  %s1650_s2 = inlined_call_operand.vmem [shape: f32[1,64], index: 2, kind: input, shape index: {}]   ;;  %s1651_s3 = inlined_call_operand.vmem [shape: f32[1,64], index: 3, kind: input, shape index: {}]   ;;  %s1652_s4 = inlined_call_operand.hbm [shape: f32[64,128], index: 4, kind: input, shape index: {}]   ;;  %s1653_s5 = inlined_call_operand.vmem [shape: f32[1,128], index: 5, kind: input, shape index: {}]   ;;  %s1654_s6 = inlined_call_operand.vmem [shape: f32[1,128], index: 6, kind: input, shape index: {}]   ;;  %s1655_s7 = inlined_call_operand.vmem [shape: f32[128,32], index: 7, kind: input, shape index: {}]   ;;  %s1656_s8 = inlined_call_operand.vmem [shape: f32[1,32], index: 8, kind: input, shape index: {}]   ;;  %s1657_s9 = inlined_call_operand.vmem [shape: f32[1,32], index: 9, kind: input, shape index: {}]   ;;  %s1658_s10 = inlined_call_operand.vmem [shape: f32[2,32,512], index: 10, kind: input, shape index: {}]   ;;  %s1659_s11 = inlined_call_operand.vmem [shape: f32[2,1,512], index: 11, kind: input, shape index: {}]   ;;  %s1660_s12 = inlined_call_operand.vmem [shape: f32[2,2,512], index: 12, kind: output, shape index: {}]  }
   0x1 LB: > { %s1481_s22 = sadd.s32 4294967295, %s1403_s21   ;;  %p1142_p0 = scmp.ge.s32.totalorder %s1403_s21, 1  ;;  %s1403_s21 = sphi %s1475_s21, %s23_s21  }
   0x2   : > { %p316_p1 = scmp.lt.s32.totalorder %s1403_s21, 3  ;;  %s1405_s23 = smov [#allocation2]  }
   0x3   : > { %s340_s24 = sshll.u32 %s1405_s23, 4  ;;  %p1661_p3 = scmp.eq.s32.totalorder %s1481_s22, 0  ;;  %s341_s24 = int_to_ptr.vmem [resolvable:$true] %s340_s24 }
   0x4   : > { %p1485_p2 = pnand %p1142_p0, %p316_p1  ;;  %s1365_s29 = scalar_lea.hbm %s1652_s4, 1024 }
   0x5   : > { %p1366_p6 = scmp.ne.s32.totalorder %s1652_s4, %s1365_s29  ;;  %p1372_p10 = scmp.lt.u32.totalorder %s1365_s29, %s1652_s4 }
   0x6   : > { %s1663_s25 = scalar_select %p1485_p2, 1, 0 }
   0x7   : > { %p1346_p4 = pneg %p1485_p2 }
   0x9   : > { %p1494_p5 = pnand %p1661_p3, %p1346_p4 }
   0xb   : > { %p1367_p7 = pneg %p1494_p5 }
   0xd   : > { %p1368_p8 = pnand %p1367_p7, %p1366_p6 }
   0xf   : > { %p1369_p9 = pneg %p1368_p8 }
  0x11   : > { %p1374_p11 = pnand %p1372_p10, %p1369_p9 }
  0x13   : > { %1377 = shalt.err (!%p1374_p11)
}
  0x14   : > { %s1378_s16 = scalar_lea.vmem %s341_s24, 1024  ;;  %p1386_p1 = scmp.lt.s32.totalorder %s341_s24, %s341_s24 }
  0x15   : > { %p1379_p12 = scmp.ne.s32.totalorder %s341_s24, %s1378_s16  ;;  %p1387_p4 = scmp.lt.s32.totalorder %s1378_s16, %s1378_s16 }
  0x17   : > { %p1381_p13 = pnand %p1379_p12, %p1367_p7  ;;  %p1388_p3 = por %p1387_p4, %p1386_p1 }
  0x19   : > { %p1382_p0 = pneg %p1381_p13 }
  0x1b   : > { %p1389_p2 = pnand %p1388_p3, %p1382_p0 }
  0x1d   : > { %1392 = shalt.err (!%p1389_p2)
}
  0x1e   : > { %s1406_s17 = smov 128   ;;  %s1407_s18 = smov 8  }
  0x1f   : > { %1349 = dma.hbm_to_vmem [thread:$0]  (!%p1494_p5), %s1652_s4, 1024, %s341_s24, [#allocation3], %s1406_s17, %s1406_s17, %s1407_s18  }
  0x20   : > { %p1665_p6 = scmp.ne.s32.totalorder %s1663_s25, 0 }
  0x21   : > { %p1666_p8 = scmp.eq.s32.totalorder (!%p1665_p6), %s1481_s22, 0 }
  0x22   : > { %386 = sbr.rel (%p1665_p6) target bundleno = 952 (0x3b8), region = 68 }
  0x29   : > { %1398 = dma.done.wait (%p1666_p8), [#allocation3], 1024   ;;  %p1667_p7 = pmov %p1666_p8 }
  0x2a   : > { %vm464_vm0 = vcmask 1042432   ;;  %vm451_vm1 = vcmask 23552   ;;  %v450_v0 = vld [vmem:[%s1649_s1] sm:$0x7]  ;;  %v447_v2 = vld [vmem:[%s1648_s0 + $0x8] sm:$0xff]  ;;  %v448_v3 = vld [vmem:[%s1648_s0 + $0x10] sm:$0xff] }
  0x2b   : > { %1400 = vsyncadd (%p1667_p7), [#allocation3], 4294966272  ;;  %v446_v1 = vld [vmem:[%s1648_s0] sm:$0xff]  ;;  %1210 = vmatprep.subr.msk.mxu1 %vm464_vm0, %v450_v0  ;;  %v580_v5 = vld [vmem:[#allocation2 + $0x8] sm:$0xff]  ;;  %vm587_vm2 = vcmask 523264   ;;  %p432_p2 = scmp.lt.s32.totalorder %s1481_s22, 1 }
  0x2c   : > { %1212 = vmatprep.mubr.msk.f32.mxu1 %vm451_vm1, %v446_v1  ;;  %v579_v4 = vld [vmem:[#allocation2] sm:$0xff]  ;;  %1211 = vmatpush3.msk.msra.mxu1 %vm464_vm0, %v450_v0  ;;  %v581_v6 = vld [vmem:[#allocation2 + $0x10] sm:$0xff]  ;;  %v582_v7 = vld [vmem:[#allocation2 + $0x18] sm:$0xff]  ;;  %vm834_vm3 = vcmask 261120   ;;  %vm853_vm4 = vcmask 1040384  }
  0x2d   : > { %1213 = vmatmul.mubr.msk.f32.vlgmr.msra.gmra.mrb[0].mxu1 %vm451_vm1, %v447_v2  ;;  %v1278_v8 = vpack.c.bf16 %v580_v5, %v579_v4  ;;  %v1282_v9 = vpack.c.bf16 %v582_v7, %v581_v6  ;;  %v449_v10 = vld [vmem:[%s1648_s0 + $0x18] sm:$0xff]  ;;  %v583_v11 = vld [vmem:[#allocation2 + $0x20] sm:$0xff]  ;;  %v584_v12 = vld [vmem:[#allocation2 + $0x28] sm:$0xff]  ;;  %s1669_s22 = smov (!%p432_p2, %s1481_s22), 1 }
  0x2e   : > { %1215 = vmatprep.mubr.msk.f32.mxu1 %vm451_vm1, %v448_v3  ;;  %v1286_v13 = vpack.c.bf16 %v584_v12, %v583_v11  ;;  %v585_v14 = vld [vmem:[#allocation2 + $0x30] sm:$0xff]  ;;  %v586_v15 = vld [vmem:[#allocation2 + $0x38] sm:$0xff]  ;;  %v711_v17 = vld [vmem:[%s1655_s7] sm:$0xff]  ;;  %s1171_s26 = sshll.u32 %s1669_s22, 7  ;;  %s1149_s15 = sshll.u32 %s1669_s22, 2 }
  0x2f   : > { %1279 = vmatprep.subr.bf16.mxu1 %v1278_v8  ;;  %v1290_v16 = vpack.c.bf16 %v586_v15, %v585_v14  ;;  %v712_v18 = vld [vmem:[%s1655_s7 + $0x8] sm:$0xff]  ;;  %v713_v19 = vld [vmem:[%s1655_s7 + $0x10] sm:$0xff]  ;;  %v714_v21 = vld [vmem:[%s1655_s7 + $0x18] sm:$0xff]  ;;  %s1607_s29 = scalar_lea.vmem %s1658_s10, %s1171_s26  ;;  %s440_s18 = scalar_lea.vmem %s1659_s11, %s1149_s15 }
  0x30   : > { %1281 = vmatpush3.bf16.msra.mxu1 %v1278_v8  ;;  %v1294_v20 = vpack.c.bf16 %v712_v18, %v711_v17  ;;  %v1298_v22 = vpack.c.bf16 %v714_v21, %v713_v19  ;;  %v715_v23 = vld [vmem:[%s1655_s7 + $0x20] sm:$0xff]  ;;  %v716_v24 = vld [vmem:[%s1655_s7 + $0x28] sm:$0xff]  ;;  %v717_v26 = vld [vmem:[%s1655_s7 + $0x30] sm:$0xff]  ;;  %s1172_s19 = sshll.u32 %s1669_s22, 3 }
  0x31   : > { %1216 = vmatmul.mubr.msk.f32.gmra.mrb[2].mxu1 %vm451_vm1, %v449_v10  ;;  %1283 = vmatprep.subr.bf16.mxu1 %v1282_v9  ;;  %v1302_v25 = vpack.c.bf16 %v716_v24, %v715_v23  ;;  %v718_v27 = vld [vmem:[%s1655_s7 + $0x38] sm:$0xff]  ;;  %v719_v29 = vld [vmem:[%s1655_s7 + $0x40] sm:$0xff]  ;;  %v720_v30 = vld [vmem:[%s1655_s7 + $0x48] sm:$0xff]  ;;  %s445_s27 = scalar_lea.vmem %s1660_s12, %s1172_s19 }
  0x32   : > { %1295 = vmatprep.subr.bf16.mxu0 %v1294_v20  ;;  %v1306_v28 = vpack.c.bf16 %v718_v27, %v717_v26  ;;  %v1310_v31 = vpack.c.bf16 %v720_v30, %v719_v29  ;;  %v721_v32 = vld [vmem:[%s1655_s7 + $0x50] sm:$0xff]  ;;  %v722_v33 = vld [vmem:[%s1655_s7 + $0x58] sm:$0xff]  ;;  %v1157_v35 = vld [vmem:[%s1650_s2] ss:$0 sm:$0xff] }
  0x33   : > { %1297 = vmatpush3.bf16.msra.mxu0 %v1294_v20  ;;  %v1314_v34 = vpack.c.bf16 %v722_v33, %v721_v32  ;;  %v1158_v37 = vld [vmem:[%s1651_s3] ss:$0 sm:$0xff]  ;;  %v724_v54 = vld [vmem:[%s1655_s7 + $0x68] sm:$0xff]  ;;  %v725_v56 = vld [vmem:[%s1655_s7 + $0x70] sm:$0xff] }
  0x34   : > { %1285 = vmatpush3.bf16.msra.mxu1 %v1282_v9  ;;  %1299 = vmatprep.subr.bf16.mxu0 %v1298_v22  ;;  %v723_v53 = vld [vmem:[%s1655_s7 + $0x60] sm:$0xff]  ;;  %v726_v57 = vld [vmem:[%s1655_s7 + $0x78] sm:$0xff]  ;;  %v860_v14 = vld [vmem:[%s1607_s29 + $0x28] sm:$0xff] }
  0x35   : > { %1287 = vmatprep.subr.bf16.mxu1 %v1286_v13  ;;  %v1318_v55 = vpack.c.bf16 %v724_v54, %v723_v53  ;;  %v1322_v58 = vpack.c.bf16 %v726_v57, %v725_v56  ;;  %v1163_v59 = vld [vmem:[%s1653_s5] ss:$0 sm:$0xff]  ;;  %v864_v19 = vld [vmem:[%s1607_s29 + $0x48] sm:$0xff]  ;;  %v862_v26 = vld [vmem:[%s1607_s29 + $0x38] sm:$0xff] }
  0x36   : > { %v1164_v61 = vld [vmem:[%s1654_s6] ss:$0 sm:$0xff]  ;;  %v868_v20 = vld [vmem:[%s1607_s29 + $0x68] sm:$0xff] }
  0x37   : > { %1301 = vmatpush3.bf16.msra.mxu0 %v1298_v22  ;;  %v859_v17 = vld [vmem:[%s1607_s29 + $0x20] sm:$0xff]  ;;  %v1330_v21 = vpack.c.bf16 %v868_v20, %v864_v19  ;;  %v1409_v19 = vmov 1983009808  }
  0x38   : > { %1289 = vmatpush3.bf16.msra.mxu1 %v1286_v13  ;;  %1303 = vmatprep.subr.bf16.mxu0 %v1302_v25  ;;  %v856_v13 = vld [vmem:[%s1607_s29 + $0x8] sm:$0xff]  ;;  %v863_v22 = vld [vmem:[%s1607_s29 + $0x40] sm:$0xff]  ;;  %v1045_v20 = vunpack.c.l.s4 %v1409_v19 }
  0x39   : > { %1291 = vmatprep.subr.bf16.mxu1 %v1290_v16  ;;  %v1326_v15 = vpack.c.bf16 %v860_v14, %v856_v13  ;;  %v867_v23 = vld [vmem:[%s1607_s29 + $0x60] sm:$0xff] }
  0x3a   : > { %v1332_v24 = vpack.c.bf16 %v867_v23, %v863_v22  ;;  %v1165_v29 = vld [vmem:[%s1656_s8] ss:$0 sm:$0xff] }
  0x3b   : > { %1305 = vmatpush3.bf16.msra.mxu0 %v1302_v25  ;;  %v858_v25 = vld [vmem:[%s1607_s29 + $0x18] sm:$0xff] }
  0x3c   : > { %1293 = vmatpush3.bf16.msra.mxu1 %v1290_v16  ;;  %1307 = vmatprep.subr.bf16.mxu0 %v1306_v28  ;;  %v855_v16 = vld [vmem:[%s1607_s29] sm:$0xff]  ;;  %v1334_v27 = vpack.c.bf16 %v862_v26, %v858_v25 }
  0x3d   : > { %v1328_v18 = vpack.c.bf16 %v859_v17, %v855_v16  ;;  %1327 = vmatprep.subr.bf16.mxu1 %v1326_v15 }
  0x3f   : > { %1309 = vmatpush3.bf16.msra.mxu0 %v1306_v28  ;;  %v1408_v28 = vmov 0.0  }
  0x40   : > { %1311 = vmatprep.subr.bf16.mxu0 %v1310_v31 }
  0x43   : > { %1313 = vmatpush3.bf16.msra.mxu0 %v1310_v31  ;;  %v1166_v31 = vld [vmem:[%s1657_s9] ss:$0 sm:$0xff] }
  0x44   : > { %1315 = vmatprep.subr.bf16.mxu0 %v1314_v34 }
  0x47   : > { %1317 = vmatpush3.bf16.msra.mxu0 %v1314_v34 }
  0x48   : > { %1319 = vmatprep.subr.bf16.mxu0 %v1318_v55 }
  0x4b   : > { %1321 = vmatpush3.bf16.msra.mxu0 %v1318_v55 }
  0x4c   : > { %1323 = vmatprep.subr.bf16.mxu0 %v1322_v58 }
  0x4f   : > { %1325 = vmatpush3.bf16.msra.mxu0 %v1322_v58  ;;  %v857_v58 = vld [vmem:[%s1607_s29 + $0x10] sm:$0xff] }
 0x100   : > { %v1214_v36 = vpop.f32.mrb[0].mxu1 }
 0x101   : > { %v561_v38 = vmul.f32 %v1214_v36, %v1157_v35  ;;  %v534_v39 = vpop.f32.mrb[1].mxu1 }
 0x102   : > { %v560_v40 = vmul.f32 %v1157_v35, %v534_v39 }
 0x103   : > { %v572_v41 = vadd.f32 %v1158_v37, %v561_v38 }
 0x104   : > { %v571_v42 = vadd.f32 %v1158_v37, %v560_v40  ;;  %v1217_v43 = vpop.f32.mrb[2].mxu1 }
 0x105   : > { %v563_v44 = vmul.f32 %v1217_v43, %v1157_v35  ;;  %v544_v45 = vpop.f32.mrb[3].mxu1  ;;  %v576_v48 = vmax.f32 %v572_v41, 0.0 }
 0x106   : > { %v575_v46 = vmax.f32 %v571_v42, 0.0  ;;  %v562_v47 = vmul.f32 %v1157_v35, %v544_v45 }
 0x107   : > { %v574_v49 = vadd.f32 %v1158_v37, %v563_v44 }
 0x108   : > { %v573_v50 = vadd.f32 %v1158_v37, %v562_v47  ;;  %1234 = vmatprep.mubr.msk.f32.mxu1 %vm587_vm2, %v575_v46 }
 0x109   : > { %1235 = vmatmul.mubr.msk.f32.vlgmr.msra.gmra.mrb[4].mxu1 %vm587_vm2, %v576_v48  ;;  %v578_v52 = vmax.f32 %v574_v49, 0.0 }
 0x10a   : > { %v577_v51 = vmax.f32 %v573_v50, 0.0  ;;  %1329 = vmatpush1.bf16.msra.mxu1 %v1328_v18 }
 0x10b   : > { %1331 = vmatprep.subr.bf16.mxu1 %v1330_v21 }
 0x10c   : > { %1237 = vmatprep.mubr.msk.f32.mxu1 %vm587_vm2, %v577_v51 }
 0x10d   : > { %1238 = vmatmul.mubr.msk.f32.gmra.mrb[6].mxu1 %vm587_vm2, %v578_v52 }
 0x10e   : > { %1333 = vmatpush1.bf16.msra.mxu1 %v1332_v24  ;;  %960 = vmatprep.mubr.f32.mxu1 %v1408_v28  ;;  %v1046_v24 = vunpack.c.0.s8 %v1045_v20 }
 0x10f   : > { %1335 = vmatprep.subr.bf16.mxu1 %v1334_v27 }
 0x1dc   : > { %v1236_v60 = vpop.f32.mrb[4].mxu1 }
 0x1dd   : > { %v693_v62 = vmul.f32 %v1236_v60, %v1163_v59  ;;  %v666_v63 = vpop.f32.mrb[5].mxu1 }
 0x1de   : > { %v692_v0 = vmul.f32 %v1163_v59, %v666_v63 }
 0x1df   : > { %v704_v1 = vadd.f32 %v1164_v61, %v693_v62  ;;  %v870_v62 = vld [vmem:[%s1607_s29 + $0x78] sm:$0xff] }
 0x1e0   : > { %v1239_v2 = vpop.f32.mrb[6].mxu1  ;;  %v703_v3 = vadd.f32 %v1164_v61, %v692_v0 }
 0x1e1   : > { %v695_v4 = vmul.f32 %v1239_v2, %v1163_v59  ;;  %v676_v5 = vpop.f32.mrb[7].mxu1  ;;  %v708_v8 = vmax.f32 %v704_v1, 0.0 }
 0x1e2   : > { %v694_v6 = vmul.f32 %v1163_v59, %v676_v5  ;;  %v707_v7 = vmax.f32 %v703_v3, 0.0  ;;  %v861_v59 = vld [vmem:[%s1607_s29 + $0x30] sm:$0xff] }
 0x1e3   : > { %v706_v9 = vadd.f32 %v1164_v61, %v695_v4  ;;  %v1336_v1 = vpack.c.bf16 %v861_v59, %v857_v58  ;;  %v865_v3 = vld [vmem:[%s1607_s29 + $0x50] sm:$0xff] }
 0x1e4   : > { %v705_v10 = vadd.f32 %v1164_v61, %v694_v6  ;;  %1272 = vmatprep.mubr.f32.mxu0 %v707_v7  ;;  %v866_v61 = vld [vmem:[%s1607_s29 + $0x58] sm:$0xff]  ;;  %v869_v4 = vld [vmem:[%s1607_s29 + $0x70] sm:$0xff]  ;;  %v873_v7 = vlaneseq }
 0x1e5   : > { %1273 = vmatmul.mubr.f32.vlgmr.msra.gmra.mrb[0].mxu0 %v708_v8  ;;  %v710_v12 = vmax.f32 %v706_v9, 0.0  ;;  %v1338_v2 = vpack.c.bf16 %v870_v62, %v866_v61  ;;  %v1340_v6 = vpack.c.bf16 %v869_v4, %v865_v3 }
 0x1e6   : > { %v709_v11 = vmax.f32 %v705_v10, 0.0  ;;  %v874_v8 = vshrl.u32 %v873_v7, 7  ;;  %v871_v10 = vld [vmem:[%s440_s18] sm:$0xf] }
 0x1e8   : > { %1275 = vmatprep.mubr.f32.mxu0 %v709_v11  ;;  %v875_v9 = vsub.s32 0, %v874_v8  ;;  %v879_v11 = vsub.s32 1, %v874_v8  ;;  %v883_v17 = vsub.s32 2, %v874_v8  ;;  %v887_v21 = vsub.s32 3, %v874_v8 }
 0x1e9   : > { %1276 = vmatmul.mubr.f32.gmra.mrb[2].mxu0 %v710_v12 }
 0x1ea   : > { %v876_v12 = vrot.slane %v871_v10, %v875_v9  ;;  %v880_v13 = vrot.slane %v871_v10, %v879_v11  ;;  %v884_v23 = vrot.slane %v871_v10, %v883_v17  ;;  %v888_v25 = vrot.slane %v871_v10, %v887_v21 }
 0x2b8   : > { %v1274_v30 = vpop.f32.mrb[0].mxu0 }
 0x2b9   : > { %v820_v32 = vmul.f32 %v1274_v30, %v1165_v29  ;;  %v793_v33 = vpop.f32.mrb[1].mxu0 }
 0x2ba   : > { %v819_v34 = vmul.f32 %v1165_v29, %v793_v33 }
 0x2bb   : > { %v831_v35 = vadd.f32 %v1166_v31, %v820_v32 }
 0x2bc   : > { %v830_v36 = vadd.f32 %v1166_v31, %v819_v34  ;;  %v1277_v37 = vpop.f32.mrb[2].mxu0 }
 0x2bd   : > { %v836_v38 = vsel %vm834_vm3, %v831_v35, -inf  ;;  %v822_v39 = vmul.f32 %v1277_v37, %v1165_v29  ;;  %v803_v40 = vpop.f32.mrb[3].mxu0 }
 0x2be   : > { %v835_v41 = vsel %vm834_vm3, %v830_v36, -inf  ;;  %v821_v42 = vmul.f32 %v1165_v29, %v803_v40  ;;  %v1049_v29 = vsub.s32 %v1046_v24, %v874_v8 }
 0x2bf   : > { %v837_v43 = vmax.f32 %v835_v41, %v836_v38  ;;  %v833_v44 = vadd.f32 %v1166_v31, %v822_v39 }
 0x2c0   : > { %v832_v45 = vadd.f32 %v1166_v31, %v821_v42 }
 0x2c1   : > { %v838_v46 = vrot.slane %v837_v43, 4  ;;  %v845_v47 = vsel %vm834_vm3, %v833_v44, -inf }
 0x2c2   : > { %v844_v48 = vsel %vm834_vm3, %v832_v45, -inf }
 0x2c3   : > { %v839_v49 = vmax.f32 %v837_v43, %v838_v46  ;;  %v846_v50 = vmax.f32 %v844_v48, %v845_v47 }
 0x2c5   : > { %v840_v51 = vrot.slane %v839_v49, 2  ;;  %v847_v52 = vrot.slane %v846_v50, 4 }
 0x2c7   : > { %v841_v53 = vmax.f32 %v839_v49, %v840_v51  ;;  %v848_v54 = vmax.f32 %v846_v50, %v847_v52 }
 0x2c9   : > { %v849_v55 = vrot.slane %v848_v54, 2  ;;  %v842_v56 = vrot.slane %v841_v53, 1 }
 0x2cb   : > { %v850_v57 = vmax.f32 %v848_v54, %v849_v55  ;;  %v843_v63 = vmax.f32 %v841_v53, %v842_v56 }
 0x2cd   : > { %v851_v60 = vrot.slane %v850_v57, 1 }
 0x2cf   : > { %v852_v0 = vmax.f32 %v850_v57, %v851_v60 }
 0x2d1   : > { %v854_v5 = vsel %vm853_vm4, %v843_v63, %v852_v0 }
 0x2d2   : > { %1167 = vmatmul.mubr.msk.f32.vlgmr.msra.gmra.mrb[8].mxu1 %vm834_vm3, %v854_v5 }
 0x2d3   : > { %1337 = vmatpush1.bf16.msra.mxu1 %v1336_v1  ;;  %1031 = vmatprep.mubr.f32.mxu1 %v1408_v28 }
 0x2d4   : > { %1339 = vmatprep.subr.bf16.mxu1 %v1338_v2 }
 0x2d7   : > { %1341 = vmatpush1.bf16.msra.mxu1 %v1340_v6 }
 0x2da   : > { %1168 = vmatmul.mubr.msk.f32.vlgmr.msra.gmra.mrb[10].mxu1 %vm834_vm3, %v854_v5 }
 0x3a5   : > { %v962_v14 = vpop.f32.mrb[8].mxu1 }
 0x3a6   : > { %v963_v15 = vadd.f32 %v962_v14, %v876_v12  ;;  %v964_v16 = vpop.f32.mrb[9].mxu1 }
 0x3a7   : > { %v965_v18 = vadd.f32 %v964_v16, %v880_v13 }
 0x3a9   : > { %v1042_v22 = vcombine.low %v963_v15, %v965_v18 }
 0x3ab   : > { %v1050_v32 = vrot.slane %v1042_v22, %v1049_v29 }
 0x3ad   : > { %v1033_v26 = vpop.f32.mrb[10].mxu1 }
 0x3ae   : > { %v1034_v27 = vadd.f32 %v1033_v26, %v884_v23  ;;  %v1035_v28 = vpop.f32.mrb[11].mxu1 }
 0x3af   : > { %v1036_v30 = vadd.f32 %v1035_v28, %v888_v25 }
 0x3b1   : > { %v1043_v31 = vcombine.low %v1034_v27, %v1036_v30 }
 0x3b3   : > { %v1057_v33 = vrot.slane %v1043_v31, %v1049_v29 }
 0x3b5   : > { %v1058_v34 = vcombine.low %v1050_v32, %v1057_v33 }
 0x3b7   : > { %1060 = vst [vmem:[%s445_s27] sm:$0xff] %v1058_v34 }
 0x3b8 PF: > { %s23_s21 = sadd.s32 1, %s1403_s21  }
 0x3b9   : > { %p20_p3 = scmp.ge.s32.totalorder %s23_s21, 4  }
 0x3bb   :  { %22 = sbr.rel (!%p20_p3) target bundleno = 1 (0x1), region = 106 }
 0x3c2   :  { %1082 = vsyncpa [#allocation3], 1 }
 0x3c3   :  { %1084 = vsyncpa [#allocation3 + $0x1], 1 }

// kernel: network_forward.3
= control target key start
LH: loop header
LB: loop body
LE: loop exit
PB: predicated region body
PF: predicated region fallthrough
CT: control target
= control target key end

     0   :  { %16 = vsyncpa [#allocation3], 0  ;;  %s6178_s0 = inlined_call_operand.vmem [shape: f32[2,64,16], index: 0, kind: input, shape index: {}]   ;;  %s6179_s1 = inlined_call_operand.vmem [shape: f32[2,16,64], index: 1, kind: input, shape index: {}]   ;;  %s6180_s2 = inlined_call_operand.vmem [shape: f32[2,1,64], index: 2, kind: input, shape index: {}]   ;;  %s6181_s3 = inlined_call_operand.vmem [shape: f32[2,1,64], index: 3, kind: input, shape index: {}]   ;;  %s6182_s4 = inlined_call_operand.vmem [shape: f32[2,64,128], index: 4, kind: input, shape index: {}]   ;;  %s6183_s5 = inlined_call_operand.vmem [shape: f32[2,1,128], index: 5, kind: input, shape index: {}]   ;;  %s6184_s6 = inlined_call_operand.vmem [shape: f32[2,1,128], index: 6, kind: input, shape index: {}]   ;;  %s6185_s7 = inlined_call_operand.hbm [shape: f32[2,128,1024], index: 7, kind: input, shape index: {}]   ;;  %s6186_s8 = inlined_call_operand.vmem [shape: f32[2,1,1024], index: 8, kind: input, shape index: {}]   ;;  %s6187_s9 = inlined_call_operand.vmem [shape: f32[2,3,16], index: 9, kind: input, shape index: {}]   ;;  %s6188_s10 = inlined_call_operand.vmem [shape: f32[2,3,1], index: 10, kind: input, shape index: {}]   ;;  %s6189_s11 = inlined_call_operand.vmem [shape: f32[2,2,3,1024], index: 11, kind: output, shape index: {}]  }
   0x1   :  { %18 = vsyncpa [#allocation3 + $0x1], 0  ;;  %s4891_s17 = smov 0   ;;  %s4893_s18 = smov 0  }
   0x2   :  { %s4895_s19 = smov 0   ;;  %s4897_s20 = smov 0  }
   0x3 LB: > { %s4910_s21 = sadd.s32 4294967295, %s4824_s20   ;;  %s4913_s22 = sadd.s32 1, %s4824_s20   ;;  %s4824_s20 = sphi %s4897_s20, %s6219_s20   ;;  %s4820_s19 = sphi %s4895_s19, %s6218_s19   ;;  %s4816_s18 = sphi %s4893_s18, %s6217_s18   ;;  %s4812_s17 = sphi %s4891_s17, %s6216_s17  }
   0x4   : > { %s210_s23 = ssub.s32 %s4824_s20, %s4913_s22  ;;  %s213_s24 = sadd.s32 1, %s4820_s19 }
   0x5   : > { %p211_p0 = scmp.eq.s32.totalorder %s210_s23, 0  ;;  %p220_p1 = scmp.ne.s32.totalorder %s4820_s19, %s4816_s18 }
   0x6   : > { %p221_p2 = scmp.eq.s32.totalorder %s4824_s20, 0  ;;  %p226_p3 = scmp.ne.s32.totalorder %s4816_s18, %s4812_s17 }
   0x7   : > { %s4923_s25 = scalar_select %p211_p0, %s4820_s19, %s213_s24  }
   0x8   : > { %p222_p4 = por %p221_p2, %p220_p1  ;;  %p227_p5 = scmp.eq.s32.totalorder %s4910_s21, 0 }
   0x9   : > { %p4559_p6 = scmp.lt.s32.totalorder %s4824_s20, 2  ;;  %s402_s27 = sand.u32 1, %s4820_s19  }
   0xa   : > { %p4927_p7 = por %p227_p5, %p226_p3  ;;  %s4040_s28 = sshll.u32 %s402_s27, 10 }
   0xb   : > { %s4106_s29 = sshll.u32 %s4824_s20, 14  ;;  %s406_s14 = scalar_lea.vmem [#allocation2], %s4040_s28 }
   0xc   : > { %s4936_s13 = scalar_lea.hbm %s6185_s7, %s4106_s29  ;;  %s413_s15 = sshll.u32 %s406_s14, 4  ;;  %s4938_s15 = int_to_ptr.vmem [resolvable:$true] %s413_s15 }
   0xd   : > { %p4940_p8 = pnand %p4559_p6, %p222_p4  ;;  %s4945_s17 = scalar_lea.sflag [#allocation3], %s402_s27 }
   0xe   : > { %s4760_s23 = scalar_lea.hbm %s4936_s13, 16384  ;;  %s4765_s29 = scalar_lea.hbm %s6185_s7, 32768 }
   0xf   : > { %p4761_p10 = scmp.ne.s32.totalorder %s4936_s13, %s4760_s23  ;;  %p4762_p11 = pneg %p4940_p8 }
  0x10   : > { %p4766_p0 = scmp.lt.u32.totalorder %s4936_s13, %s6185_s7  ;;  %p4767_p1 = scmp.lt.u32.totalorder %s4765_s29, %s4760_s23 }
  0x11   : > { %p4763_p12 = pnand %p4762_p11, %p4761_p10  ;;  %p4769_p3 = scmp.lt.u32.totalorder %s4760_s23, %s4936_s13 }
  0x12   : > { %p4768_p2 = por %p4767_p1, %p4766_p0 }
  0x13   : > { %p4764_p13 = pneg %p4763_p12 }
  0x14   : > { %p4770_p4 = por %p4769_p3, %p4768_p2 }
  0x16   : > { %p4771_p5 = pnand %p4770_p4, %p4764_p13 }
  0x18   : > { %4774 = shalt.err (!%p4771_p5)
}
  0x19   : > { %s4775_s27 = scalar_lea.vmem %s4938_s15, 16384  ;;  %s4826_s14 = smov [#allocation2]  }
  0x1a   : > { %p4776_p6 = scmp.ne.s32.totalorder %s4938_s15, %s4775_s27  ;;  %s4780_s24 = sshll.u32 %s4826_s14, 4  ;;  %s4781_s24 = int_to_ptr.vmem [resolvable:$false] %s4780_s24 }
  0x1b   : > { %s4782_s28 = scalar_lea.vmem %s4781_s24, 32768  ;;  %p4783_p9 = scmp.lt.s32.totalorder %s4938_s15, %s4781_s24 }
  0x1c   : > { %p4778_p10 = pnand %p4776_p6, %p4762_p11  ;;  %p4784_p0 = scmp.lt.s32.totalorder %s4782_s28, %s4775_s27 }
  0x1e   : > { %p4779_p12 = pneg %p4778_p10  ;;  %p4785_p1 = por %p4784_p0, %p4783_p9 }
  0x20   : > { %p4786_p2 = pnand %p4785_p1, %p4779_p12 }
  0x22   : > { %4789 = shalt.err (!%p4786_p2)
}
  0x23   : > { %s4827_s23 = smov 1024   ;;  %s4828_s29 = smov 64  }
  0x24   : > { %4558 = dma.hbm_to_vmem [thread:$0]  (!%p4940_p8), %s4936_s13, 16384, %s4938_s15, %s4945_s17, %s4827_s23, %s4827_s23, %s4828_s29  }
  0x25   : > { %p442_p11 = scmp.lt.s32.totalorder %s4824_s20, 3  ;;  %p6204_p13 = scmp.ge.s32.totalorder %s4824_s20, 1 }
  0x27   : > { %p443_p3 = pnand %p6204_p13, %p442_p11 }
  0x29   : > { %446 = sbr.rel (%p443_p3) target bundleno = 1887 (0x75f), region = 64 }
  0x30   : > { %s448_s30 = sand.u32 1, %s4816_s18  }
  0x31   : > { %s4044_s12 = sshll.u32 %s448_s30, 10  ;;  %s449_s27 = scalar_lea.sflag [#allocation3], %s448_s30 }
  0x32   : > { %s4977_s14 = scalar_lea.vmem [#allocation2], %s4044_s12 }
  0x33   : > { %4807 = dma.done.wait (%p4927_p7), %s449_s27, 16384  }
  0x34   : > { %4809 = vsyncadd (%p4927_p7), %s449_s27, 4294950912  ;;  %p530_p9 = scmp.lt.s32.totalorder %s4910_s21, 1  ;;  %vm584_vm0 = vcmask 130048   ;;  %v929_v23 = vld [vmem:[%s4977_s14 + $0x8] sm:$0xff]  ;;  %v931_v25 = vld [vmem:[%s4977_s14 + $0x18] sm:$0xff]  ;;  %vm760_vm1 = vcmask 523264  }
  0x35   : > { %v937_v24 = vld [vmem:[%s4977_s14 + $0x48] sm:$0xff]  ;;  %v939_v27 = vld [vmem:[%s4977_s14 + $0x58] sm:$0xff]  ;;  %v928_v28 = vld [vmem:[%s4977_s14] sm:$0xff]  ;;  %vm1766_vm2 = vcmask 261120  }
  0x36   : > { %s6221_s21 = smov (!%p530_p9, %s4910_s21), 1  ;;  %v4201_v26 = vpack.c.bf16 %v937_v24, %v929_v23  ;;  %v936_v29 = vld [vmem:[%s4977_s14 + $0x40] sm:$0xff]  ;;  %v4233_v30 = vpack.c.bf16 %v939_v27, %v931_v25  ;;  %v945_v32 = vld [vmem:[%s4977_s14 + $0x88] sm:$0xff]  ;;  %v954_v23 = vld [vmem:[%s4977_s14 + $0xd0] sm:$0xff] }
  0x37   : > { %s4108_s20 = sshll.u32 %s6221_s21, 4  ;;  %s4989_s13 = sshll.u32 %s6221_s21, 6  ;;  %v4203_v31 = vpack.c.bf16 %v936_v29, %v928_v28  ;;  %v953_v33 = vld [vmem:[%s4977_s14 + $0xc8] sm:$0xff]  ;;  %v944_v35 = vld [vmem:[%s4977_s14 + $0x80] sm:$0xff]  ;;  %v963_v25 = vld [vmem:[%s4977_s14 + $0x118] sm:$0xff] }
  0x38   : > { %s539_s17 = scalar_lea.vmem %s6179_s1, %s4108_s20  ;;  %s4998_s26 = scalar_lea.vmem %s6178_s0, %s4989_s13  ;;  %v4205_v34 = vpack.c.bf16 %v953_v33, %v945_v32  ;;  %v952_v36 = vld [vmem:[%s4977_s14 + $0xc0] sm:$0xff]  ;;  %v961_v38 = vld [vmem:[%s4977_s14 + $0x108] sm:$0xff]  ;;  %v970_v32 = vld [vmem:[%s4977_s14 + $0x150] sm:$0xff] }
  0x39   : > { %s5004_s30 = scalar_lea.vmem %s6182_s4, %s4989_s13  ;;  %v582_v0 = vld [vmem:[%s539_s17] sm:$0xff]  ;;  %v583_v1 = vld [vmem:[%s539_s17 + $0x8] sm:$0xff]  ;;  %v576_v12 = vld [vmem:[%s4998_s26 + $0x10] sm:$0xff]  ;;  %v4207_v37 = vpack.c.bf16 %v952_v36, %v944_v35  ;;  %s542_s20 = scalar_lea.vmem %s6180_s2, %s6221_s21 }
  0x3a   : > { %v574_v2 = vld [vmem:[%s4998_s26] sm:$0xff]  ;;  %v4181_v3 = vpack.c.bf16 %v583_v1, %v582_v0  ;;  %v753_v5 = vld [vmem:[%s5004_s30 + $0x8] sm:$0xff]  ;;  %v754_v6 = vld [vmem:[%s5004_s30 + $0x10] sm:$0xff]  ;;  %s545_s17 = scalar_lea.vmem %s6181_s3, %s6221_s21  ;;  %s4051_s12 = sshll.u32 %s6221_s21, 3 }
  0x3b   : > { %4141 = vmatprep.mubr.msk.f32.mxu0 %vm584_vm0, %v574_v2  ;;  %1734 = vxpose.xlu0.b32.start [1/4] (short) (narrow) %v574_v2, 16  ;;  %v752_v4 = vld [vmem:[%s5004_s30] sm:$0xff]  ;;  %v755_v8 = vld [vmem:[%s5004_s30 + $0x18] sm:$0xff]  ;;  %v575_v10 = vld [vmem:[%s4998_s26 + $0x8] sm:$0xff]  ;;  %s5264_s15 = scalar_lea.vmem %s6186_s8, %s4051_s12  ;;  %s4052_s16 = sshll.u32 %s6221_s21, 2 }
  0x3c   : > { %4182 = vmatprep.subr.bf16.mxu0 %v4181_v3  ;;  %v4185_v7 = vpack.c.bf16 %v753_v5, %v752_v4  ;;  %v578_v9 = vld [vmem:[%s4998_s26 + $0x20] sm:$0xff]  ;;  %v4189_v11 = vpack.c.bf16 %v755_v8, %v754_v6  ;;  %v577_v13 = vld [vmem:[%s4998_s26 + $0x18] sm:$0xff]  ;;  %v579_v14 = vld [vmem:[%s4998_s26 + $0x28] sm:$0xff]  ;;  %s5631_s28 = scalar_lea.vmem %s6188_s10, %s4052_s16 }
  0x3d   : > { %4184 = vmatpush3.bf16.msra.mxu0 %v4181_v3  ;;  %3201 = vxpose.xlu1.b32.start [1/4] (short) (narrow) %v578_v9, 16  ;;  %v756_v15 = vld [vmem:[%s5004_s30 + $0x20] sm:$0xff]  ;;  %v757_v16 = vld [vmem:[%s5004_s30 + $0x28] sm:$0xff]  ;;  %v580_v18 = vld [vmem:[%s4998_s26 + $0x30] sm:$0xff] }
  0x3e   : > { %4186 = vmatprep.subr.bf16.mxu1 %v4185_v7  ;;  %v4193_v17 = vpack.c.bf16 %v757_v16, %v756_v15  ;;  %v581_v19 = vld [vmem:[%s4998_s26 + $0x38] sm:$0xff]  ;;  %v758_v20 = vld [vmem:[%s5004_s30 + $0x30] sm:$0xff]  ;;  %4202 = vmatprep.subr.bf16.mxu0 %v4201_v26  ;;  %v969_v39 = vld [vmem:[%s4977_s14 + $0x148] sm:$0xff]  ;;  %s5140_s26 = scalar_lea.vmem %s6183_s5, %s6221_s21 }
  0x3f   : > { %1735 = vxpose.xlu0.b32.cont [2/4] (short) (narrow) %v575_v10, 16  ;;  %4188 = vmatpush3.bf16.msra.mxu1 %v4185_v7  ;;  %v759_v21 = vld [vmem:[%s5004_s30 + $0x38] sm:$0xff]  ;;  %v4209_v40 = vpack.c.bf16 %v969_v39, %v961_v38  ;;  %v960_v41 = vld [vmem:[%s4977_s14 + $0x100] sm:$0xff]  ;;  %v977_v44 = vld [vmem:[%s4977_s14 + $0x188] sm:$0xff]  ;;  %s5146_s30 = scalar_lea.vmem %s6184_s6, %s6221_s21  ;;  %s5637_s21 = scalar_lea.vmem %s6187_s9, %s4052_s16 }
  0x40   : > { %4142 = vmatmul.mubr.msk.f32.vlgmr.msra.gmra.mrb[0].mxu0 %vm584_vm0, %v575_v10  ;;  %4190 = vmatprep.subr.bf16.mxu1 %v4189_v11  ;;  %v4197_v22 = vpack.c.bf16 %v759_v21, %v758_v20  ;;  %v968_v42 = vld [vmem:[%s4977_s14 + $0x140] sm:$0xff]  ;;  %v985_v45 = vld [vmem:[%s4977_s14 + $0x1c8] sm:$0xff]  ;;  %v930_v8 = vld [vmem:[%s4977_s14 + $0x10] sm:$0xff] }
  0x41   : > { %4144 = vmatprep.mubr.msk.f32.mxu0 %vm584_vm0, %v576_v12  ;;  %3202 = vxpose.xlu1.b32.cont [2/4] (short) (narrow) %v579_v14, 16  ;;  %v4211_v43 = vpack.c.bf16 %v968_v42, %v960_v41  ;;  %v4213_v46 = vpack.c.bf16 %v985_v45, %v977_v44  ;;  %v976_v47 = vld [vmem:[%s4977_s14 + $0x180] sm:$0xff]  ;;  %v993_v50 = vld [vmem:[%s4977_s14 + $0x208] sm:$0xff]  ;;  %v971_v26 = vld [vmem:[%s4977_s14 + $0x158] sm:$0xff] }
  0x42   : > { %4204 = vmatpush1.bf16.msra.mxu0 %v4203_v31  ;;  %v984_v48 = vld [vmem:[%s4977_s14 + $0x1c0] sm:$0xff]  ;;  %v1001_v51 = vld [vmem:[%s4977_s14 + $0x248] sm:$0xff]  ;;  %v962_v31 = vld [vmem:[%s4977_s14 + $0x110] sm:$0xff] }
  0x43   : > { %1736 = vxpose.xlu0.b32.cont [3/4] (short) (narrow) %v576_v12, 16  ;;  %4192 = vmatpush3.bf16.msra.mxu1 %v4189_v11  ;;  %v4215_v49 = vpack.c.bf16 %v984_v48, %v976_v47  ;;  %v4217_v52 = vpack.c.bf16 %v1001_v51, %v993_v50  ;;  %v992_v53 = vld [vmem:[%s4977_s14 + $0x200] sm:$0xff]  ;;  %v1009_v56 = vld [vmem:[%s4977_s14 + $0x288] sm:$0xff]  ;;  %v947_v12 = vld [vmem:[%s4977_s14 + $0x98] sm:$0xff]  ;;  %v4243_v35 = vpack.c.bf16 %v970_v32, %v962_v31  ;;  %v6198_v31 = vmov 0.0  }
  0x44   : > { %4145 = vmatmul.mubr.msk.f32.gmra.mrb[2].mxu0 %vm584_vm0, %v577_v13  ;;  %4194 = vmatprep.subr.bf16.mxu1 %v4193_v17  ;;  %v1000_v54 = vld [vmem:[%s4977_s14 + $0x240] sm:$0xff]  ;;  %v1017_v57 = vld [vmem:[%s4977_s14 + $0x2c8] sm:$0xff]  ;;  %v979_v33 = vld [vmem:[%s4977_s14 + $0x198] sm:$0xff] }
  0x45   : > { %4147 = vmatprep.mubr.msk.f32.mxu0 %vm584_vm0, %v578_v9  ;;  %3203 = vxpose.xlu1.b32.cont [3/4] (short) (narrow) %v580_v18, 16  ;;  %v4219_v55 = vpack.c.bf16 %v1000_v54, %v992_v53  ;;  %v4221_v58 = vpack.c.bf16 %v1017_v57, %v1009_v56  ;;  %v1008_v59 = vld [vmem:[%s4977_s14 + $0x280] sm:$0xff]  ;;  %v1025_v62 = vld [vmem:[%s4977_s14 + $0x308] sm:$0xff]  ;;  %v938_v9 = vld [vmem:[%s4977_s14 + $0x50] sm:$0xff] }
  0x46   : > { %4206 = vmatprep.subr.bf16.mxu0 %v4205_v34  ;;  %v1016_v60 = vld [vmem:[%s4977_s14 + $0x2c0] sm:$0xff]  ;;  %v1033_v63 = vld [vmem:[%s4977_s14 + $0x348] sm:$0xff]  ;;  %v987_v34 = vld [vmem:[%s4977_s14 + $0x1d8] sm:$0xff] }
  0x47   : > { %1737 = vxpose.xlu0.b32.end [4/4] (short) (narrow) %v577_v13, 16  ;;  %4196 = vmatpush3.bf16.msra.mxu1 %v4193_v17  ;;  %v4223_v61 = vpack.c.bf16 %v1016_v60, %v1008_v59  ;;  %v4225_v0 = vpack.c.bf16 %v1033_v63, %v1025_v62  ;;  %v5066_v1 = vld [vmem:[%s542_s20] ss:$0 sm:$0xff]  ;;  %v955_v13 = vld [vmem:[%s4977_s14 + $0xd8] sm:$0xff]  ;;  %v4245_v36 = vpack.c.bf16 %v987_v34, %v979_v33  ;;  %v986_v38 = vld [vmem:[%s4977_s14 + $0x1d0] sm:$0xff] }
  0x48   : > { %4148 = vmatmul.mubr.msk.f32.gmra.mrb[4].mxu0 %vm584_vm0, %v579_v14  ;;  %4198 = vmatprep.subr.bf16.mxu1 %v4197_v22  ;;  %v5068_v3 = vld [vmem:[%s545_s17] ss:$0 sm:$0xff]  ;;  %v4237_v21 = vpack.c.bf16 %v955_v13, %v947_v12  ;;  %v995_v39 = vld [vmem:[%s4977_s14 + $0x218] sm:$0xff]  ;;  %v1002_v44 = vld [vmem:[%s4977_s14 + $0x250] sm:$0xff] }
  0x49   : > { %4150 = vmatprep.mubr.msk.f32.mxu0 %vm584_vm0, %v580_v18  ;;  %3204 = vxpose.xlu1.b32.end [4/4] (short) (narrow) %v581_v19, 16  ;;  %v4235_v18 = vpack.c.bf16 %v938_v9, %v930_v8  ;;  %v1011_v45 = vld [vmem:[%s4977_s14 + $0x298] sm:$0xff]  ;;  %v1018_v50 = vld [vmem:[%s4977_s14 + $0x2d0] sm:$0xff]  ;;  %v1032_v8 = vld [vmem:[%s4977_s14 + $0x340] sm:$0xff] }
  0x4a   : > { %4208 = vmatpush1.bf16.msra.mxu0 %v4207_v37  ;;  %v978_v37 = vld [vmem:[%s4977_s14 + $0x190] sm:$0xff]  ;;  %v1027_v51 = vld [vmem:[%s4977_s14 + $0x318] sm:$0xff]  ;;  %v4074_v32 = vld [vmem:[%s5140_s26] ss:$0 sm:$0xff] }
  0x4b   : > { %4200 = vmatpush3.bf16.msra.mxu1 %v4197_v22  ;;  %4210 = vmatprep.subr.bf16.mxu0 %v4209_v40  ;;  %v946_v22 = vld [vmem:[%s4977_s14 + $0x90] sm:$0xff]  ;;  %v1003_v40 = vld [vmem:[%s4977_s14 + $0x258] sm:$0xff]  ;;  %v4247_v41 = vpack.c.bf16 %v986_v38, %v978_v37  ;;  %v4075_v34 = vld [vmem:[%s5146_s30] ss:$0 sm:$0xff] }
  0x4c   : > { %4151 = vmatmul.mubr.msk.f32.gmra.mrb[6].mxu0 %vm584_vm0, %v581_v19  ;;  %4234 = vmatprep.subr.bf16.mxu1 %v4233_v30  ;;  %v4239_v29 = vpack.c.bf16 %v954_v23, %v946_v22  ;;  %v4241_v30 = vpack.c.bf16 %v971_v26, %v963_v25  ;;  %v4249_v42 = vpack.c.bf16 %v1003_v40, %v995_v39  ;;  %v1026_v9 = vld [vmem:[%s4977_s14 + $0x310] sm:$0xff]  ;;  %v933_v25 = vld [vmem:[%s4977_s14 + $0x28] sm:$0xff]  ;;  %v940_v39 = vld [vmem:[%s4977_s14 + $0x60] sm:$0xff] }
  0x4d   : > { %v1034_v12 = vld [vmem:[%s4977_s14 + $0x350] sm:$0xff]  ;;  %v941_v26 = vld [vmem:[%s4977_s14 + $0x68] sm:$0xff]  ;;  %1162 = vmatprep.mubr.f32.mxu0 %v6198_v31 }
  0x4e   : > { %4212 = vmatpush1.bf16.msra.mxu0 %v4211_v43  ;;  %v994_v43 = vld [vmem:[%s4977_s14 + $0x210] sm:$0xff]  ;;  %v4259_v13 = vpack.c.bf16 %v1034_v12, %v1026_v9  ;;  %v981_v12 = vld [vmem:[%s4977_s14 + $0x1a8] sm:$0xff] }
  0x4f   : > { %4214 = vmatprep.subr.bf16.mxu0 %v4213_v46  ;;  %v1019_v46 = vld [vmem:[%s4977_s14 + $0x2d8] sm:$0xff]  ;;  %v4251_v47 = vpack.c.bf16 %v1002_v44, %v994_v43  ;;  %v1050_v23 = vld [vmem:[%s4977_s14 + $0x3d0] sm:$0xff] }
  0x50   : > { %v4253_v48 = vpack.c.bf16 %v1019_v46, %v1011_v45  ;;  %v934_v40 = vld [vmem:[%s4977_s14 + $0x30] sm:$0xff]  ;;  %v957_v45 = vld [vmem:[%s4977_s14 + $0xe8] sm:$0xff]  ;;  %v951_v46 = vld [vmem:[%s4977_s14 + $0xb8] sm:$0xff] }
  0x51   : > { %v966_v9 = vld [vmem:[%s4977_s14 + $0x130] sm:$0xff] }
  0x52   : > { %4216 = vmatpush1.bf16.msra.mxu0 %v4215_v49  ;;  %v1010_v49 = vld [vmem:[%s4977_s14 + $0x290] sm:$0xff] }
  0x53   : > { %4218 = vmatprep.subr.bf16.mxu0 %v4217_v52  ;;  %v1035_v52 = vld [vmem:[%s4977_s14 + $0x358] sm:$0xff]  ;;  %v4255_v53 = vpack.c.bf16 %v1018_v50, %v1010_v49 }
  0x54   : > { %v4257_v54 = vpack.c.bf16 %v1035_v52, %v1027_v51  ;;  %v948_v51 = vld [vmem:[%s4977_s14 + $0xa0] sm:$0xff] }
  0x56   : > { %4220 = vmatpush1.bf16.msra.mxu0 %v4219_v55 }
  0x57   : > { %4222 = vmatprep.subr.bf16.mxu0 %v4221_v58 }
  0x5a   : > { %4224 = vmatpush1.bf16.msra.mxu0 %v4223_v61 }
  0x5b   : > { %4226 = vmatprep.subr.bf16.mxu0 %v4225_v0 }
 0x113   : > { %v4143_v2 = vpop.f32.mrb[0].mxu0 }
 0x114   : > { %v722_v4 = vmul.f32 %v4143_v2, %v5066_v1  ;;  %v675_v5 = vpop.f32.mrb[1].mxu0 }
 0x115   : > { %v721_v6 = vmul.f32 %v5066_v1, %v675_v5 }
 0x116   : > { %v737_v7 = vadd.f32 %v5068_v3, %v722_v4 }
 0x117   : > { %v4146_v10 = vpop.f32.mrb[2].mxu0  ;;  %v736_v11 = vadd.f32 %v5068_v3, %v721_v6 }
 0x118   : > { %v724_v14 = vmul.f32 %v4146_v10, %v5066_v1  ;;  %v685_v15 = vpop.f32.mrb[3].mxu0  ;;  %v745_v19 = vmax.f32 %v737_v7, 0.0  ;;  %v1024_v7 = vld [vmem:[%s4977_s14 + $0x300] sm:$0xff] }
 0x119   : > { %v744_v16 = vmax.f32 %v736_v11, 0.0  ;;  %v723_v17 = vmul.f32 %v5066_v1, %v685_v15 }
 0x11a   : > { %v739_v20 = vadd.f32 %v5068_v3, %v724_v14  ;;  %v1049_v14 = vld [vmem:[%s4977_s14 + $0x3c8] sm:$0xff] }
 0x11b   : > { %4169 = vmatprep.mubr.msk.f32.mxu1 %vm760_vm1, %v744_v16  ;;  %v738_v24 = vadd.f32 %v5068_v3, %v723_v17  ;;  %v4149_v55 = vpop.f32.mrb[4].mxu0  ;;  %v1043_v16 = vld [vmem:[%s4977_s14 + $0x398] sm:$0xff] }
 0x11c   : > { %v747_v27 = vmax.f32 %v739_v20, 0.0  ;;  %4170 = vmatmul.mubr.msk.f32.vlgmr.msra.gmra.mrb[0].mxu1 %vm760_vm1, %v745_v19  ;;  %v726_v56 = vmul.f32 %v4149_v55, %v5066_v1  ;;  %v695_v57 = vpop.f32.mrb[5].mxu0  ;;  %v1051_v17 = vld [vmem:[%s4977_s14 + $0x3d8] sm:$0xff]  ;;  %v1040_v19 = vld [vmem:[%s4977_s14 + $0x380] sm:$0xff] }
 0x11d   : > { %v746_v28 = vmax.f32 %v738_v24, 0.0  ;;  %4236 = vmatpush1.bf16.msra.mxu1 %v4235_v18  ;;  %v725_v58 = vmul.f32 %v5066_v1, %v695_v57  ;;  %v4261_v18 = vpack.c.bf16 %v1051_v17, %v1043_v16  ;;  %v1048_v20 = vld [vmem:[%s4977_s14 + $0x3c0] sm:$0xff]  ;;  %v958_v57 = vld [vmem:[%s4977_s14 + $0xf0] sm:$0xff]  ;;  %v991_v16 = vld [vmem:[%s4977_s14 + $0x1f8] sm:$0xff] }
 0x11e   : > { %4238 = vmatprep.subr.bf16.mxu1 %v4237_v21  ;;  %v741_v59 = vadd.f32 %v5068_v3, %v726_v56  ;;  %v1042_v21 = vld [vmem:[%s4977_s14 + $0x390] sm:$0xff]  ;;  %v4231_v22 = vpack.c.bf16 %v1048_v20, %v1040_v19  ;;  %v956_v55 = vld [vmem:[%s4977_s14 + $0xe0] sm:$0xff] }
 0x11f   : > { %4172 = vmatprep.mubr.msk.f32.mxu1 %vm760_vm1, %v746_v28  ;;  %v740_v60 = vadd.f32 %v5068_v3, %v725_v58  ;;  %v4152_v61 = vpop.f32.mrb[6].mxu0  ;;  %v4263_v24 = vpack.c.bf16 %v1050_v23, %v1042_v21  ;;  %v4265_v28 = vpack.c.bf16 %v941_v26, %v933_v25  ;;  %v950_v56 = vld [vmem:[%s4977_s14 + $0xb0] sm:$0xff]  ;;  %v980_v19 = vld [vmem:[%s4977_s14 + $0x1a0] sm:$0xff]  ;;  %v997_v23 = vld [vmem:[%s4977_s14 + $0x228] sm:$0xff] }
 0x120   : > { %4173 = vmatmul.mubr.msk.f32.gmra.mrb[2].mxu1 %vm760_vm1, %v747_v27  ;;  %v749_v62 = vmax.f32 %v741_v59, 0.0  ;;  %v728_v63 = vmul.f32 %v4152_v61, %v5066_v1  ;;  %v705_v0 = vpop.f32.mrb[7].mxu0  ;;  %v935_v27 = vld [vmem:[%s4977_s14 + $0x38] sm:$0xff]  ;;  %v988_v20 = vld [vmem:[%s4977_s14 + $0x1e0] sm:$0xff]  ;;  %v982_v21 = vld [vmem:[%s4977_s14 + $0x1b0] sm:$0xff] }
 0x121   : > { %4240 = vmatpush1.bf16.msra.mxu1 %v4239_v29  ;;  %v748_v2 = vmax.f32 %v740_v60, 0.0  ;;  %v727_v4 = vmul.f32 %v5066_v1, %v705_v0  ;;  %v4227_v1 = vpack.c.bf16 %v1032_v8, %v1024_v7  ;;  %v943_v29 = vld [vmem:[%s4977_s14 + $0x78] sm:$0xff]  ;;  %v965_v60 = vld [vmem:[%s4977_s14 + $0x128] sm:$0xff]  ;;  %v972_v8 = vld [vmem:[%s4977_s14 + $0x160] sm:$0xff] }
 0x122   : > { %4242 = vmatprep.subr.bf16.mxu1 %v4241_v30  ;;  %v743_v5 = vadd.f32 %v5068_v3, %v728_v63  ;;  %v4297_v30 = vpack.c.bf16 %v943_v29, %v935_v27  ;;  %v973_v63 = vld [vmem:[%s4977_s14 + $0x168] sm:$0xff]  ;;  %v967_v0 = vld [vmem:[%s4977_s14 + $0x138] sm:$0xff] }
 0x123   : > { %v742_v6 = vadd.f32 %v5068_v3, %v727_v4  ;;  %4175 = vmatprep.mubr.msk.f32.mxu1 %vm760_vm1, %v748_v2  ;;  %4228 = vmatpush1.bf16.msra.mxu0 %v4227_v1  ;;  %v1041_v3 = vld [vmem:[%s4977_s14 + $0x388] sm:$0xff]  ;;  %v975_v2 = vld [vmem:[%s4977_s14 + $0x178] sm:$0xff]  ;;  %v4271_v4 = vpack.c.bf16 %v956_v55, %v948_v51 }
 0x124   : > { %4176 = vmatmul.mubr.msk.f32.gmra.mrb[4].mxu1 %vm760_vm1, %v749_v62  ;;  %v751_v10 = vmax.f32 %v743_v5, 0.0  ;;  %v4229_v15 = vpack.c.bf16 %v1049_v14, %v1041_v3  ;;  %v4303_v5 = vpack.c.bf16 %v958_v57, %v950_v56  ;;  %v4305_v1 = vpack.c.bf16 %v975_v2, %v967_v0  ;;  %v989_v14 = vld [vmem:[%s4977_s14 + $0x1e8] sm:$0xff]  ;;  %v999_v27 = vld [vmem:[%s4977_s14 + $0x238] sm:$0xff] }
 0x125   : > { %4244 = vmatpush1.bf16.msra.mxu1 %v4243_v35  ;;  %v750_v11 = vmax.f32 %v742_v6, 0.0  ;;  %v964_v6 = vld [vmem:[%s4977_s14 + $0x120] sm:$0xff]  ;;  %v1005_v26 = vld [vmem:[%s4977_s14 + $0x268] sm:$0xff]  ;;  %v1039_v55 = vld [vmem:[%s4977_s14 + $0x378] sm:$0xff] }
 0x126   : > { %4246 = vmatprep.subr.bf16.mxu1 %v4245_v36  ;;  %4230 = vmatprep.subr.bf16.mxu0 %v4229_v15  ;;  %v932_v36 = vld [vmem:[%s4977_s14 + $0x20] sm:$0xff]  ;;  %v983_v15 = vld [vmem:[%s4977_s14 + $0x1b8] sm:$0xff]  ;;  %v4275_v17 = vpack.c.bf16 %v972_v8, %v964_v6  ;;  %v1029_v51 = vld [vmem:[%s4977_s14 + $0x328] sm:$0xff] }
 0x127   : > { %4178 = vmatprep.mubr.msk.f32.mxu1 %vm760_vm1, %v750_v11  ;;  %4232 = vmatpush1.bf16.msra.mxu0 %v4231_v22  ;;  %v4273_v11 = vpack.c.bf16 %v973_v63, %v965_v60  ;;  %v990_v22 = vld [vmem:[%s4977_s14 + $0x1f0] sm:$0xff]  ;;  %v4309_v25 = vpack.c.bf16 %v991_v16, %v983_v15  ;;  %v1045_v0 = vld [vmem:[%s4977_s14 + $0x3a8] sm:$0xff] }
 0x128   : > { %4179 = vmatmul.mubr.msk.f32.gmra.mrb[6].mxu1 %vm760_vm1, %v751_v10  ;;  %4266 = vmatprep.subr.bf16.mxu0 %v4265_v28  ;;  %v974_v10 = vld [vmem:[%s4977_s14 + $0x170] sm:$0xff]  ;;  %v1007_v28 = vld [vmem:[%s4977_s14 + $0x278] sm:$0xff]  ;;  %v1053_v2 = vld [vmem:[%s4977_s14 + $0x3e8] sm:$0xff] }
 0x129   : > { %4248 = vmatpush1.bf16.msra.mxu1 %v4247_v41  ;;  %1251 = vmatprep.mubr.f32.mxu1 %v6198_v31  ;;  %v942_v41 = vld [vmem:[%s4977_s14 + $0x70] sm:$0xff] }
 0x12a   : > { %4250 = vmatprep.subr.bf16.mxu1 %v4249_v42  ;;  %v949_v42 = vld [vmem:[%s4977_s14 + $0xa8] sm:$0xff]  ;;  %v4299_v49 = vpack.c.bf16 %v942_v41, %v934_v40  ;;  %v1015_v41 = vld [vmem:[%s4977_s14 + $0x2b8] sm:$0xff]  ;;  %v1038_v63 = vld [vmem:[%s4977_s14 + $0x370] sm:$0xff] }
 0x12b   : > { %v4269_v58 = vpack.c.bf16 %v957_v45, %v949_v42  ;;  %v1021_v40 = vld [vmem:[%s4977_s14 + $0x2e8] sm:$0xff]  ;;  %v1023_v42 = vld [vmem:[%s4977_s14 + $0x2f8] sm:$0xff]  ;;  %v1012_v45 = vld [vmem:[%s4977_s14 + $0x2a0] sm:$0xff] }
 0x12d   : > { %4252 = vmatpush1.bf16.msra.mxu1 %v4251_v47  ;;  %v959_v47 = vld [vmem:[%s4977_s14 + $0xf8] sm:$0xff] }
 0x12e   : > { %4254 = vmatprep.subr.bf16.mxu1 %v4253_v48  ;;  %v4267_v48 = vpack.c.bf16 %v940_v39, %v932_v36  ;;  %v4301_v59 = vpack.c.bf16 %v959_v47, %v951_v46  ;;  %v4313_v36 = vpack.c.bf16 %v1007_v28, %v999_v27  ;;  %v1013_v39 = vld [vmem:[%s4977_s14 + $0x2a8] sm:$0xff]  ;;  %v1020_v46 = vld [vmem:[%s4977_s14 + $0x2e0] sm:$0xff] }
 0x12f   : > { %v4285_v47 = vpack.c.bf16 %v1021_v40, %v1013_v39  ;;  %v4287_v56 = vpack.c.bf16 %v1020_v46, %v1012_v45 }
 0x131   : > { %4256 = vmatpush1.bf16.msra.mxu1 %v4255_v53 }
 0x132   : > { %4258 = vmatprep.subr.bf16.mxu1 %v4257_v54 }
 0x135   : > { %4260 = vmatpush1.bf16.msra.mxu1 %v4259_v13 }
 0x136   : > { %4262 = vmatprep.subr.bf16.mxu1 %v4261_v18  ;;  %v4307_v18 = vpack.c.bf16 %v974_v10, %v966_v9  ;;  %v1044_v9 = vld [vmem:[%s4977_s14 + $0x3a0] sm:$0xff]  ;;  %v4293_v10 = vpack.c.bf16 %v1053_v2, %v1045_v0 }
 0x139   : > { %4264 = vmatpush1.bf16.msra.mxu1 %v4263_v24  ;;  %v4277_v24 = vpack.c.bf16 %v989_v14, %v981_v12  ;;  %v1046_v12 = vld [vmem:[%s4977_s14 + $0x3b0] sm:$0xff] }
 0x13a   : > { %4298 = vmatprep.subr.bf16.mxu1 %v4297_v30  ;;  %v4279_v30 = vpack.c.bf16 %v988_v20, %v980_v19 }
 0x1ef   : > { %v4171_v33 = vpop.f32.mrb[0].mxu1 }
 0x1f0   : > { %v851_v35 = vpop.f32.mrb[1].mxu1  ;;  %v898_v37 = vmul.f32 %v4171_v33, %v4074_v32  ;;  %v996_v33 = vld [vmem:[%s4977_s14 + $0x220] sm:$0xff] }
 0x1f1   : > { %v897_v38 = vmul.f32 %v4074_v32, %v851_v35  ;;  %v4281_v35 = vpack.c.bf16 %v1005_v26, %v997_v23 }
 0x1f2   : > { %v913_v52 = vadd.f32 %v4075_v34, %v898_v37  ;;  %v998_v37 = vld [vmem:[%s4977_s14 + $0x230] sm:$0xff] }
 0x1f3   : > { %v912_v43 = vadd.f32 %v4075_v34, %v897_v38  ;;  %v4174_v44 = vpop.f32.mrb[2].mxu1  ;;  %v1006_v38 = vld [vmem:[%s4977_s14 + $0x270] sm:$0xff] }
 0x1f4   : > { %v861_v50 = vpop.f32.mrb[3].mxu1  ;;  %v900_v61 = vmul.f32 %v4174_v44, %v4074_v32  ;;  %v5171_v7 = vmax.f32 %v913_v52, 0.0  ;;  %v4315_v44 = vpack.c.bf16 %v1006_v38, %v998_v37  ;;  %v1037_v52 = vld [vmem:[%s4977_s14 + $0x368] sm:$0xff] }
 0x1f5   : > { %v5159_v53 = vmax.f32 %v912_v43, 0.0  ;;  %v899_v54 = vmul.f32 %v4074_v32, %v861_v50  ;;  %v4311_v32 = vpack.c.bf16 %v990_v22, %v982_v21  ;;  %v1022_v50 = vld [vmem:[%s4977_s14 + $0x2f0] sm:$0xff]  ;;  %v4289_v60 = vpack.c.bf16 %v1037_v52, %v1029_v51  ;;  %v5269_v21 = vld [vmem:[%s5264_s15] sm:$0xff] }
 0x1f6   : > { %v915_v13 = vadd.f32 %v4075_v34, %v900_v61 }
 0x1f7   : > { %1163 = vmatmul.mubr.f32.vlgmr.msra.gmra.mrb[8].mxu0 %v5159_v53  ;;  %1252 = vmatmul.mubr.f32.vlgmr.msra.gmra.mrb[8].mxu1 %v5159_v53  ;;  %v914_v62 = vadd.f32 %v4075_v34, %v899_v54  ;;  %v1004_v34 = vld [vmem:[%s4977_s14 + $0x260] sm:$0xff]  ;;  %v1031_v54 = vld [vmem:[%s4977_s14 + $0x338] sm:$0xff] }
 0x1f8   : > { %4268 = vmatpush1.bf16.msra.mxu0 %v4267_v48  ;;  %4300 = vmatpush1.bf16.msra.mxu1 %v4299_v49  ;;  %v5196_v29 = vmax.f32 %v915_v13, 0.0  ;;  %v4283_v43 = vpack.c.bf16 %v1004_v34, %v996_v33  ;;  %v4317_v48 = vpack.c.bf16 %v1023_v42, %v1015_v41  ;;  %v1014_v49 = vld [vmem:[%s4977_s14 + $0x2b0] sm:$0xff]  ;;  %v4321_v61 = vpack.c.bf16 %v1039_v55, %v1031_v54 }
 0x1f9   : > { %1168 = vmatprep.mubr.f32.mxu0 %v6198_v31  ;;  %1257 = vmatprep.mubr.f32.mxu1 %v6198_v31  ;;  %v5179_v3 = vmax.f32 %v914_v62, 0.0  ;;  %v4319_v57 = vpack.c.bf16 %v1022_v50, %v1014_v49  ;;  %v1030_v62 = vld [vmem:[%s4977_s14 + $0x330] sm:$0xff] }
 0x1fa   : > { %4270 = vmatprep.subr.bf16.mxu0 %v4269_v58  ;;  %4302 = vmatprep.subr.bf16.mxu1 %v4301_v59  ;;  %v1028_v58 = vld [vmem:[%s4977_s14 + $0x320] sm:$0xff]  ;;  %v4323_v8 = vpack.c.bf16 %v1038_v63, %v1030_v62  ;;  %v1054_v13 = vld [vmem:[%s4977_s14 + $0x3f0] sm:$0xff] }
 0x1fb   : > { %1169 = vmatmul.mubr.f32.gmra.mrb[10].mxu0 %v5171_v7  ;;  %1258 = vmatmul.mubr.f32.gmra.mrb[10].mxu1 %v5171_v7  ;;  %v1036_v59 = vld [vmem:[%s4977_s14 + $0x360] sm:$0xff]  ;;  %v4327_v15 = vpack.c.bf16 %v1054_v13, %v1046_v12 }
 0x1fc   : > { %4272 = vmatpush1.bf16.msra.mxu0 %v4271_v4  ;;  %4304 = vmatpush1.bf16.msra.mxu1 %v4303_v5  ;;  %v1047_v4 = vld [vmem:[%s4977_s14 + $0x3b8] sm:$0xff]  ;;  %v4291_v6 = vpack.c.bf16 %v1036_v59, %v1028_v58 }
 0x1fd   : > { %1174 = vmatprep.mubr.f32.mxu0 %v6198_v31  ;;  %1263 = vmatprep.mubr.f32.mxu1 %v6198_v31  ;;  %v1055_v5 = vld [vmem:[%s4977_s14 + $0x3f8] sm:$0xff] }
 0x1fe   : > { %4274 = vmatprep.subr.bf16.mxu0 %v4273_v11  ;;  %4306 = vmatprep.subr.bf16.mxu1 %v4305_v1  ;;  %v4325_v11 = vpack.c.bf16 %v1055_v5, %v1047_v4  ;;  %v1052_v1 = vld [vmem:[%s4977_s14 + $0x3e0] sm:$0xff] }
 0x1ff   : > { %1175 = vmatmul.mubr.f32.gmra.mrb[12].mxu0 %v5179_v3  ;;  %1264 = vmatmul.mubr.f32.gmra.mrb[12].mxu1 %v5179_v3  ;;  %v4295_v14 = vpack.c.bf16 %v1052_v1, %v1044_v9 }
 0x200   : > { %4276 = vmatpush1.bf16.msra.mxu0 %v4275_v17  ;;  %4308 = vmatpush1.bf16.msra.mxu1 %v4307_v18 }
 0x201   : > { %1180 = vmatprep.mubr.f32.mxu0 %v6198_v31  ;;  %1269 = vmatprep.mubr.f32.mxu1 %v6198_v31 }
 0x202   : > { %4278 = vmatprep.subr.bf16.mxu0 %v4277_v24  ;;  %4310 = vmatprep.subr.bf16.mxu1 %v4309_v25 }
 0x203   : > { %1181 = vmatmul.mubr.f32.gmra.mrb[14].mxu0 %v5196_v29  ;;  %1270 = vmatmul.mubr.f32.gmra.mrb[14].mxu1 %v5196_v29 }
 0x204   : > { %4280 = vmatpush1.bf16.msra.mxu0 %v4279_v30  ;;  %4312 = vmatpush1.bf16.msra.mxu1 %v4311_v32 }
 0x205   : > { %4282 = vmatprep.subr.bf16.mxu0 %v4281_v35  ;;  %4314 = vmatprep.subr.bf16.mxu1 %v4313_v36 }
 0x206   : > { %1340 = vmatprep.mubr.f32.mxu0 %v6198_v31  ;;  %1429 = vmatprep.mubr.f32.mxu1 %v6198_v31 }
 0x208   : > { %4284 = vmatpush1.bf16.msra.mxu0 %v4283_v43  ;;  %4316 = vmatpush1.bf16.msra.mxu1 %v4315_v44 }
 0x209   : > { %4286 = vmatprep.subr.bf16.mxu0 %v4285_v47  ;;  %4318 = vmatprep.subr.bf16.mxu1 %v4317_v48 }
 0x20c   : > { %4288 = vmatpush1.bf16.msra.mxu0 %v4287_v56  ;;  %4320 = vmatpush1.bf16.msra.mxu1 %v4319_v57 }
 0x20d   : > { %4290 = vmatprep.subr.bf16.mxu0 %v4289_v60  ;;  %4322 = vmatprep.subr.bf16.mxu1 %v4321_v61 }
 0x210   : > { %4292 = vmatpush1.bf16.msra.mxu0 %v4291_v6  ;;  %4324 = vmatpush1.bf16.msra.mxu1 %v4323_v8 }
 0x211   : > { %4294 = vmatprep.subr.bf16.mxu0 %v4293_v10  ;;  %4326 = vmatprep.subr.bf16.mxu1 %v4325_v11 }
 0x214   : > { %4296 = vmatpush1.bf16.msra.mxu0 %v4295_v14  ;;  %4328 = vmatpush1.bf16.msra.mxu1 %v4327_v15 }
 0x217   : > { %1341 = vmatmul.mubr.f32.vlgmr.msra.gmra.mrb[16].mxu0 %v5159_v53  ;;  %1430 = vmatmul.mubr.f32.vlgmr.msra.gmra.mrb[16].mxu1 %v5159_v53  ;;  %v5250_v53 = vpop.f32.mrb[4].mxu1 }
 0x218   : > { %1346 = vmatprep.mubr.f32.mxu0 %v6198_v31  ;;  %1435 = vmatprep.mubr.f32.mxu1 %v6198_v31 }
 0x21b   : > { %1347 = vmatmul.mubr.f32.gmra.mrb[18].mxu0 %v5171_v7  ;;  %1436 = vmatmul.mubr.f32.gmra.mrb[18].mxu1 %v5171_v7  ;;  %v5252_v7 = vpop.f32.mrb[5].mxu1 }
 0x21c   : > { %1352 = vmatprep.mubr.f32.mxu0 %v6198_v31  ;;  %1441 = vmatprep.mubr.f32.mxu1 %v6198_v31  ;;  %v5254_v16 = vpop.f32.mrb[6].mxu1 }
 0x21d   : > { %v5256_v17 = vpop.f32.mrb[7].mxu1 }
 0x21f   : > { %1353 = vmatmul.mubr.f32.gmra.mrb[20].mxu0 %v5179_v3  ;;  %1442 = vmatmul.mubr.f32.gmra.mrb[20].mxu1 %v5179_v3  ;;  %v1058_v3 = vlaneseq }
 0x220   : > { %1358 = vmatprep.mubr.f32.mxu0 %v6198_v31  ;;  %1447 = vmatprep.mubr.f32.mxu1 %v6198_v31 }
 0x221   : > { %v5259_v18 = vshrl.u32 %v1058_v3, 7 }
 0x223   : > { %1359 = vmatmul.mubr.f32.gmra.mrb[22].mxu0 %v5196_v29  ;;  %1448 = vmatmul.mubr.f32.gmra.mrb[22].mxu1 %v5196_v29  ;;  %6205 = vst [vmem:[#allocation5_spill] sm:$0xff] %v5259_v18  ;;  %v6197_v19 = vsub.s32 0, %v5259_v18  ;;  %v6195_v20 = vsub.s32 2, %v5259_v18  ;;  %v6196_v22 = vsub.s32 1, %v5259_v18  ;;  %v6194_v23 = vsub.s32 3, %v5259_v18 }
 0x224   : > { %1837 = vmatprep.mubr.f32.mxu0 %v6198_v31  ;;  %1991 = vmatprep.mubr.f32.mxu1 %v6198_v31 }
 0x225   : > { %v1061_v26 = vrot.slane %v5269_v21, %v6197_v19  ;;  %v1069_v27 = vrot.slane %v5269_v21, %v6195_v20  ;;  %v1065_v30 = vrot.slane %v5269_v21, %v6196_v22  ;;  %v1073_v32 = vrot.slane %v5269_v21, %v6194_v23 }
 0x2ca   : > { %v1164_v24 = vpop.f32.mrb[8].mxu0  ;;  %v1253_v25 = vpop.f32.mrb[8].mxu1 }
 0x2cb   : > { %v1166_v28 = vpop.f32.mrb[9].mxu0  ;;  %v1255_v29 = vpop.f32.mrb[9].mxu1  ;;  %v5285_v35 = vadd.f32 %v1164_v24, %v1061_v26  ;;  %v5287_v36 = vadd.f32 %v1253_v25, %v1069_v27 }
 0x2cc   : > { %v5293_v41 = vadd.f32 %v1166_v28, %v1065_v30  ;;  %v5295_v42 = vadd.f32 %v1255_v29, %v1073_v32 }
 0x2ce   : > { %v1170_v33 = vpop.f32.mrb[10].mxu0  ;;  %v1259_v34 = vpop.f32.mrb[10].mxu1 }
 0x2cf   : > { %v5289_v37 = vadd.f32 %v1170_v33, %v1061_v26  ;;  %v5291_v38 = vadd.f32 %v1259_v34, %v1069_v27  ;;  %v1172_v39 = vpop.f32.mrb[11].mxu0  ;;  %v1261_v40 = vpop.f32.mrb[11].mxu1  ;;  %v6193_v34 = vsub.s32 4, %v5259_v18 }
 0x2d0   : > { %v5297_v43 = vadd.f32 %v1172_v39, %v1065_v30  ;;  %v5299_v44 = vadd.f32 %v1261_v40, %v1073_v32 }
 0x2d1   : > { %v1454_v45 = vmax.f32 %v5285_v35, %v5289_v37  ;;  %v1472_v46 = vmax.f32 %v5287_v36, %v5291_v38 }
 0x2d2   : > { %v1463_v47 = vmax.f32 %v5293_v41, %v5297_v43  ;;  %v1481_v48 = vmax.f32 %v5295_v42, %v5299_v44  ;;  %v1176_v49 = vpop.f32.mrb[12].mxu0  ;;  %v1265_v50 = vpop.f32.mrb[12].mxu1 }
 0x2d3   : > { %v5309_v51 = vadd.f32 %v1176_v49, %v1061_v26  ;;  %v5311_v52 = vadd.f32 %v1265_v50, %v1069_v27  ;;  %v1178_v54 = vpop.f32.mrb[13].mxu0  ;;  %v1267_v55 = vpop.f32.mrb[13].mxu1 }
 0x2d4   : > { %v5313_v56 = vadd.f32 %v1178_v54, %v1065_v30  ;;  %v5315_v57 = vadd.f32 %v1267_v55, %v1073_v32 }
 0x2d5   : > { %v1455_v58 = vmax.f32 %v1454_v45, %v5309_v51  ;;  %v1473_v59 = vmax.f32 %v1472_v46, %v5311_v52  ;;  %v6192_v45 = vsub.s32 6, %v5259_v18  ;;  %v6191_v46 = vsub.s32 5, %v5259_v18 }
 0x2d6   : > { %v1464_v60 = vmax.f32 %v1463_v47, %v5313_v56  ;;  %v1482_v61 = vmax.f32 %v1481_v48, %v5315_v57  ;;  %v1182_v62 = vpop.f32.mrb[14].mxu0  ;;  %v1271_v63 = vpop.f32.mrb[14].mxu1 }
 0x2d7   : > { %v1183_v0 = vadd.f32 %v1182_v62, %v1061_v26  ;;  %v5321_v2 = vadd.f32 %v1271_v63, %v1069_v27  ;;  %v1184_v4 = vpop.f32.mrb[15].mxu0  ;;  %v1273_v5 = vpop.f32.mrb[15].mxu1  ;;  %v5344_v62 = vrot.slane %v5269_v21, %v6192_v45  ;;  %v5349_v63 = vrot.slane %v5269_v21, %v6191_v46 }
 0x2d8   : > { %v5323_v6 = vadd.f32 %v1184_v4, %v1065_v30  ;;  %v5325_v8 = vadd.f32 %v1273_v5, %v1073_v32 }
 0x2d9   : > { %v1456_v9 = vmax.f32 %v1455_v58, %v1183_v0  ;;  %v1474_v10 = vmax.f32 %v1473_v59, %v5321_v2  ;;  %v5336_v58 = vrot.slane %v5269_v21, %v6193_v34  ;;  %v6190_v59 = vsub.s32 7, %v5259_v18 }
 0x2da   : > { %v1465_v11 = vmax.f32 %v1464_v60, %v5323_v6  ;;  %v1483_v1 = vmax.f32 %v1482_v61, %v5325_v8 }
 0x2db   : > { %v1457_v12 = vrot.slane %v1456_v9, 4  ;;  %v1475_v13 = vrot.slane %v1474_v10, 4 }
 0x2dc   : > { %v1466_v14 = vrot.slane %v1465_v11, 4  ;;  %v1484_v15 = vrot.slane %v1483_v1, 4 }
 0x2dd   : > { %v1458_v3 = vmax.f32 %v1456_v9, %v1457_v12  ;;  %v1476_v24 = vmax.f32 %v1474_v10, %v1475_v13 }
 0x2de   : > { %v1467_v25 = vmax.f32 %v1465_v11, %v1466_v14  ;;  %v1485_v26 = vmax.f32 %v1483_v1, %v1484_v15 }
 0x2df   : > { %v1459_v27 = vrot.slane %v1458_v3, 2  ;;  %v1477_v28 = vrot.slane %v1476_v24, 2 }
 0x2e0   : > { %v1468_v29 = vrot.slane %v1467_v25, 2  ;;  %v1486_v30 = vrot.slane %v1485_v26, 2 }
 0x2e1   : > { %v1460_v32 = vmax.f32 %v1458_v3, %v1459_v27  ;;  %v1478_v33 = vmax.f32 %v1476_v24, %v1477_v28 }
 0x2e2   : > { %v1469_v39 = vmax.f32 %v1467_v25, %v1468_v29  ;;  %v1487_v40 = vmax.f32 %v1485_v26, %v1486_v30 }
 0x2e3   : > { %v1461_v47 = vrot.slane %v1460_v32, 1  ;;  %v1479_v48 = vrot.slane %v1478_v33, 1 }
 0x2e4   : > { %v1470_v49 = vrot.slane %v1469_v39, 1  ;;  %v1488_v50 = vrot.slane %v1487_v40, 1 }
 0x2e5   : > { %v1462_v54 = vmax.f32 %v1460_v32, %v1461_v47  ;;  %v1480_v55 = vmax.f32 %v1478_v33, %v1479_v48 }
 0x2e6   : > { %v1471_v60 = vmax.f32 %v1469_v39, %v1470_v49  ;;  %v5339_v61 = vmax.f32 %v1487_v40, %v1488_v50 }
 0x2e7   : > { %v1526_v4 = vsub.f32 %v5285_v35, %v1462_v54  ;;  %v1534_v5 = vsub.f32 %v5289_v37, %v1462_v54  ;;  %v1542_v9 = vsub.f32 %v5309_v51, %v1462_v54  ;;  %v1550_v10 = vsub.f32 %v1183_v0, %v1462_v54 }
 0x2e8   : > { %v1528_v11 = vsub.f32 %v5287_v36, %v1480_v55  ;;  %v1536_v1 = vsub.f32 %v5291_v38, %v1480_v55  ;;  %v1544_v12 = vsub.f32 %v5311_v52, %v1480_v55  ;;  %v1552_v13 = vsub.f32 %v5321_v2, %v1480_v55 }
 0x2e9   : > { %v1558_v14 = vmul.f32 1.442695, %v1526_v4  ;;  %v1574_v15 = vmul.f32 1.442695, %v1534_v5  ;;  %v1590_v3 = vmul.f32 1.442695, %v1542_v9  ;;  %v1527_v24 = vsub.f32 %v5293_v41, %v1471_v60 }
 0x2ea   : > { %v1606_v25 = vmul.f32 1.442695, %v1550_v10  ;;  %v1562_v35 = vmul.f32 1.442695, %v1528_v11  ;;  %v1535_v37 = vsub.f32 %v5297_v43, %v1471_v60  ;;  %v5363_v51 = vrot.slane %v5269_v21, %v6190_v59  ;;  %v1342_v0 = vpop.f32.mrb[16].mxu0  ;;  %v1431_v2 = vpop.f32.mrb[16].mxu1 }
 0x2eb   : > { %4598 = vpow2.f32 %v1558_v14  ;;  %v1578_v36 = vmul.f32 1.442695, %v1536_v1  ;;  %v1594_v38 = vmul.f32 1.442695, %v1544_v12  ;;  %v1543_v52 = vsub.f32 %v5313_v56, %v1471_v60  ;;  %v1344_v28 = vpop.f32.mrb[17].mxu0  ;;  %v1433_v29 = vpop.f32.mrb[17].mxu1 }
 0x2ec   : > { %4600 = vpow2.f32 %v1574_v15  ;;  %v1610_v26 = vmul.f32 1.442695, %v1552_v13  ;;  %v1551_v41 = vsub.f32 %v5323_v6, %v1471_v60  ;;  %v1560_v27 = vmul.f32 1.442695, %v1527_v24 }
 0x2ed   : > { %4602 = vpow2.f32 %v1590_v3  ;;  %v1576_v43 = vmul.f32 1.442695, %v1535_v37  ;;  %v1529_v21 = vsub.f32 %v5295_v42, %v5339_v61  ;;  %v1537_v30 = vsub.f32 %v5299_v44, %v5339_v61 }
 0x2ee   : > { %4604 = vpow2.f32 %v1606_v25  ;;  %v1592_v32 = vmul.f32 1.442695, %v1543_v52  ;;  %v1545_v56 = vsub.f32 %v5315_v57, %v5339_v61  ;;  %v1553_v33 = vsub.f32 %v5325_v8, %v5339_v61  ;;  %v1348_v6 = vpop.f32.mrb[18].mxu0  ;;  %v1437_v39 = vpop.f32.mrb[18].mxu1 }
 0x2ef   : > { %4606 = vpow2.f32 %v1562_v35  ;;  %v1608_v40 = vmul.f32 1.442695, %v1551_v41  ;;  %v1564_v47 = vmul.f32 1.442695, %v1529_v21  ;;  %v1350_v48 = vpop.f32.mrb[19].mxu0  ;;  %v1439_v49 = vpop.f32.mrb[19].mxu1  ;;  %v5376_v50 = vadd.f32 %v1342_v0, %v5336_v58 }
 0x2f0   : > { %4608 = vpow2.f32 %v1578_v36  ;;  %v1580_v42 = vmul.f32 1.442695, %v1537_v30  ;;  %v5379_v44 = vadd.f32 %v1431_v2, %v5344_v62  ;;  %v5382_v57 = vadd.f32 %v1344_v28, %v5349_v63 }
 0x2f1   : > { %4610 = vpow2.f32 %v1594_v38  ;;  %v5385_v8 = vadd.f32 %v1433_v29, %v5363_v51  ;;  %v5388_v54 = vadd.f32 %v1348_v6, %v5336_v58  ;;  %v5391_v55 = vadd.f32 %v1437_v39, %v5344_v62 }
 0x2f2   : > { %4612 = vpow2.f32 %v1610_v26  ;;  %v5394_v60 = vadd.f32 %v1350_v48, %v5349_v63  ;;  %v5397_v61 = vadd.f32 %v1439_v49, %v5363_v51  ;;  %v1354_v4 = vpop.f32.mrb[20].mxu0  ;;  %v1443_v5 = vpop.f32.mrb[20].mxu1  ;;  %v1596_v36 = vmul.f32 1.442695, %v1545_v56 }
 0x2f3   : > { %4614 = vpow2.f32 %v1560_v27  ;;  %v1490_v9 = vmax.f32 %v5376_v50, %v5388_v54  ;;  %v5402_v10 = vadd.f32 %v1354_v4, %v5336_v58  ;;  %v5405_v11 = vadd.f32 %v1443_v5, %v5344_v62  ;;  %v1356_v1 = vpop.f32.mrb[21].mxu0  ;;  %v1445_v12 = vpop.f32.mrb[21].mxu1 }
 0x2f4   : > { %4616 = vpow2.f32 %v1576_v43  ;;  %v1508_v13 = vmax.f32 %v5379_v44, %v5391_v55  ;;  %v1499_v14 = vmax.f32 %v5382_v57, %v5394_v60  ;;  %v1517_v15 = vmax.f32 %v5385_v8, %v5397_v61 }
 0x2f5   : > { %v5413_v3 = vpop.eup %4598  ;;  %4618 = vpow2.f32 %v1592_v32  ;;  %v1491_v24 = vmax.f32 %v1490_v9, %v5402_v10  ;;  %v5417_v25 = vadd.f32 %v1356_v1, %v5349_v63  ;;  %v5420_v35 = vadd.f32 %v1445_v12, %v5363_v51 }
 0x2f6   : > { %v5422_v37 = vpop.eup %4600  ;;  %4620 = vpow2.f32 %v1608_v40  ;;  %v1612_v38 = vmul.f32 1.442695, %v1553_v33  ;;  %v1509_v52 = vmax.f32 %v1508_v13, %v5405_v11  ;;  %v1360_v0 = vpop.f32.mrb[22].mxu0 }
 0x2f7   : > { %v1449_v2 = vpop.f32.mrb[22].mxu1  ;;  %v5425_v26 = vpop.eup %4602  ;;  %v1622_v41 = vadd.f32 %v5422_v37, %v5413_v3  ;;  %4622 = vpow2.f32 %v1564_v47  ;;  %v1500_v27 = vmax.f32 %v1499_v14, %v5417_v25  ;;  %v1518_v28 = vmax.f32 %v1517_v15, %v5420_v35 }
 0x2f8   : > { %v1362_v29 = vpop.f32.mrb[23].mxu0  ;;  %v1451_v43 = vpop.f32.mrb[23].mxu1  ;;  %4624 = vpow2.f32 %v1580_v42  ;;  %v5434_v30 = vadd.f32 %v1360_v0, %v5336_v58  ;;  %v5437_v32 = vadd.f32 %v1449_v2, %v5344_v62 }
 0x2f9   : > { %v5431_v21 = vpop.eup %4604  ;;  %v5440_v56 = vadd.f32 %v1362_v29, %v5349_v63  ;;  %v1623_v6 = vadd.f32 %v5425_v26, %v1622_v41  ;;  %v5446_v39 = vadd.f32 %v1451_v43, %v5363_v51  ;;  %4626 = vpow2.f32 %v1596_v36 }
 0x2fa   : > { %v5442_v33 = vpop.eup %4606  ;;  %v1492_v47 = vmax.f32 %v1491_v24, %v5434_v30  ;;  %v1510_v58 = vmax.f32 %v1509_v52, %v5437_v32  ;;  %4628 = vpow2.f32 %v1612_v38 }
 0x2fb   : > { %v5448_v40 = vpop.eup %4608  ;;  %v1501_v62 = vmax.f32 %v1500_v27, %v5440_v56  ;;  %v1624_v63 = vadd.f32 %v5431_v21, %v1623_v6  ;;  %v1519_v42 = vmax.f32 %v1518_v28, %v5446_v39 }
 0x2fc   : > { %v5453_v48 = vpop.eup %4610  ;;  %v1640_v49 = vadd.f32 %v5448_v40, %v5442_v33  ;;  %v1493_v4 = vrot.slane %v1492_v47, 4  ;;  %v1511_v5 = vrot.slane %v1510_v58, 4 }
 0x2fd   : > { %v5459_v51 = vpop.eup %4612  ;;  %v1502_v9 = vrot.slane %v1501_v62, 4  ;;  %v1625_v12 = vrot.slane %v1624_v63, 4  ;;  %v1520_v14 = vrot.slane %v1519_v42, 4 }
 0x2fe   : > { %v5461_v1 = vpop.eup %4614  ;;  %v1641_v13 = vadd.f32 %v5453_v48, %v1640_v49  ;;  %v1494_v24 = vmax.f32 %v1492_v47, %v1493_v4  ;;  %v1512_v36 = vmax.f32 %v1510_v58, %v1511_v5 }
 0x2ff   : > { %v5464_v15 = vpop.eup %4616  ;;  %v1503_v52 = vmax.f32 %v1501_v62, %v1502_v9  ;;  %v1626_v2 = vadd.f32 %v1625_v12, %v1624_v63  ;;  %v1521_v27 = vmax.f32 %v1519_v42, %v1520_v14 }
 0x300   : > { %v5466_v0 = vpop.eup %4618  ;;  %v1642_v41 = vadd.f32 %v5459_v51, %v1641_v13  ;;  %v1631_v38 = vadd.f32 %v5464_v15, %v5461_v1  ;;  %v1495_v29 = vrot.slane %v1494_v24, 2  ;;  %v1513_v43 = vrot.slane %v1512_v36, 2 }
 0x301   : > { %v5471_v28 = vpop.eup %4620  ;;  %v1504_v6 = vrot.slane %v1503_v52, 2  ;;  %v1627_v59 = vrot.slane %v1626_v2, 2  ;;  %v1522_v9 = vrot.slane %v1521_v27, 2 }
 0x302   : > { %v5473_v49 = vpop.eup %4622  ;;  %v1643_v47 = vrot.slane %v1642_v41, 4  ;;  %v1632_v58 = vadd.f32 %v5466_v0, %v1631_v38  ;;  %v1496_v63 = vmax.f32 %v1494_v24, %v1495_v29  ;;  %v1514_v4 = vmax.f32 %v1512_v36, %v1513_v43 }
 0x303   : > { %v5476_v62 = vpop.eup %4624  ;;  %v1505_v5 = vmax.f32 %v1503_v52, %v1504_v6  ;;  %v1628_v12 = vadd.f32 %v1627_v59, %v1626_v2 }
 0x304   : > { %v1644_v13 = vadd.f32 %v1643_v47, %v1642_v41  ;;  %v1633_v42 = vadd.f32 %v5471_v28, %v1632_v58  ;;  %v1649_v14 = vadd.f32 %v5476_v62, %v5473_v49  ;;  %v5481_v46 = vpop.eup %4626  ;;  %v1497_v45 = vrot.slane %v1496_v63, 1 }
 0x305   : > { %v1515_v34 = vrot.slane %v1514_v4, 1  ;;  %v1506_v23 = vrot.slane %v1505_v5, 1  ;;  %v1629_v20 = vrot.slane %v1628_v12, 1  ;;  %v5484_v36 = vpop.eup %4628  ;;  %v1523_v41 = vmax.f32 %v1521_v27, %v1522_v9 }
 0x306   : > { %v1645_v38 = vrot.slane %v1644_v13, 2  ;;  %v1634_v22 = vrot.slane %v1633_v42, 4  ;;  %v1650_v24 = vadd.f32 %v5481_v46, %v1649_v14  ;;  %v1498_v52 = vmax.f32 %v1496_v63, %v1497_v45 }
 0x307   : > { %v1516_v59 = vmax.f32 %v1514_v4, %v1515_v34  ;;  %v5486_v2 = vmax.f32 %v1505_v5, %v1506_v23  ;;  %v1630_v29 = vadd.f32 %v1629_v20, %v1628_v12 }
 0x308   : > { %v1646_v43 = vadd.f32 %v1645_v38, %v1644_v13  ;;  %v1635_v6 = vadd.f32 %v1634_v22, %v1633_v42  ;;  %v1651_v47 = vadd.f32 %v5484_v36, %v1650_v24  ;;  %v1530_v58 = vsub.f32 %v5376_v50, %v1498_v52 }
 0x309   : > { %v1538_v19 = vsub.f32 %v5388_v54, %v1498_v52  ;;  %v1546_v31 = vsub.f32 %v5402_v10, %v1498_v52  ;;  %v1554_v14 = vsub.f32 %v5434_v30, %v1498_v52  ;;  %4630 = vrcp.f32 %v1630_v29 }
 0x30a   : > { %v1647_v18 = vrot.slane %v1646_v43, 1  ;;  %v1636_v45 = vrot.slane %v1635_v6, 2  ;;  %v1652_v34 = vrot.slane %v1651_v47, 4  ;;  %v1566_v23 = vmul.f32 1.442695, %v1530_v58 }
 0x30b   : > { %v1582_v63 = vmul.f32 1.442695, %v1538_v19  ;;  %v1598_v27 = vmul.f32 1.442695, %v1546_v31  ;;  %v1532_v20 = vsub.f32 %v5379_v44, %v1516_v59  ;;  %v1614_v9 = vmul.f32 1.442695, %v1554_v14 }
 0x30c   : > { %v1648_v22 = vadd.f32 %v1647_v18, %v1646_v43  ;;  %v1637_v4 = vadd.f32 %v1636_v45, %v1635_v6  ;;  %v1653_v5 = vadd.f32 %v1652_v34, %v1651_v47  ;;  %4632 = vpow2.f32 %v1566_v23 }
 0x30d   : > { %v1540_v50 = vsub.f32 %v5391_v55, %v1516_v59  ;;  %v1548_v54 = vsub.f32 %v5405_v11, %v1516_v59  ;;  %v1556_v10 = vsub.f32 %v5437_v32, %v1516_v59  ;;  %v1524_v13 = vrot.slane %v1523_v41, 1 }
 0x30e   : > { %4634 = vrcp.f32 %v1648_v22  ;;  %v1638_v30 = vrot.slane %v1637_v4, 1  ;;  %v1654_v12 = vrot.slane %v1653_v5, 2  ;;  %v1570_v19 = vmul.f32 1.442695, %v1532_v20 }
 0x30f   : > { %4636 = vpow2.f32 %v1582_v63  ;;  %v1586_v31 = vmul.f32 1.442695, %v1540_v50  ;;  %v1602_v42 = vmul.f32 1.442695, %v1548_v54  ;;  %v1531_v38 = vsub.f32 %v5382_v57, %v5486_v2 }
 0x310   : > { %v1639_v44 = vadd.f32 %v1638_v30, %v1637_v4  ;;  %v1655_v18 = vadd.f32 %v1654_v12, %v1653_v5  ;;  %4638 = vpow2.f32 %v1598_v27  ;;  %v1539_v55 = vsub.f32 %v5394_v60, %v5486_v2 }
 0x311   : > { %4640 = vpow2.f32 %v1614_v9  ;;  %v1547_v11 = vsub.f32 %v5417_v25, %v5486_v2  ;;  %v1555_v32 = vsub.f32 %v5440_v56, %v5486_v2  ;;  %v1525_v52 = vmax.f32 %v1523_v41, %v1524_v13 }
 0x312   : > { %4642 = vrcp.f32 %v1639_v44  ;;  %v1656_v24 = vrot.slane %v1655_v18, 1  ;;  %v1618_v59 = vmul.f32 1.442695, %v1556_v10  ;;  %v1568_v29 = vmul.f32 1.442695, %v1531_v38 }
 0x313   : > { %4644 = vpow2.f32 %v1570_v19  ;;  %v1584_v43 = vmul.f32 1.442695, %v1539_v55  ;;  %v4631_v6 = vpop.eup %4630  ;;  %v1533_v57 = vsub.f32 %v5385_v8, %v1525_v52  ;;  %v1541_v60 = vsub.f32 %v5397_v61, %v1525_v52 }
 0x314   : > { %v1657_v47 = vadd.f32 %v1656_v24, %v1655_v18  ;;  %4646 = vpow2.f32 %v1586_v31  ;;  %v1549_v25 = vsub.f32 %v5420_v35, %v1525_v52  ;;  %v1557_v58 = vsub.f32 %v5446_v39, %v1525_v52 }
 0x315   : > { %4648 = vpow2.f32 %v1602_v42  ;;  %v1702_v56 = vmul.f32 %v4631_v6, %v5413_v3  ;;  %v1600_v2 = vmul.f32 1.442695, %v1547_v11  ;;  %v1710_v41 = vmul.f32 %v4631_v6, %v5422_v37 }
 0x316   : > { %4650 = vrcp.f32 %v1657_v47  ;;  %v5511_v14 = vpop.eup %4632  ;;  %v1616_v45 = vmul.f32 1.442695, %v1555_v32  ;;  %v1572_v34 = vmul.f32 1.442695, %v1533_v57  ;;  %v5514_v8 = vmul.f32 %v4631_v6, %v5425_v26 }
 0x317   : > { %4652 = vpow2.f32 %v1618_v59  ;;  %v1588_v23 = vmul.f32 1.442695, %v1541_v60  ;;  %v4331_v35 = vpack.c.bf16 %v1710_v41, %v1702_v56  ;;  %v1726_v39 = vmul.f32 %v4631_v6, %v5431_v21 }
 0x318   : > { %v4635_v61 = vpop.eup %4634  ;;  %4654 = vpow2.f32 %v1568_v29  ;;  %v1620_v9 = vmul.f32 1.442695, %v1557_v58 }
 0x319   : > { %v5517_v63 = vpop.eup %4636  ;;  %4656 = vpow2.f32 %v1584_v43  ;;  %v5520_v3 = vmul.f32 %v4635_v61, %v5442_v33  ;;  %v5523_v37 = vmul.f32 %v4635_v61, %v5448_v40  ;;  %v5526_v27 = vmul.f32 %v4635_v61, %v5453_v48 }
 0x31a   : > { %v5528_v26 = vpop.eup %4638  ;;  %v1658_v20 = vadd.f32 %v5517_v63, %v5511_v14  ;;  %4658 = vpow2.f32 %v1600_v2  ;;  %v4335_v21 = vpack.c.bf16 %v1726_v39, %v5514_v8  ;;  %v5534_v22 = vmul.f32 %v4635_v61, %v5459_v51 }
 0x31b   : > { %v5536_v4 = vpop.eup %4640  ;;  %4660 = vpow2.f32 %v1616_v45  ;;  %v1604_v33 = vmul.f32 1.442695, %v1549_v25  ;;  %v4339_v40 = vpack.c.bf16 %v5523_v37, %v5520_v3 }
 0x31c   : > { %v4643_v48 = vpop.eup %4642  ;;  %v1659_v5 = vadd.f32 %v5528_v26, %v1658_v20  ;;  %4662 = vpow2.f32 %v1572_v34  ;;  %v4343_v50 = vpack.c.bf16 %v5534_v22, %v5526_v27  ;;  %v6206_v20 = vmov 0.0  }
 0x31d   : > { %v5543_v54 = vpop.eup %4644  ;;  %4664 = vpow2.f32 %v1588_v23  ;;  %v1703_v51 = vmul.f32 %v4643_v48, %v5461_v1  ;;  %v1711_v10 = vmul.f32 %v4643_v48, %v5464_v15  ;;  %v1719_v30 = vmul.f32 %v4643_v48, %v5466_v0 }
 0x31e   : > { %v5548_v12 = vpop.eup %4646  ;;  %v1660_v13 = vadd.f32 %v5536_v4, %v1659_v5  ;;  %v1727_v19 = vmul.f32 %v4643_v48, %v5471_v28  ;;  %4666 = vpow2.f32 %v1604_v33 }
 0x31f   : > { %v5552_v31 = vpop.eup %4648  ;;  %v1676_v42 = vadd.f32 %v5548_v12, %v5543_v54  ;;  %v4329_v44 = vpack.c.bf16 %v1711_v10, %v1703_v51  ;;  %4668 = vpow2.f32 %v1620_v9 }
 0x320   : > { %v4651_v18 = vpop.eup %4650  ;;  %v1661_v38 = vrot.slane %v1660_v13, 4  ;;  %v4333_v1 = vpack.c.bf16 %v1727_v19, %v1719_v30 }
 0x321   : > { %v5556_v15 = vpop.eup %4652  ;;  %v1677_v0 = vadd.f32 %v5552_v31, %v1676_v42  ;;  %4330 = vmatprep.subr.bf16.mxu0 %v4329_v44  ;;  %v1705_v55 = vmul.f32 %v4651_v18, %v5473_v49  ;;  %v1713_v28 = vmul.f32 %v4651_v18, %v5476_v62  ;;  %v1721_v11 = vmul.f32 %v4651_v18, %v5481_v46  ;;  %v5572_v62 = vpop.trf.xlu0 }
 0x322   : > { %v5562_v32 = vpop.eup %4654  ;;  %v1662_v24 = vadd.f32 %v1661_v38, %v1660_v13  ;;  %4332 = vmatpush1.bf16.msra.mxu0 %v4331_v35  ;;  %v1729_v52 = vmul.f32 %v4651_v18, %v5484_v36 }
 0x323   : > { %v5565_v59 = vpop.eup %4656  ;;  %v1678_v29 = vadd.f32 %v5556_v15, %v1677_v0  ;;  %4334 = vmatprep.subr.bf16.mxu0 %v4333_v1  ;;  %v4337_v43 = vpack.c.bf16 %v1713_v28, %v1705_v55 }
 0x324   : > { %v5568_v6 = vpop.eup %4658  ;;  %v1663_v47 = vrot.slane %v1662_v24, 2  ;;  %v1667_v49 = vadd.f32 %v5565_v59, %v5562_v32  ;;  %v4341_v46 = vpack.c.bf16 %v1729_v52, %v1721_v11 }
 0x325   : > { %v5574_v57 = vpop.eup %4660  ;;  %v1679_v60 = vrot.slane %v1678_v29, 4  ;;  %v5586_v37 = vpop.trf.xlu0 }
 0x326   : > { %v5576_v25 = vpop.eup %4662  ;;  %v1664_v36 = vadd.f32 %v1663_v47, %v1662_v24  ;;  %v1668_v58 = vadd.f32 %v5568_v6, %v1667_v49  ;;  %4336 = vmatpush1.bf16.msra.mxu0 %v4335_v21 }
 0x327   : > { %v5579_v56 = vpop.eup %4664  ;;  %v1680_v2 = vadd.f32 %v1679_v60, %v1678_v29  ;;  %4338 = vmatprep.subr.bf16.mxu0 %v4337_v43 }
 0x328   : > { %v1665_v41 = vrot.slane %v1664_v36, 1  ;;  %v1669_v45 = vadd.f32 %v5574_v57, %v1668_v58  ;;  %v1685_v34 = vadd.f32 %v5579_v56, %v5576_v25  ;;  %v4667_v8 = vpop.eup %4666 }
 0x329   : > { %v1681_v61 = vrot.slane %v1680_v2, 2  ;;  %4076 = vmatmul.mubr.msk.f32.vlgmr.msra.gmra.mrb[24].mxu0 %vm1766_vm2, %v5572_v62  ;;  %v4669_v23 = vpop.eup %4668 }
 0x32a   : > { %v1666_v35 = vadd.f32 %v1665_v41, %v1664_v36  ;;  %v1670_v39 = vrot.slane %v1669_v45, 4  ;;  %v1686_v3 = vadd.f32 %v4667_v8, %v1685_v34  ;;  %4340 = vmatpush1.bf16.msra.mxu0 %v4339_v40  ;;  %1843 = vmatprep.mubr.f32.mxu0 %v6206_v20 }
 0x32b   : > { %v1682_v21 = vadd.f32 %v1681_v61, %v1680_v2  ;;  %4342 = vmatprep.subr.bf16.mxu0 %v4341_v46  ;;  %v5640_v61 = vld [vmem:[%s5637_s21] sm:$0x7] }
 0x32c   : > { %4670 = vrcp.f32 %v1666_v35  ;;  %v1671_v33 = vadd.f32 %v1670_v39, %v1669_v45  ;;  %v1687_v48 = vadd.f32 %v4669_v23, %v1686_v3 }
 0x32d   : > { %v1683_v5 = vrot.slane %v1682_v21, 1  ;;  %4077 = vmatmul.mubr.msk.f32.gmra.mrb[26].mxu0 %vm1766_vm2, %v5586_v37 }
 0x32e   : > { %v1672_v9 = vrot.slane %v1671_v33, 2  ;;  %v1688_v51 = vrot.slane %v1687_v48, 4  ;;  %4344 = vmatpush1.bf16.msra.mxu0 %v4343_v50  ;;  %1914 = vmatprep.mubr.f32.mxu0 %v6206_v20 }
 0x32f   : > { %v1684_v40 = vadd.f32 %v1683_v5, %v1682_v21 }
 0x330   : > { %v1673_v10 = vadd.f32 %v1672_v9, %v1671_v33  ;;  %v1689_v30 = vadd.f32 %v1688_v51, %v1687_v48  ;;  %v2396_v33 = vld [vmem:[%s4977_s14 + $0x8] sm:$0xff] }
 0x331   : > { %4672 = vrcp.f32 %v1684_v40  ;;  %4078 = vmatmul.mubr.msk.f32.vlgmr.msra.gmra.mrb[28].mxu0 %vm1766_vm2, %v5572_v62  ;;  %v2404_v48 = vld [vmem:[%s4977_s14 + $0x48] sm:$0xff] }
 0x332   : > { %v1674_v13 = vrot.slane %v1673_v10, 1  ;;  %v1690_v19 = vrot.slane %v1689_v30, 2  ;;  %1920 = vmatprep.mubr.f32.mxu0 %v6206_v20 }
 0x334   : > { %v1675_v42 = vadd.f32 %v1674_v13, %v1673_v10  ;;  %v1691_v44 = vadd.f32 %v1690_v19, %v1689_v30  ;;  %v4377_v13 = vpack.c.bf16 %v2404_v48, %v2396_v33  ;;  %v2398_v19 = vld [vmem:[%s4977_s14 + $0x18] sm:$0xff] }
 0x335   : > { %4079 = vmatmul.mubr.msk.f32.gmra.mrb[30].mxu0 %vm1766_vm2, %v5586_v37  ;;  %v2462_v48 = vld [vmem:[%s4977_s14 + $0x218] sm:$0xff] }
 0x336   : > { %v4671_v27 = vpop.eup %4670  ;;  %4674 = vrcp.f32 %v1675_v42  ;;  %v1692_v22 = vrot.slane %v1691_v44, 1  ;;  %2068 = vmatprep.mubr.f32.mxu0 %v6206_v20  ;;  %v2395_v42 = vld [vmem:[%s4977_s14] sm:$0xff] }
 0x337   : > { %v1706_v50 = vmul.f32 %v4671_v27, %v5511_v14  ;;  %v1714_v18 = vmul.f32 %v4671_v27, %v5517_v63  ;;  %v1722_v38 = vmul.f32 %v4671_v27, %v5528_v26  ;;  %v1730_v1 = vmul.f32 %v4671_v27, %v5536_v4  ;;  %v2406_v27 = vld [vmem:[%s4977_s14 + $0x58] sm:$0xff] }
 0x338   : > { %v1693_v0 = vadd.f32 %v1692_v22, %v1691_v44  ;;  %v2403_v44 = vld [vmem:[%s4977_s14 + $0x40] sm:$0xff]  ;;  %v2412_v22 = vld [vmem:[%s4977_s14 + $0x88] sm:$0xff] }
 0x339   : > { %v4347_v55 = vpack.c.bf16 %v1714_v18, %v1706_v50  ;;  %v4351_v28 = vpack.c.bf16 %v1730_v1, %v1722_v38  ;;  %v2420_v50 = vld [vmem:[%s4977_s14 + $0xc8] sm:$0xff] }
 0x33a   : > { %4676 = vrcp.f32 %v1693_v0  ;;  %v4379_v0 = vpack.c.bf16 %v2403_v44, %v2395_v42  ;;  %v2469_v42 = vld [vmem:[%s4977_s14 + $0x250] sm:$0xff] }
 0x33b   : > { %v4673_v11 = vpop.eup %4672 }
 0x33c   : > { %v1708_v24 = vmul.f32 %v4673_v11, %v5543_v54  ;;  %v1716_v52 = vmul.f32 %v4673_v11, %v5548_v12  ;;  %v1724_v29 = vmul.f32 %v4673_v11, %v5552_v31  ;;  %v1732_v43 = vmul.f32 %v4673_v11, %v5556_v15 }
 0x33e   : > { %v4355_v14 = vpack.c.bf16 %v1716_v52, %v1708_v24  ;;  %v4359_v47 = vpack.c.bf16 %v1732_v43, %v1724_v29  ;;  %v4409_v24 = vpack.c.bf16 %v2406_v27, %v2398_v19  ;;  %v4381_v52 = vpack.c.bf16 %v2420_v50, %v2412_v22  ;;  %v2414_v29 = vld [vmem:[%s4977_s14 + $0x98] sm:$0xff]  ;;  %v2411_v43 = vld [vmem:[%s4977_s14 + $0x80] sm:$0xff]  ;;  %v2461_v19 = vld [vmem:[%s4977_s14 + $0x210] sm:$0xff] }
 0x33f   : > { %v2478_v22 = vld [vmem:[%s4977_s14 + $0x298] sm:$0xff]  ;;  %v2475_v50 = vld [vmem:[%s4977_s14 + $0x280] sm:$0xff] }
 0x340   : > { %v4675_v63 = vpop.eup %4674 }
 0x341   : > { %v1707_v26 = vmul.f32 %v4675_v63, %v5562_v32  ;;  %v1715_v4 = vmul.f32 %v4675_v63, %v5565_v59  ;;  %v1723_v49 = vmul.f32 %v4675_v63, %v5568_v6  ;;  %v1731_v46 = vmul.f32 %v4675_v63, %v5574_v57  ;;  %v2082_v57 = vld [vmem:[%s5631_s28] sm:$0x7]  ;;  %v2428_v63 = vld [vmem:[%s4977_s14 + $0x108] sm:$0xff] }
 0x343   : > { %v4345_v60 = vpack.c.bf16 %v1715_v4, %v1707_v26  ;;  %v4349_v36 = vpack.c.bf16 %v1731_v46, %v1723_v49  ;;  %v2436_v26 = vld [vmem:[%s4977_s14 + $0x148] sm:$0xff]  ;;  %v2413_v46 = vld [vmem:[%s4977_s14 + $0x90] sm:$0xff] }
 0x344   : > { %v4677_v54 = vpop.eup %4676 }
 0x345   : > { %4346 = vmatprep.subr.bf16.mxu1 %v4345_v60  ;;  %v1709_v12 = vmul.f32 %v4677_v54, %v5576_v25  ;;  %v1717_v31 = vmul.f32 %v4677_v54, %v5579_v56  ;;  %v1725_v15 = vmul.f32 %v4677_v54, %v4667_v8  ;;  %v1733_v58 = vmul.f32 %v4677_v54, %v4669_v23  ;;  %v2421_v60 = vld [vmem:[%s4977_s14 + $0xd0] sm:$0xff] }
 0x346   : > { %4348 = vmatpush1.bf16.msra.mxu1 %v4347_v55  ;;  %v2397_v55 = vld [vmem:[%s4977_s14 + $0x10] sm:$0xff]  ;;  %v4385_v54 = vpack.c.bf16 %v2436_v26, %v2428_v63  ;;  %v2502_v63 = vld [vmem:[%s4977_s14 + $0x358] sm:$0xff]  ;;  %v2508_v26 = vld [vmem:[%s4977_s14 + $0x388] sm:$0xff] }
 0x347   : > { %v4353_v2 = vpack.c.bf16 %v1717_v31, %v1709_v12  ;;  %4350 = vmatprep.subr.bf16.mxu1 %v4349_v36  ;;  %v4357_v32 = vpack.c.bf16 %v1733_v58, %v1725_v15  ;;  %v2430_v12 = vld [vmem:[%s4977_s14 + $0x118] sm:$0xff]  ;;  %v2427_v31 = vld [vmem:[%s4977_s14 + $0x100] sm:$0xff] }
 0x348   : > { %v2435_v15 = vld [vmem:[%s4977_s14 + $0x140] sm:$0xff]  ;;  %v2438_v58 = vld [vmem:[%s4977_s14 + $0x158] sm:$0xff] }
 0x349   : > { %4354 = vmatprep.subr.bf16.mxu0 %v4353_v2  ;;  %v2444_v2 = vld [vmem:[%s4977_s14 + $0x188] sm:$0xff] }
 0x34a   : > { %4356 = vmatpush1.bf16.msra.mxu0 %v4355_v14  ;;  %4352 = vmatpush1.bf16.msra.mxu1 %v4351_v28  ;;  %v2405_v28 = vld [vmem:[%s4977_s14 + $0x50] sm:$0xff]  ;;  %v2419_v14 = vld [vmem:[%s4977_s14 + $0xc0] sm:$0xff] }
 0x34b   : > { %4358 = vmatprep.subr.bf16.mxu0 %v4357_v32  ;;  %v4411_v4 = vpack.c.bf16 %v2405_v28, %v2397_v55  ;;  %v4383_v49 = vpack.c.bf16 %v2419_v14, %v2411_v43  ;;  %v2452_v32 = vld [vmem:[%s4977_s14 + $0x1c8] sm:$0xff]  ;;  %v4427_v55 = vpack.c.bf16 %v2469_v42, %v2461_v19  ;;  %v2494_v43 = vld [vmem:[%s4977_s14 + $0x318] sm:$0xff]  ;;  %v2491_v14 = vld [vmem:[%s4977_s14 + $0x300] sm:$0xff] }
 0x34c   : > { %v2426_v19 = vld [vmem:[%s4977_s14 + $0xf8] sm:$0xff]  ;;  %v2415_v42 = vld [vmem:[%s4977_s14 + $0xa0] sm:$0xff] }
 0x34d   : > { %4080 = vmatmul.mubr.msk.f32.vlgmr.msra.gmra.mrb[24].mxu1 %vm1766_vm2, %v5572_v62 }
 0x34e   : > { %4360 = vmatpush1.bf16.msra.mxu0 %v4359_v47  ;;  %1997 = vmatprep.mubr.f32.mxu1 %v6206_v20  ;;  %v2422_v47 = vld [vmem:[%s4977_s14 + $0xd8] sm:$0xff] }
 0x34f   : > { %v4413_v36 = vpack.c.bf16 %v2422_v47, %v2414_v29  ;;  %v2499_v47 = vld [vmem:[%s4977_s14 + $0x340] sm:$0xff] }
 0x351   : > { %4082 = vmatmul.mubr.msk.f32.vlgmr.msra.gmra.mrb[32].mxu0 %vm1766_vm2, %v5572_v62  ;;  %4081 = vmatmul.mubr.msk.f32.gmra.mrb[26].mxu1 %vm1766_vm2, %v5586_v37  ;;  %v4830_v62 = vmov 0  }
 0x352   : > { %2074 = vmatprep.mubr.f32.mxu0 %v6206_v20  ;;  %2155 = vmatprep.mubr.f32.mxu1 %v6206_v20 }
 0x353   : > { %4596 = vset.pattern.permute.xlu0 %v4830_v62  ;;  %4597 = vset.pattern.permute.xlu1 %v4830_v62  ;;  %v2429_v62 = vld [vmem:[%s4977_s14 + $0x110] sm:$0xff] }
 0x354   : > { %2085 = vperm.xlu0 %4596, %v2082_v57   ;;  %v2437_v57 = vld [vmem:[%s4977_s14 + $0x150] sm:$0xff] }
 0x355   : > { %4083 = vmatmul.mubr.msk.f32.gmra.mrb[34].mxu0 %vm1766_vm2, %v5586_v37 }
 0x356   : > { %2226 = vmatprep.mubr.f32.mxu0 %v6206_v20 }
 0x3fc   : > { %v1839_v59 = vpop.f32.mrb[24].mxu0 }
 0x3fd   : > { %v1841_v6 = vpop.f32.mrb[25].mxu0 }
 0x400   : > { %v1845_v25 = vpop.f32.mrb[26].mxu0 }
 0x401   : > { %v4363_v56 = vpack.c.bf16 %v1845_v25, %v1839_v59  ;;  %v1847_v41 = vpop.f32.mrb[27].mxu0  ;;  %v4415_v59 = vpack.c.bf16 %v2421_v60, %v2413_v46  ;;  %v4417_v25 = vpack.c.bf16 %v2438_v58, %v2430_v12  ;;  %v4403_v46 = vpack.c.bf16 %v2499_v47, %v2491_v14  ;;  %v2493_v60 = vld [vmem:[%s4977_s14 + $0x310] sm:$0xff]  ;;  %v2510_v58 = vld [vmem:[%s4977_s14 + $0x398] sm:$0xff]  ;;  %v2456_v14 = vld [vmem:[%s4977_s14 + $0x1e8] sm:$0xff] }
 0x402   : > { %v4361_v45 = vpack.c.bf16 %v1847_v41, %v1841_v6  ;;  %v4387_v6 = vpack.c.bf16 %v2435_v15, %v2427_v31  ;;  %v2446_v41 = vld [vmem:[%s4977_s14 + $0x198] sm:$0xff]  ;;  %v4433_v31 = vpack.c.bf16 %v2502_v63, %v2494_v43  ;;  %v2448_v43 = vld [vmem:[%s4977_s14 + $0x1a8] sm:$0xff] }
 0x404   : > { %v1916_v34 = vpop.f32.mrb[28].mxu0  ;;  %4362 = vmatprep.subr.bf16.mxu1 %v4361_v45  ;;  %v2443_v45 = vld [vmem:[%s4977_s14 + $0x180] sm:$0xff] }
 0x405   : > { %v1918_v8 = vpop.f32.mrb[29].mxu0  ;;  %4364 = vmatpush1.bf16.msra.mxu1 %v4363_v56  ;;  %v4389_v56 = vpack.c.bf16 %v2452_v32, %v2444_v2  ;;  %v2507_v2 = vld [vmem:[%s4977_s14 + $0x380] sm:$0xff] }
 0x406   : > { %v2515_v32 = vld [vmem:[%s4977_s14 + $0x3c0] sm:$0xff] }
 0x408   : > { %v1922_v23 = vpop.f32.mrb[30].mxu0  ;;  %4084 = vmatmul.mubr.msk.f32.vlgmr.msra.gmra.mrb[28].mxu1 %vm584_vm0, %v5640_v61 }
 0x409   : > { %v4367_v35 = vpack.c.bf16 %v1922_v23, %v1916_v34  ;;  %v1924_v39 = vpop.f32.mrb[31].mxu0  ;;  %2297 = vmatprep.mubr.f32.mxu1 %v6206_v20  ;;  %v2451_v34 = vld [vmem:[%s4977_s14 + $0x1c0] sm:$0xff]  ;;  %v2468_v23 = vld [vmem:[%s4977_s14 + $0x248] sm:$0xff] }
 0x40a   : > { %v4365_v3 = vpack.c.bf16 %v1924_v39, %v1918_v8  ;;  %v2454_v8 = vld [vmem:[%s4977_s14 + $0x1d8] sm:$0xff]  ;;  %v4391_v39 = vpack.c.bf16 %v2451_v34, %v2443_v45 }
 0x40c   : > { %4366 = vmatprep.subr.bf16.mxu0 %v4365_v3  ;;  %v2445_v3 = vld [vmem:[%s4977_s14 + $0x190] sm:$0xff] }
 0x40d   : > { %4368 = vmatpush1.bf16.msra.mxu0 %v4367_v35  ;;  %v4419_v35 = vpack.c.bf16 %v2437_v57, %v2429_v62  ;;  %v2408_v62 = vld [vmem:[%s4977_s14 + $0x68] sm:$0xff] }
 0x410   : > { %4085 = vmatmul.mubr.msk.f32.vlgmr.msra.gmra.mrb[36].mxu0 %vm584_vm0, %v5640_v61 }
 0x411   : > { %2368 = vmatprep.mubr.f32.mxu0 %v6206_v20 }
 0x420   : > { %v1993_v37 = vpop.f32.mrb[24].mxu1 }
 0x421   : > { %v1995_v21 = vpop.f32.mrb[25].mxu1 }
 0x424   : > { %v2070_v5 = vpop.f32.mrb[32].mxu0  ;;  %v1999_v9 = vpop.f32.mrb[26].mxu1 }
 0x425   : > { %v2072_v51 = vpop.f32.mrb[33].mxu0  ;;  %v4371_v40 = vpack.c.bf16 %v1999_v9, %v1993_v37  ;;  %v2001_v10 = vpop.f32.mrb[27].mxu1  ;;  %v2453_v37 = vld [vmem:[%s4977_s14 + $0x1d0] sm:$0xff]  ;;  %v2467_v9 = vld [vmem:[%s4977_s14 + $0x240] sm:$0xff] }
 0x426   : > { %v4369_v30 = vpack.c.bf16 %v2001_v10, %v1995_v21  ;;  %v4421_v21 = vpack.c.bf16 %v2454_v8, %v2446_v41  ;;  %v2484_v10 = vld [vmem:[%s4977_s14 + $0x2c8] sm:$0xff]  ;;  %v4759_v41 = vld [vmem:[%s5146_s30] ss:$0 sm:$0xff]  ;;  %v2517_v8 = vld [vmem:[%s4977_s14 + $0x3d0] sm:$0xff]  ;;  %s5832_s30 = scalar_lea.vmem %s6189_s11, %s4989_s13 }
 0x428   : > { %v2076_v18 = vpop.f32.mrb[34].mxu0  ;;  %4370 = vmatprep.subr.bf16.mxu1 %v4369_v30  ;;  %v4423_v30 = vpack.c.bf16 %v2453_v37, %v2445_v3  ;;  %v2416_v3 = vld [vmem:[%s4977_s14 + $0xa8] sm:$0xff] }
 0x429   : > { %v4375_v38 = vpack.c.bf16 %v2076_v18, %v2070_v5  ;;  %v2078_v1 = vpop.f32.mrb[35].mxu0  ;;  %4372 = vmatpush1.bf16.msra.mxu1 %v4371_v40  ;;  %v2459_v5 = vld [vmem:[%s4977_s14 + $0x200] sm:$0xff]  ;;  %v2476_v40 = vld [vmem:[%s4977_s14 + $0x288] sm:$0xff] }
 0x42a   : > { %v4373_v11 = vpack.c.bf16 %v2078_v1, %v2072_v51  ;;  %4378 = vmatprep.subr.bf16.mxu1 %v4377_v13  ;;  %v2470_v51 = vld [vmem:[%s4977_s14 + $0x258] sm:$0xff]  ;;  %v4395_v13 = vpack.c.bf16 %v2467_v9, %v2459_v5  ;;  %v4397_v27 = vpack.c.bf16 %v2484_v10, %v2476_v40  ;;  %v2483_v18 = vld [vmem:[%s4977_s14 + $0x2c0] sm:$0xff]  ;;  %v2492_v1 = vld [vmem:[%s4977_s14 + $0x308] sm:$0xff] }
 0x42b   : > { %v4425_v44 = vpack.c.bf16 %v2470_v51, %v2462_v48  ;;  %v4399_v28 = vpack.c.bf16 %v2483_v18, %v2475_v50  ;;  %v2424_v37 = vld [vmem:[%s4977_s14 + $0xe8] sm:$0xff]  ;;  %v2401_v40 = vld [vmem:[%s4977_s14 + $0x30] sm:$0xff] }
 0x42c   : > { %4374 = vmatprep.subr.bf16.mxu0 %v4373_v11  ;;  %4086 = vmatmul.mubr.msk.f32.vlgmr.msra.gmra.mrb[30].mxu1 %vm584_vm0, %v5640_v61  ;;  %v2477_v11 = vld [vmem:[%s4977_s14 + $0x290] sm:$0xff] }
 0x42d   : > { %4376 = vmatpush1.bf16.msra.mxu0 %v4375_v38  ;;  %4380 = vmatpush1.bf16.msra.mxu1 %v4379_v0  ;;  %v2486_v38 = vld [vmem:[%s4977_s14 + $0x2d8] sm:$0xff]  ;;  %v2500_v0 = vld [vmem:[%s4977_s14 + $0x348] sm:$0xff]  ;;  %v2409_v10 = vld [vmem:[%s4977_s14 + $0x70] sm:$0xff] }
 0x42e   : > { %4410 = vmatprep.subr.bf16.mxu0 %v4409_v24  ;;  %4382 = vmatprep.subr.bf16.mxu1 %v4381_v52  ;;  %v2485_v24 = vld [vmem:[%s4977_s14 + $0x2d0] sm:$0xff]  ;;  %v4429_v52 = vpack.c.bf16 %v2486_v38, %v2478_v22  ;;  %v4401_v29 = vpack.c.bf16 %v2500_v0, %v2492_v1  ;;  %v2440_v22 = vld [vmem:[%s4977_s14 + $0x168] sm:$0xff]  ;;  %v4475_v50 = vpack.c.bf16 %v2409_v10, %v2401_v40 }
 0x42f   : > { %2629 = vmatprep.mubr.f32.mxu1 %v6206_v20  ;;  %v2504_v40 = vld [vmem:[%s4977_s14 + $0x368] sm:$0xff] }
 0x430   : > { %4087 = vmatmul.mubr.msk.f32.vlgmr.msra.gmra.mrb[38].mxu0 %vm584_vm0, %v5640_v61  ;;  %v2460_v61 = vld [vmem:[%s4977_s14 + $0x208] sm:$0xff] }
 0x431   : > { %4412 = vmatpush1.bf16.msra.mxu0 %v4411_v4  ;;  %4384 = vmatpush1.bf16.msra.mxu1 %v4383_v49  ;;  %v4393_v33 = vpack.c.bf16 %v2468_v23, %v2460_v61  ;;  %v2516_v4 = vld [vmem:[%s4977_s14 + $0x3c8] sm:$0xff]  ;;  %v4431_v49 = vpack.c.bf16 %v2485_v24, %v2477_v11  ;;  %v2399_v23 = vld [vmem:[%s4977_s14 + $0x20] sm:$0xff]  ;;  %v2434_v11 = vld [vmem:[%s4977_s14 + $0x138] sm:$0xff] }
 0x432   : > { %4414 = vmatprep.subr.bf16.mxu0 %v4413_v36  ;;  %4386 = vmatprep.subr.bf16.mxu1 %v4385_v54  ;;  %v2501_v36 = vld [vmem:[%s4977_s14 + $0x350] sm:$0xff]  ;;  %v4758_v54 = vld [vmem:[%s5140_s26] ss:$0 sm:$0xff]  ;;  %v4405_v15 = vpack.c.bf16 %v2516_v4, %v2508_v26  ;;  %v2442_v24 = vld [vmem:[%s4977_s14 + $0x178] sm:$0xff] }
 0x433   : > { %2718 = vmatprep.mubr.f32.mxu0 %v6206_v20  ;;  %v901_v12 = vmul.f32 %v4758_v54, %v5252_v7  ;;  %v902_v57 = vmul.f32 %v4758_v54, %v5250_v53  ;;  %v4435_v7 = vpack.c.bf16 %v2501_v36, %v2493_v60  ;;  %v2402_v53 = vld [vmem:[%s4977_s14 + $0x38] sm:$0xff]  ;;  %v903_v9 = vmul.f32 %v4758_v54, %v5256_v17  ;;  %v2441_v60 = vld [vmem:[%s4977_s14 + $0x170] sm:$0xff] }
 0x434   : > { %v904_v17 = vmul.f32 %v4758_v54, %v5254_v16  ;;  %v4481_v4 = vpack.c.bf16 %v2442_v24, %v2434_v11  ;;  %v2450_v36 = vld [vmem:[%s4977_s14 + $0x1b8] sm:$0xff]  ;;  %v4453_v54 = vpack.c.bf16 %v2456_v14, %v2448_v43  ;;  %v2497_v11 = vld [vmem:[%s4977_s14 + $0x330] sm:$0xff]  ;;  %v2511_v43 = vld [vmem:[%s4977_s14 + $0x3a0] sm:$0xff] }
 0x435   : > { %4416 = vmatpush1.bf16.msra.mxu0 %v4415_v59  ;;  %4388 = vmatpush1.bf16.msra.mxu1 %v4387_v6  ;;  %v2518_v59 = vld [vmem:[%s4977_s14 + $0x3d8] sm:$0xff]  ;;  %v2400_v6 = vld [vmem:[%s4977_s14 + $0x28] sm:$0xff]  ;;  %v916_v45 = vadd.f32 %v4759_v41, %v901_v12  ;;  %v917_v48 = vadd.f32 %v4759_v41, %v902_v57  ;;  %v918_v38 = vadd.f32 %v4759_v41, %v903_v9  ;;  %v2449_v57 = vld [vmem:[%s4977_s14 + $0x1b0] sm:$0xff] }
 0x436   : > { %4418 = vmatprep.subr.bf16.mxu0 %v4417_v25  ;;  %4390 = vmatprep.subr.bf16.mxu1 %v4389_v56  ;;  %v4407_v25 = vpack.c.bf16 %v2515_v32, %v2507_v2  ;;  %v2509_v56 = vld [vmem:[%s4977_s14 + $0x390] sm:$0xff]  ;;  %v4437_v34 = vpack.c.bf16 %v2518_v59, %v2510_v58  ;;  %v4441_v61 = vpack.c.bf16 %v2408_v62, %v2400_v6  ;;  %v2458_v12 = vld [vmem:[%s4977_s14 + $0x1f8] sm:$0xff]  ;;  %v2464_v58 = vld [vmem:[%s4977_s14 + $0x228] sm:$0xff] }
 0x437   : > { %v5730_v5 = vmax.f32 %v916_v45, 0.0  ;;  %v5743_v18 = vmax.f32 %v917_v48, 0.0  ;;  %v919_v63 = vadd.f32 %v4759_v41, %v904_v17  ;;  %v5757_v26 = vmax.f32 %v918_v38, 0.0  ;;  %v2472_v2 = vld [vmem:[%s4977_s14 + $0x268] sm:$0xff]  ;;  %v2474_v41 = vld [vmem:[%s4977_s14 + $0x278] sm:$0xff]  ;;  %v2463_v45 = vld [vmem:[%s4977_s14 + $0x220] sm:$0xff] }
 0x438   : > { %v4485_v6 = vpack.c.bf16 %v2458_v12, %v2450_v36  ;;  %v2479_v48 = vld [vmem:[%s4977_s14 + $0x2a0] sm:$0xff]  ;;  %v2512_v38 = vld [vmem:[%s4977_s14 + $0x3a8] sm:$0xff]  ;;  %v2514_v24 = vld [vmem:[%s4977_s14 + $0x3b8] sm:$0xff] }
 0x439   : > { %4420 = vmatpush1.bf16.msra.mxu0 %v4419_v35  ;;  %4392 = vmatpush1.bf16.msra.mxu1 %v4391_v39  ;;  %v2407_v35 = vld [vmem:[%s4977_s14 + $0x60] sm:$0xff]  ;;  %v2410_v39 = vld [vmem:[%s4977_s14 + $0x78] sm:$0xff]  ;;  %v5771_v59 = vmax.f32 %v919_v63, 0.0 }
 0x43a   : > { %4422 = vmatprep.subr.bf16.mxu0 %v4421_v21  ;;  %4394 = vmatprep.subr.bf16.mxu1 %v4393_v33  ;;  %v4439_v21 = vpack.c.bf16 %v2517_v8, %v2509_v56  ;;  %v4443_v33 = vpack.c.bf16 %v2407_v35, %v2399_v23  ;;  %v4473_v51 = vpack.c.bf16 %v2410_v39, %v2402_v53  ;;  %v2480_v8 = vld [vmem:[%s4977_s14 + $0x2a8] sm:$0xff]  ;;  %v2465_v39 = vld [vmem:[%s4977_s14 + $0x230] sm:$0xff]  ;;  %v2487_v9 = vld [vmem:[%s4977_s14 + $0x2e0] sm:$0xff] }
 0x43b   : > { %v4457_v56 = vpack.c.bf16 %v2472_v2, %v2464_v58  ;;  %v2495_v17 = vld [vmem:[%s4977_s14 + $0x320] sm:$0xff] }
 0x43c   : > { %v2519_v14 = vld [vmem:[%s4977_s14 + $0x3e0] sm:$0xff] }
 0x43d   : > { %4424 = vmatpush1.bf16.msra.mxu0 %v4423_v30  ;;  %4396 = vmatpush1.bf16.msra.mxu1 %v4395_v13  ;;  %v2418_v30 = vld [vmem:[%s4977_s14 + $0xb8] sm:$0xff]  ;;  %v4445_v13 = vpack.c.bf16 %v2424_v37, %v2416_v3  ;;  %v2473_v3 = vld [vmem:[%s4977_s14 + $0x270] sm:$0xff] }
 0x43e   : > { %4426 = vmatprep.subr.bf16.mxu0 %v4425_v44  ;;  %4398 = vmatprep.subr.bf16.mxu1 %v4397_v27  ;;  %v2423_v44 = vld [vmem:[%s4977_s14 + $0xe0] sm:$0xff]  ;;  %v2432_v27 = vld [vmem:[%s4977_s14 + $0x128] sm:$0xff]  ;;  %v4477_v1 = vpack.c.bf16 %v2426_v19, %v2418_v30  ;;  %v2482_v37 = vld [vmem:[%s4977_s14 + $0x2b8] sm:$0xff]  ;;  %v4491_v10 = vpack.c.bf16 %v2473_v3, %v2465_v39 }
 0x43f   : > { %v4447_v0 = vpack.c.bf16 %v2423_v44, %v2415_v42  ;;  %v4449_v16 = vpack.c.bf16 %v2440_v22, %v2432_v27  ;;  %v2481_v19 = vld [vmem:[%s4977_s14 + $0x2b0] sm:$0xff]  ;;  %v2498_v44 = vld [vmem:[%s4977_s14 + $0x338] sm:$0xff] }
 0x440   : > { %v2489_v42 = vld [vmem:[%s4977_s14 + $0x2f0] sm:$0xff]  ;;  %v2506_v22 = vld [vmem:[%s4977_s14 + $0x378] sm:$0xff] }
 0x441   : > { %4428 = vmatpush1.bf16.msra.mxu0 %v4427_v55  ;;  %4400 = vmatpush1.bf16.msra.mxu1 %v4399_v28  ;;  %v2417_v55 = vld [vmem:[%s4977_s14 + $0xb0] sm:$0xff] }
 0x442   : > { %4430 = vmatprep.subr.bf16.mxu0 %v4429_v52  ;;  %4402 = vmatprep.subr.bf16.mxu1 %v4401_v29  ;;  %v2425_v28 = vld [vmem:[%s4977_s14 + $0xf0] sm:$0xff]  ;;  %v2431_v52 = vld [vmem:[%s4977_s14 + $0x120] sm:$0xff] }
 0x443   : > { %v2439_v29 = vld [vmem:[%s4977_s14 + $0x160] sm:$0xff]  ;;  %v4479_v47 = vpack.c.bf16 %v2425_v28, %v2417_v55  ;;  %v4497_v55 = vpack.c.bf16 %v2506_v22, %v2498_v44 }
 0x445   : > { %4432 = vmatpush1.bf16.msra.mxu0 %v4431_v49  ;;  %4404 = vmatpush1.bf16.msra.mxu1 %v4403_v46  ;;  %v4451_v49 = vpack.c.bf16 %v2439_v29, %v2431_v52  ;;  %v2433_v46 = vld [vmem:[%s4977_s14 + $0x130] sm:$0xff]  ;;  %v2522_v29 = vld [vmem:[%s4977_s14 + $0x3f8] sm:$0xff] }
 0x446   : > { %4434 = vmatprep.subr.bf16.mxu0 %v4433_v31  ;;  %4406 = vmatprep.subr.bf16.mxu1 %v4405_v15  ;;  %v2447_v31 = vld [vmem:[%s4977_s14 + $0x1a0] sm:$0xff]  ;;  %v4483_v32 = vpack.c.bf16 %v2441_v60, %v2433_v46  ;;  %v4501_v63 = vpack.c.bf16 %v2522_v29, %v2514_v24  ;;  %v2521_v46 = vld [vmem:[%s4977_s14 + $0x3f0] sm:$0xff] }
 0x447   : > { %v2455_v15 = vld [vmem:[%s4977_s14 + $0x1e0] sm:$0xff] }
 0x448   : > { %v4455_v62 = vpack.c.bf16 %v2455_v15, %v2447_v31 }
 0x449   : > { %4436 = vmatpush1.bf16.msra.mxu0 %v4435_v7  ;;  %4408 = vmatpush1.bf16.msra.mxu1 %v4407_v25  ;;  %v2457_v7 = vld [vmem:[%s4977_s14 + $0x1f0] sm:$0xff]  ;;  %v2466_v25 = vld [vmem:[%s4977_s14 + $0x238] sm:$0xff] }
 0x44a   : > { %4438 = vmatprep.subr.bf16.mxu0 %v4437_v34  ;;  %4442 = vmatprep.subr.bf16.mxu1 %v4441_v61  ;;  %v2471_v34 = vld [vmem:[%s4977_s14 + $0x260] sm:$0xff]  ;;  %v2488_v61 = vld [vmem:[%s4977_s14 + $0x2e8] sm:$0xff]  ;;  %v4487_v23 = vpack.c.bf16 %v2457_v7, %v2449_v57  ;;  %v4489_v35 = vpack.c.bf16 %v2474_v41, %v2466_v25 }
 0x44b   : > { %v4459_v53 = vpack.c.bf16 %v2471_v34, %v2463_v45 }
 0x44c   : > { %2630 = vmatmul.mubr.f32.vlgmr.msra.gmra.mrb[32].mxu1 %v5730_v5 }
 0x44d   : > { %4440 = vmatpush1.bf16.msra.mxu0 %v4439_v21  ;;  %4444 = vmatpush1.bf16.msra.mxu1 %v4443_v33  ;;  %v4461_v21 = vpack.c.bf16 %v2488_v61, %v2480_v8  ;;  %v2490_v33 = vld [vmem:[%s4977_s14 + $0x2f8] sm:$0xff]  ;;  %v5839_v8 = vld [vmem:[%s5264_s15] sm:$0xff] }
 0x44e   : > { %4474 = vmatprep.subr.bf16.mxu0 %v4473_v51  ;;  %2635 = vmatprep.mubr.f32.mxu1 %v6206_v20  ;;  %v2496_v51 = vld [vmem:[%s4977_s14 + $0x328] sm:$0xff]  ;;  %v4493_v30 = vpack.c.bf16 %v2490_v33, %v2482_v37 }
 0x44f   : > { %4446 = vmatprep.subr.bf16.mxu1 %v4445_v13  ;;  %v4463_v13 = vpack.c.bf16 %v2487_v9, %v2479_v48  ;;  %v4465_v27 = vpack.c.bf16 %v2504_v40, %v2496_v51 }
 0x450   : > { %2719 = vmatmul.mubr.f32.vlgmr.msra.gmra.mrb[40].mxu0 %v5730_v5  ;;  %2636 = vmatmul.mubr.f32.gmra.mrb[34].mxu1 %v5743_v18 }
 0x451   : > { %4476 = vmatpush1.bf16.msra.mxu0 %v4475_v50  ;;  %2724 = vmatprep.mubr.f32.mxu0 %v6206_v20  ;;  %v2503_v50 = vld [vmem:[%s4977_s14 + $0x360] sm:$0xff] }
 0x452   : > { %4478 = vmatprep.subr.bf16.mxu0 %v4477_v1  ;;  %4448 = vmatpush1.bf16.msra.mxu1 %v4447_v0  ;;  %v2520_v1 = vld [vmem:[%s4977_s14 + $0x3e8] sm:$0xff]  ;;  %v4495_v0 = vpack.c.bf16 %v2489_v42, %v2481_v19  ;;  %v4467_v28 = vpack.c.bf16 %v2503_v50, %v2495_v17 }
 0x453   : > { %2641 = vmatprep.mubr.f32.mxu1 %v6206_v20  ;;  %4450 = vmatprep.subr.bf16.mxu1 %v4449_v16  ;;  %v2505_v16 = vld [vmem:[%s4977_s14 + $0x370] sm:$0xff]  ;;  %v4469_v52 = vpack.c.bf16 %v2520_v1, %v2512_v38 }
 0x454   : > { %2725 = vmatmul.mubr.f32.gmra.mrb[42].mxu0 %v5743_v18  ;;  %2642 = vmatmul.mubr.f32.gmra.mrb[36].mxu1 %v5757_v26 }
 0x455   : > { %4480 = vmatpush1.bf16.msra.mxu0 %v4479_v47  ;;  %2730 = vmatprep.mubr.f32.mxu0 %v6206_v20  ;;  %v4499_v47 = vpack.c.bf16 %v2505_v16, %v2497_v11 }
 0x456   : > { %4482 = vmatprep.subr.bf16.mxu0 %v4481_v4  ;;  %4452 = vmatpush1.bf16.msra.mxu1 %v4451_v49  ;;  %v4471_v4 = vpack.c.bf16 %v2519_v14, %v2511_v43  ;;  %v2513_v49 = vld [vmem:[%s4977_s14 + $0x3b0] sm:$0xff] }
 0x457   : > { %2647 = vmatprep.mubr.f32.mxu1 %v6206_v20  ;;  %4454 = vmatprep.subr.bf16.mxu1 %v4453_v54  ;;  %v4503_v60 = vpack.c.bf16 %v2521_v46, %v2513_v49 }
 0x458   : > { %2731 = vmatmul.mubr.f32.gmra.mrb[44].mxu0 %v5757_v26  ;;  %2648 = vmatmul.mubr.f32.gmra.mrb[38].mxu1 %v5771_v59 }
 0x459   : > { %4484 = vmatpush1.bf16.msra.mxu0 %v4483_v32  ;;  %2736 = vmatprep.mubr.f32.mxu0 %v6206_v20 }
 0x45a   : > { %4486 = vmatprep.subr.bf16.mxu0 %v4485_v6  ;;  %4456 = vmatpush1.bf16.msra.mxu1 %v4455_v62 }
 0x45b   : > { %4458 = vmatprep.subr.bf16.mxu1 %v4457_v56  ;;  %2807 = vmatprep.mubr.f32.mxu1 %v6206_v20 }
 0x45c   : > { %2737 = vmatmul.mubr.f32.gmra.mrb[46].mxu0 %v5771_v59 }
 0x45d   : > { %4488 = vmatpush1.bf16.msra.mxu0 %v4487_v23  ;;  %2896 = vmatprep.mubr.f32.mxu0 %v6206_v20  ;;  %v6207_v23 = vld [vmem:[#allocation5_spill] sm:$0xff] }
 0x45e   : > { %4490 = vmatprep.subr.bf16.mxu0 %v4489_v35  ;;  %4460 = vmatpush1.bf16.msra.mxu1 %v4459_v53  ;;  %v6208_v35 = vsub.s32 0, %v6207_v23  ;;  %v6209_v3 = vsub.s32 1, %v6207_v23  ;;  %v6210_v9 = vsub.s32 2, %v6207_v23  ;;  %v6211_v19 = vsub.s32 3, %v6207_v23 }
 0x45f   : > { %4462 = vmatprep.subr.bf16.mxu1 %v4461_v21 }
 0x460   : > { %v2528_v53 = vrot.slane %v5839_v8, %v6208_v35  ;;  %v2532_v37 = vrot.slane %v5839_v8, %v6209_v3  ;;  %v2536_v51 = vrot.slane %v5839_v8, %v6210_v9  ;;  %v2540_v42 = vrot.slane %v5839_v8, %v6211_v19 }
 0x461   : > { %4492 = vmatpush1.bf16.msra.mxu0 %v4491_v10 }
 0x462   : > { %4494 = vmatprep.subr.bf16.mxu0 %v4493_v30  ;;  %4464 = vmatpush1.bf16.msra.mxu1 %v4463_v13 }
 0x463   : > { %4466 = vmatprep.subr.bf16.mxu1 %v4465_v27 }
 0x465   : > { %4496 = vmatpush1.bf16.msra.mxu0 %v4495_v0 }
 0x466   : > { %4498 = vmatprep.subr.bf16.mxu0 %v4497_v55  ;;  %4468 = vmatpush1.bf16.msra.mxu1 %v4467_v28 }
 0x467   : > { %4470 = vmatprep.subr.bf16.mxu1 %v4469_v52 }
 0x469   : > { %4500 = vmatpush1.bf16.msra.mxu0 %v4499_v47 }
 0x46a   : > { %4502 = vmatprep.subr.bf16.mxu0 %v4501_v63  ;;  %4472 = vmatpush1.bf16.msra.mxu1 %v4471_v4 }
 0x46d   : > { %4504 = vmatpush1.bf16.msra.mxu0 %v4503_v60  ;;  %2808 = vmatmul.mubr.f32.vlgmr.msra.gmra.mrb[40].mxu1 %v5730_v5 }
 0x46e   : > { %2813 = vmatprep.mubr.f32.mxu1 %v6206_v20 }
 0x470   : > { %2897 = vmatmul.mubr.f32.vlgmr.msra.gmra.mrb[48].mxu0 %v5730_v5  ;;  %v2086_v5 = vpop.permute.xlu0 %2085 }
 0x471   : > { %2902 = vmatprep.mubr.f32.mxu0 %v6206_v20  ;;  %2814 = vmatmul.mubr.f32.gmra.mrb[42].mxu1 %v5743_v18 }
 0x472   : > { %2819 = vmatprep.mubr.f32.mxu1 %v6206_v20 }
 0x474   : > { %2903 = vmatmul.mubr.f32.gmra.mrb[50].mxu0 %v5743_v18 }
 0x475   : > { %2908 = vmatprep.mubr.f32.mxu0 %v6206_v20  ;;  %2820 = vmatmul.mubr.f32.gmra.mrb[44].mxu1 %v5757_v26 }
 0x476   : > { %2825 = vmatprep.mubr.f32.mxu1 %v6206_v20 }
 0x478   : > { %2909 = vmatmul.mubr.f32.gmra.mrb[52].mxu0 %v5757_v26 }
 0x479   : > { %2914 = vmatprep.mubr.f32.mxu0 %v6206_v20  ;;  %2826 = vmatmul.mubr.f32.gmra.mrb[46].mxu1 %v5771_v59 }
 0x47a   : > { %3303 = vmatprep.mubr.f32.mxu1 %v6206_v20 }
 0x47c   : > { %2915 = vmatmul.mubr.f32.gmra.mrb[54].mxu0 %v5771_v59 }
 0x47d   : > { %3380 = vmatprep.mubr.f32.mxu0 %v6206_v20 }
 0x4db   : > { %v2157_v18 = vpop.f32.mrb[28].mxu1 }
 0x4dc   : > { %v2158_v36 = vadd.f32 %v2157_v18, %v2086_v5  ;;  %v2159_v54 = vpop.f32.mrb[29].mxu1 }
 0x4dd   : > { %v2160_v12 = vadd.f32 %v2159_v54, %v2086_v5 }
 0x4df   : > { %v2383_v26 = vcombine.low %v2158_v36, %v2160_v12 }
 0x4e1   : > { %2391 = vst [vmem:[%s5832_s30] sm:$0x77] %v2383_v26 }
 0x4e3   : > { %v2228_v31 = vpop.f32.mrb[36].mxu0 }
 0x4e4   : > { %v2229_v15 = vadd.f32 %v2228_v31, %v2086_v5  ;;  %v2230_v58 = vpop.f32.mrb[37].mxu0 }
 0x4e5   : > { %v2231_v2 = vadd.f32 %v2230_v58, %v2086_v5 }
 0x4e7   : > { %v2384_v32 = vcombine.low %v2229_v15, %v2231_v2 }
 0x4e9   : > { %2392 = vst [vmem:[%s5832_s30 + $0x8] sm:$0x77] %v2384_v32 }
 0x4ff   : > { %v2299_v59 = vpop.f32.mrb[30].mxu1 }
 0x500   : > { %v2300_v6 = vadd.f32 %v2299_v59, %v2086_v5  ;;  %v2301_v62 = vpop.f32.mrb[31].mxu1 }
 0x501   : > { %v2302_v57 = vadd.f32 %v2301_v62, %v2086_v5 }
 0x503   : > { %v2370_v7 = vpop.f32.mrb[38].mxu0  ;;  %v2385_v25 = vcombine.low %v2300_v6, %v2302_v57 }
 0x504   : > { %v2371_v56 = vadd.f32 %v2370_v7, %v2086_v5  ;;  %v2372_v41 = vpop.f32.mrb[39].mxu0 }
 0x505   : > { %2393 = vst [vmem:[%s5832_s30 + $0x10] sm:$0x77] %v2385_v25  ;;  %v2373_v45 = vadd.f32 %v2372_v41, %v2086_v5 }
 0x507   : > { %v2386_v34 = vcombine.low %v2371_v56, %v2373_v45 }
 0x509   : > { %2394 = vst [vmem:[%s5832_s30 + $0x18] sm:$0x77] %v2386_v34 }
 0x51f   : > { %v2631_v61 = vpop.f32.mrb[32].mxu1 }
 0x520   : > { %v2633_v39 = vpop.f32.mrb[33].mxu1  ;;  %v5847_v48 = vadd.f32 %v2631_v61, %v2528_v53 }
 0x521   : > { %v5854_v13 = vadd.f32 %v2633_v39, %v2532_v37 }
 0x523   : > { %v2720_v21 = vpop.f32.mrb[40].mxu0  ;;  %v2637_v33 = vpop.f32.mrb[34].mxu1 }
 0x524   : > { %v2722_v40 = vpop.f32.mrb[41].mxu0  ;;  %v5852_v10 = vadd.f32 %v2637_v33, %v2528_v53  ;;  %v2639_v30 = vpop.f32.mrb[35].mxu1  ;;  %v5865_v38 = vadd.f32 %v2720_v21, %v2536_v51 }
 0x525   : > { %v5859_v44 = vadd.f32 %v2639_v30, %v2532_v37  ;;  %v5869_v11 = vadd.f32 %v2722_v40, %v2540_v42  ;;  %v6212_v30 = vsub.s32 4, %v6207_v23 }
 0x526   : > { %v2921_v27 = vmax.f32 %v5847_v48, %v5852_v10 }
 0x527   : > { %v2726_v22 = vpop.f32.mrb[42].mxu0  ;;  %v2930_v17 = vmax.f32 %v5854_v13, %v5859_v44  ;;  %v2643_v50 = vpop.f32.mrb[36].mxu1  ;;  %v5895_v19 = vrot.slane %v5839_v8, %v6212_v30 }
 0x528   : > { %v5867_v1 = vadd.f32 %v2726_v22, %v2536_v51  ;;  %v2728_v0 = vpop.f32.mrb[43].mxu0  ;;  %v2644_v55 = vadd.f32 %v2643_v50, %v2528_v53  ;;  %v2645_v28 = vpop.f32.mrb[37].mxu1 }
 0x529   : > { %v5871_v16 = vadd.f32 %v2728_v0, %v2540_v42  ;;  %v5873_v24 = vadd.f32 %v2645_v28, %v2532_v37 }
 0x52a   : > { %v2939_v52 = vmax.f32 %v5865_v38, %v5867_v1  ;;  %v2922_v29 = vmax.f32 %v2921_v27, %v2644_v55 }
 0x52b   : > { %v2948_v43 = vmax.f32 %v5869_v11, %v5871_v16  ;;  %v2732_v14 = vpop.f32.mrb[44].mxu0  ;;  %v2931_v47 = vmax.f32 %v2930_v17, %v5873_v24  ;;  %v2649_v63 = vpop.f32.mrb[38].mxu1 }
 0x52c   : > { %v5880_v4 = vadd.f32 %v2732_v14, %v2536_v51  ;;  %v2734_v49 = vpop.f32.mrb[45].mxu0  ;;  %v2650_v46 = vadd.f32 %v2649_v63, %v2528_v53  ;;  %v2651_v60 = vpop.f32.mrb[39].mxu1 }
 0x52d   : > { %v5882_v5 = vadd.f32 %v2734_v49, %v2540_v42  ;;  %v5884_v18 = vadd.f32 %v2651_v60, %v2532_v37 }
 0x52e   : > { %v2940_v36 = vmax.f32 %v2939_v52, %v5880_v4  ;;  %v2923_v54 = vmax.f32 %v2922_v29, %v2650_v46 }
 0x52f   : > { %v2949_v12 = vmax.f32 %v2948_v43, %v5882_v5  ;;  %v2738_v26 = vpop.f32.mrb[46].mxu0  ;;  %v2932_v31 = vmax.f32 %v2931_v47, %v5884_v18 }
 0x530   : > { %v2924_v15 = vrot.slane %v2923_v54, 4  ;;  %v2739_v58 = vadd.f32 %v2738_v26, %v2536_v51  ;;  %v2740_v2 = vpop.f32.mrb[47].mxu0 }
 0x531   : > { %v2933_v32 = vrot.slane %v2932_v31, 4  ;;  %v5889_v59 = vadd.f32 %v2740_v2, %v2540_v42  ;;  %v6213_v42 = vsub.s32 6, %v6207_v23 }
 0x532   : > { %v2925_v6 = vmax.f32 %v2923_v54, %v2924_v15  ;;  %v2941_v62 = vmax.f32 %v2940_v36, %v2739_v58 }
 0x533   : > { %v2934_v57 = vmax.f32 %v2932_v31, %v2933_v32  ;;  %v2950_v7 = vmax.f32 %v2949_v12, %v5889_v59  ;;  %v5900_v27 = vrot.slane %v5839_v8, %v6213_v42 }
 0x534   : > { %v2926_v25 = vrot.slane %v2925_v6, 2  ;;  %v2942_v56 = vrot.slane %v2941_v62, 4 }
 0x535   : > { %v2935_v41 = vrot.slane %v2934_v57, 2  ;;  %v2951_v45 = vrot.slane %v2950_v7, 4 }
 0x536   : > { %v2927_v34 = vmax.f32 %v2925_v6, %v2926_v25  ;;  %v2943_v61 = vmax.f32 %v2941_v62, %v2942_v56 }
 0x537   : > { %v2936_v35 = vmax.f32 %v2934_v57, %v2935_v41  ;;  %v2952_v53 = vmax.f32 %v2950_v7, %v2951_v45 }
 0x538   : > { %v2928_v39 = vrot.slane %v2927_v34, 1  ;;  %v2944_v3 = vrot.slane %v2943_v61, 2 }
 0x539   : > { %v2937_v37 = vrot.slane %v2936_v35, 1  ;;  %v2953_v21 = vrot.slane %v2952_v53, 2 }
 0x53a   : > { %v2929_v33 = vmax.f32 %v2927_v34, %v2928_v39  ;;  %v2945_v9 = vmax.f32 %v2943_v61, %v2944_v3 }
 0x53b   : > { %v2938_v51 = vmax.f32 %v2936_v35, %v2937_v37  ;;  %v2954_v40 = vmax.f32 %v2952_v53, %v2953_v21 }
 0x53c   : > { %v2993_v22 = vsub.f32 %v5847_v48, %v2929_v33  ;;  %v3001_v17 = vsub.f32 %v5852_v10, %v2929_v33  ;;  %v3009_v50 = vsub.f32 %v2644_v55, %v2929_v33  ;;  %v3017_v0 = vsub.f32 %v2650_v46, %v2929_v33 }
 0x53d   : > { %v2946_v28 = vrot.slane %v2945_v9, 1  ;;  %v2994_v52 = vsub.f32 %v5854_v13, %v2938_v51  ;;  %v3002_v29 = vsub.f32 %v5859_v44, %v2938_v51  ;;  %v3010_v43 = vsub.f32 %v5873_v24, %v2938_v51 }
 0x53e   : > { %v3025_v14 = vmul.f32 1.442695, %v2993_v22  ;;  %v3041_v47 = vmul.f32 1.442695, %v3001_v17  ;;  %v3057_v63 = vmul.f32 1.442695, %v3009_v50  ;;  %v3018_v49 = vsub.f32 %v5884_v18, %v2938_v51 }
 0x53f   : > { %v3073_v60 = vmul.f32 1.442695, %v3017_v0  ;;  %v2947_v36 = vmax.f32 %v2945_v9, %v2946_v28  ;;  %v6214_v48 = vsub.s32 5, %v6207_v23  ;;  %v6215_v55 = vsub.s32 7, %v6207_v23 }
 0x540   : > { %4678 = vpow2.f32 %v3025_v14  ;;  %v3027_v44 = vmul.f32 1.442695, %v2994_v52  ;;  %v3043_v24 = vmul.f32 1.442695, %v3002_v29  ;;  %v2955_v46 = vrot.slane %v2954_v40, 1  ;;  %v2809_v54 = vpop.f32.mrb[40].mxu1 }
 0x541   : > { %v5911_v10 = vrot.slane %v5839_v8, %v6214_v48  ;;  %v5916_v13 = vrot.slane %v5839_v8, %v6215_v55  ;;  %4680 = vpow2.f32 %v3041_v47  ;;  %v2995_v18 = vsub.f32 %v5865_v38, %v2947_v36  ;;  %v2811_v31 = vpop.f32.mrb[41].mxu1 }
 0x542   : > { %v3003_v12 = vsub.f32 %v5867_v1, %v2947_v36  ;;  %v3011_v26 = vsub.f32 %v5880_v4, %v2947_v36  ;;  %4682 = vpow2.f32 %v3057_v63  ;;  %v3019_v15 = vsub.f32 %v2739_v58, %v2947_v36 }
 0x543   : > { %v3059_v2 = vmul.f32 1.442695, %v3010_v43  ;;  %v2956_v23 = vmax.f32 %v2954_v40, %v2955_v46  ;;  %4684 = vpow2.f32 %v3073_v60  ;;  %v3029_v8 = vmul.f32 1.442695, %v2995_v18  ;;  %v2898_v38 = vpop.f32.mrb[48].mxu0 }
 0x544   : > { %v3045_v32 = vmul.f32 1.442695, %v3003_v12  ;;  %v3061_v6 = vmul.f32 1.442695, %v3011_v26  ;;  %v3077_v62 = vmul.f32 1.442695, %v3019_v15  ;;  %4686 = vpow2.f32 %v3027_v44 }
 0x545   : > { %v2996_v57 = vsub.f32 %v5869_v11, %v2956_v23  ;;  %v3004_v7 = vsub.f32 %v5871_v16, %v2956_v23  ;;  %v2815_v25 = vpop.f32.mrb[42].mxu1  ;;  %4688 = vpow2.f32 %v3029_v8  ;;  %v3075_v1 = vmul.f32 1.442695, %v3018_v49  ;;  %v2900_v56 = vpop.f32.mrb[49].mxu0 }
 0x546   : > { %v3012_v4 = vsub.f32 %v5882_v5, %v2956_v23  ;;  %v3020_v58 = vsub.f32 %v5889_v59, %v2956_v23  ;;  %v2817_v41 = vpop.f32.mrb[43].mxu1  ;;  %4690 = vpow2.f32 %v3045_v32  ;;  %v5926_v34 = vadd.f32 %v2809_v54, %v5895_v19 }
 0x547   : > { %v3031_v45 = vmul.f32 1.442695, %v2996_v57  ;;  %v5929_v61 = vadd.f32 %v2898_v38, %v5900_v27  ;;  %4692 = vpow2.f32 %v3061_v6  ;;  %v3047_v11 = vmul.f32 1.442695, %v3004_v7  ;;  %v2904_v53 = vpop.f32.mrb[50].mxu0 }
 0x548   : > { %v3063_v16 = vmul.f32 1.442695, %v3012_v4  ;;  %v5932_v35 = vadd.f32 %v2811_v31, %v5911_v10  ;;  %4694 = vpow2.f32 %v3077_v62  ;;  %v5935_v5 = vadd.f32 %v2815_v25, %v5895_v19  ;;  %v2906_v3 = vpop.f32.mrb[51].mxu0  ;;  %v2821_v37 = vpop.f32.mrb[44].mxu1 }
 0x549   : > { %v5938_v59 = vadd.f32 %v2904_v53, %v5900_v27  ;;  %v5941_v39 = vadd.f32 %v2817_v41, %v5911_v10  ;;  %4696 = vpow2.f32 %v3043_v24  ;;  %v5944_v21 = vadd.f32 %v2900_v56, %v5916_v13  ;;  %v2823_v51 = vpop.f32.mrb[45].mxu1 }
 0x54a   : > { %v5947_v33 = vadd.f32 %v2906_v3, %v5916_v13  ;;  %v5950_v9 = vadd.f32 %v2821_v37, %v5895_v19  ;;  %v5952_v40 = vpop.eup %4678  ;;  %4698 = vpow2.f32 %v3059_v2  ;;  %v2957_v30 = vmax.f32 %v5926_v34, %v5935_v5 }
 0x54b   : > { %v2975_v42 = vmax.f32 %v5929_v61, %v5938_v59  ;;  %v2966_v22 = vmax.f32 %v5932_v35, %v5941_v39  ;;  %v5960_v17 = vpop.eup %4680  ;;  %4700 = vpow2.f32 %v3075_v1  ;;  %v3079_v50 = vmul.f32 1.442695, %v3020_v58  ;;  %v2910_v28 = vpop.f32.mrb[52].mxu0 }
 0x54c   : > { %v2984_v0 = vmax.f32 %v5944_v21, %v5947_v33  ;;  %v5965_v52 = vadd.f32 %v2823_v51, %v5911_v10  ;;  %v5967_v29 = vpop.eup %4682  ;;  %v3089_v43 = vadd.f32 %v5960_v17, %v5952_v40  ;;  %4702 = vpow2.f32 %v3031_v45  ;;  %v2912_v63 = vpop.f32.mrb[53].mxu0 }
 0x54d   : > { %v2958_v14 = vmax.f32 %v2957_v30, %v5950_v9  ;;  %v5973_v47 = vadd.f32 %v2910_v28, %v5900_v27  ;;  %v2827_v49 = vpop.f32.mrb[46].mxu1  ;;  %v5975_v60 = vpop.eup %4684  ;;  %4704 = vpow2.f32 %v3047_v11  ;;  %v5979_v48 = vadd.f32 %v2912_v63, %v5916_v13 }
 0x54e   : > { %v2967_v36 = vmax.f32 %v2966_v22, %v5965_v52  ;;  %v5982_v55 = vadd.f32 %v2827_v49, %v5895_v19  ;;  %v2829_v44 = vpop.f32.mrb[47].mxu1  ;;  %v5984_v24 = vpop.eup %4686  ;;  %v3090_v46 = vadd.f32 %v5967_v29, %v3089_v43  ;;  %4706 = vpow2.f32 %v3063_v16 }
 0x54f   : > { %v2976_v54 = vmax.f32 %v2975_v42, %v5973_v47  ;;  %v5989_v18 = vadd.f32 %v2829_v44, %v5911_v10  ;;  %v5991_v12 = vpop.eup %4688  ;;  %v2985_v26 = vmax.f32 %v2984_v0, %v5979_v48  ;;  %v2916_v15 = vpop.f32.mrb[54].mxu0  ;;  %4708 = vpow2.f32 %v3079_v50 }
 0x550   : > { %v2959_v31 = vmax.f32 %v2958_v14, %v5982_v55  ;;  %v5995_v19 = vpop.eup %4690  ;;  %v3091_v2 = vadd.f32 %v5975_v60, %v3090_v46  ;;  %v5999_v23 = vadd.f32 %v2916_v15, %v5900_v27  ;;  %v2918_v32 = vpop.f32.mrb[55].mxu0 }
 0x551   : > { %v2968_v8 = vmax.f32 %v2967_v36, %v5989_v18  ;;  %v6002_v10 = vpop.eup %4692  ;;  %v3107_v6 = vadd.f32 %v5995_v19, %v5991_v12  ;;  %v6007_v57 = vadd.f32 %v2918_v32, %v5916_v13 }
 0x552   : > { %v2960_v62 = vrot.slane %v2959_v31, 4  ;;  %v6009_v7 = vpop.eup %4694  ;;  %v3092_v38 = vrot.slane %v3091_v2, 4  ;;  %v2977_v25 = vmax.f32 %v2976_v54, %v5999_v23 }
 0x553   : > { %v2969_v27 = vrot.slane %v2968_v8, 4  ;;  %v6012_v1 = vpop.eup %4696  ;;  %v3108_v4 = vadd.f32 %v6002_v10, %v3107_v6  ;;  %v2986_v56 = vmax.f32 %v2985_v26, %v6007_v57 }
 0x554   : > { %v2961_v58 = vmax.f32 %v2959_v31, %v2960_v62  ;;  %v6016_v41 = vpop.eup %4698  ;;  %v3093_v45 = vadd.f32 %v3092_v38, %v3091_v2  ;;  %v3098_v13 = vadd.f32 %v6012_v1, %v5984_v24  ;;  %v2978_v11 = vrot.slane %v2977_v25, 4 }
 0x555   : > { %v2970_v16 = vmax.f32 %v2968_v8, %v2969_v27  ;;  %v6020_v53 = vpop.eup %4700  ;;  %v3109_v3 = vadd.f32 %v6009_v7, %v3108_v4  ;;  %v2987_v51 = vrot.slane %v2986_v56, 4 }
 0x556   : > { %v2962_v37 = vrot.slane %v2961_v58, 2  ;;  %v6023_v30 = vpop.eup %4702  ;;  %v3094_v42 = vrot.slane %v3093_v45, 2  ;;  %v3099_v22 = vadd.f32 %v6016_v41, %v3098_v13  ;;  %v2979_v50 = vmax.f32 %v2977_v25, %v2978_v11 }
 0x557   : > { %v2971_v0 = vrot.slane %v2970_v16, 2  ;;  %v6026_v28 = vpop.eup %4704  ;;  %v3110_v43 = vrot.slane %v3109_v3, 4  ;;  %v2988_v63 = vmax.f32 %v2986_v56, %v2987_v51 }
 0x558   : > { %v2963_v14 = vmax.f32 %v2961_v58, %v2962_v37  ;;  %v3095_v49 = vadd.f32 %v3094_v42, %v3093_v45  ;;  %v3100_v36 = vadd.f32 %v6020_v53, %v3099_v22  ;;  %v3116_v44 = vadd.f32 %v6026_v28, %v6023_v30  ;;  %v6031_v54 = vpop.eup %4706 }
 0x559   : > { %v2980_v46 = vrot.slane %v2979_v50, 2  ;;  %v3111_v26 = vadd.f32 %v3110_v43, %v3109_v3  ;;  %v2972_v15 = vmax.f32 %v2970_v16, %v2971_v0  ;;  %v2989_v2 = vrot.slane %v2988_v63, 2  ;;  %v6034_v38 = vpop.eup %4708 }
 0x55a   : > { %v2964_v31 = vrot.slane %v2963_v14, 1  ;;  %v3096_v8 = vrot.slane %v3095_v49, 1  ;;  %v3101_v32 = vrot.slane %v3100_v36, 4  ;;  %v3117_v6 = vadd.f32 %v6031_v54, %v3116_v44 }
 0x55b   : > { %v2981_v62 = vmax.f32 %v2979_v50, %v2980_v46  ;;  %v3112_v25 = vrot.slane %v3111_v26, 2  ;;  %v2973_v4 = vrot.slane %v2972_v15, 1  ;;  %v2990_v58 = vmax.f32 %v2988_v63, %v2989_v2 }
 0x55c   : > { %v2965_v27 = vmax.f32 %v2963_v14, %v2964_v31  ;;  %v3097_v56 = vadd.f32 %v3096_v8, %v3095_v49  ;;  %v3102_v45 = vadd.f32 %v3101_v32, %v3100_v36  ;;  %v3118_v13 = vadd.f32 %v6034_v38, %v3117_v6 }
 0x55d   : > { %v2982_v11 = vrot.slane %v2981_v62, 1  ;;  %v3113_v3 = vadd.f32 %v3112_v25, %v3111_v26 }
 0x55e   : > { %v2997_v16 = vsub.f32 %v5926_v34, %v2965_v27  ;;  %v3005_v37 = vsub.f32 %v5935_v5, %v2965_v27  ;;  %v3013_v51 = vsub.f32 %v5950_v9, %v2965_v27  ;;  %4710 = vrcp.f32 %v3097_v56 }
 0x55f   : > { %v3103_v42 = vrot.slane %v3102_v45, 2  ;;  %v3119_v22 = vrot.slane %v3118_v13, 4  ;;  %v3021_v50 = vsub.f32 %v5982_v55, %v2965_v27  ;;  %v3114_v0 = vrot.slane %v3113_v3, 1 }
 0x560   : > { %v3033_v43 = vmul.f32 1.442695, %v2997_v16  ;;  %v3049_v14 = vmul.f32 1.442695, %v3005_v37  ;;  %v2983_v63 = vmax.f32 %v2981_v62, %v2982_v11  ;;  %v3065_v44 = vmul.f32 1.442695, %v3013_v51 }
 0x561   : > { %v3104_v49 = vadd.f32 %v3103_v42, %v3102_v45  ;;  %v3120_v36 = vadd.f32 %v3119_v22, %v3118_v13  ;;  %v3081_v46 = vmul.f32 1.442695, %v3021_v50  ;;  %v3115_v26 = vadd.f32 %v3114_v0, %v3113_v3 }
 0x562   : > { %4712 = vpow2.f32 %v3033_v43  ;;  %v2999_v34 = vsub.f32 %v5929_v61, %v2983_v63  ;;  %v3007_v5 = vsub.f32 %v5938_v59, %v2983_v63  ;;  %v3015_v2 = vsub.f32 %v5973_v47, %v2983_v63 }
 0x563   : > { %v3105_v9 = vrot.slane %v3104_v49, 1  ;;  %v3121_v31 = vrot.slane %v3120_v36, 2  ;;  %4714 = vpow2.f32 %v3049_v14  ;;  %v3023_v55 = vsub.f32 %v5999_v23, %v2983_v63 }
 0x564   : > { %4716 = vrcp.f32 %v3115_v26  ;;  %v3037_v8 = vmul.f32 1.442695, %v2999_v34  ;;  %v3053_v62 = vmul.f32 1.442695, %v3007_v5  ;;  %v3069_v25 = vmul.f32 1.442695, %v3015_v2 }
 0x565   : > { %v3106_v32 = vadd.f32 %v3105_v9, %v3104_v49  ;;  %v3122_v6 = vadd.f32 %v3121_v31, %v3120_v36  ;;  %4718 = vpow2.f32 %v3065_v44  ;;  %v2974_v27 = vmax.f32 %v2972_v15, %v2973_v4 }
 0x566   : > { %4720 = vpow2.f32 %v3081_v46  ;;  %v2991_v56 = vrot.slane %v2990_v58, 1  ;;  %v3085_v59 = vmul.f32 1.442695, %v3023_v55 }
 0x567   : > { %4722 = vrcp.f32 %v3106_v32  ;;  %v3123_v61 = vrot.slane %v3122_v6, 1  ;;  %v2998_v45 = vsub.f32 %v5932_v35, %v2974_v27  ;;  %v3006_v47 = vsub.f32 %v5941_v39, %v2974_v27 }
 0x568   : > { %4724 = vpow2.f32 %v3037_v8  ;;  %v3014_v13 = vsub.f32 %v5965_v52, %v2974_v27  ;;  %v4711_v23 = vpop.eup %4710  ;;  %v3022_v3 = vsub.f32 %v5989_v18, %v2974_v27  ;;  %v2992_v16 = vmax.f32 %v2990_v58, %v2991_v56 }
 0x569   : > { %v3124_v11 = vadd.f32 %v3123_v61, %v3122_v6  ;;  %4726 = vpow2.f32 %v3053_v62  ;;  %v3035_v37 = vmul.f32 1.442695, %v2998_v45  ;;  %v3051_v15 = vmul.f32 1.442695, %v3006_v47 }
 0x56a   : > { %4728 = vpow2.f32 %v3069_v25  ;;  %v3067_v4 = vmul.f32 1.442695, %v3014_v13  ;;  %v3083_v51 = vmul.f32 1.442695, %v3022_v3  ;;  %v3000_v42 = vsub.f32 %v5944_v21, %v2992_v16 }
 0x56b   : > { %4730 = vrcp.f32 %v3124_v11  ;;  %v3008_v35 = vsub.f32 %v5947_v33, %v2992_v16  ;;  %v3016_v39 = vsub.f32 %v5979_v48, %v2992_v16  ;;  %v3024_v52 = vsub.f32 %v6007_v57, %v2992_v16  ;;  %v6101_v16 = vpop.trf.xlu1 }
 0x56c   : > { %v6051_v22 = vpop.eup %4712  ;;  %4732 = vpow2.f32 %v3085_v59  ;;  %v3169_v18 = vmul.f32 %v4711_v23, %v5952_v40  ;;  %v3039_v50 = vmul.f32 1.442695, %v3000_v42  ;;  %v3177_v43 = vmul.f32 %v4711_v23, %v5960_v17 }
 0x56d   : > { %v6056_v58 = vpop.eup %4714  ;;  %4734 = vpow2.f32 %v3035_v37  ;;  %v3055_v0 = vmul.f32 1.442695, %v3008_v35  ;;  %v3071_v33 = vmul.f32 1.442695, %v3016_v39  ;;  %v3087_v63 = vmul.f32 1.442695, %v3024_v52 }
 0x56e   : > { %v4717_v14 = vpop.eup %4716  ;;  %v3125_v21 = vadd.f32 %v6056_v58, %v6051_v22  ;;  %4736 = vpow2.f32 %v3051_v15  ;;  %v4507_v48 = vpack.c.bf16 %v3177_v43, %v3169_v18  ;;  %v3185_v17 = vmul.f32 %v4711_v23, %v5967_v29 }
 0x56f   : > { %v6061_v49 = vpop.eup %4718  ;;  %4738 = vpow2.f32 %v3067_v4  ;;  %v3171_v40 = vmul.f32 %v4717_v14, %v5991_v12  ;;  %v3179_v57 = vmul.f32 %v4717_v14, %v5995_v19  ;;  %v3193_v46 = vmul.f32 %v4711_v23, %v5975_v60 }
 0x570   : > { %v6065_v36 = vpop.eup %4720  ;;  %v3126_v44 = vadd.f32 %v6061_v49, %v3125_v21  ;;  %4740 = vpow2.f32 %v3083_v51  ;;  %v3187_v5 = vmul.f32 %v4717_v14, %v6002_v10  ;;  %v3195_v9 = vmul.f32 %v4717_v14, %v6009_v7 }
 0x571   : > { %v4723_v26 = vpop.eup %4722  ;;  %4742 = vpow2.f32 %v3039_v50  ;;  %v4515_v34 = vpack.c.bf16 %v3179_v57, %v3171_v40  ;;  %v4511_v8 = vpack.c.bf16 %v3193_v46, %v3185_v17 }
 0x572   : > { %v6072_v31 = vpop.eup %4724  ;;  %v3127_v12 = vadd.f32 %v6065_v36, %v3126_v44  ;;  %4744 = vpow2.f32 %v3055_v0  ;;  %v3170_v19 = vmul.f32 %v4723_v26, %v5984_v24  ;;  %v3178_v2 = vmul.f32 %v4723_v26, %v6012_v1 }
 0x573   : > { %v6077_v55 = vpop.eup %4726  ;;  %v3186_v29 = vmul.f32 %v4723_v26, %v6016_v41  ;;  %v3194_v60 = vmul.f32 %v4723_v26, %v6020_v53  ;;  %4746 = vpow2.f32 %v3071_v33  ;;  %v4519_v25 = vpack.c.bf16 %v3195_v9, %v3187_v5  ;;  %v6115_v33 = vpop.trf.xlu1 }
 0x574   : > { %v6081_v32 = vpop.eup %4728  ;;  %v3128_v10 = vrot.slane %v3127_v12, 4  ;;  %v3143_v7 = vadd.f32 %v6077_v55, %v6072_v31  ;;  %v4505_v6 = vpack.c.bf16 %v3178_v2, %v3170_v19  ;;  %4748 = vpow2.f32 %v3087_v63 }
 0x575   : > { %v4731_v62 = vpop.eup %4730  ;;  %v4509_v24 = vpack.c.bf16 %v3194_v60, %v3186_v29 }
 0x576   : > { %v6085_v1 = vpop.eup %4732  ;;  %v3129_v27 = vadd.f32 %v3128_v10, %v3127_v12  ;;  %v3144_v41 = vadd.f32 %v6081_v32, %v3143_v7  ;;  %4506 = vmatprep.subr.bf16.mxu1 %v4505_v6  ;;  %v3172_v53 = vmul.f32 %v4731_v62, %v6023_v30  ;;  %v3180_v56 = vmul.f32 %v4731_v62, %v6026_v28 }
 0x577   : > { %v6090_v61 = vpop.eup %4734  ;;  %4508 = vmatpush1.bf16.msra.mxu1 %v4507_v48  ;;  %v3188_v59 = vmul.f32 %v4731_v62, %v6031_v54  ;;  %v3196_v45 = vmul.f32 %v4731_v62, %v6034_v38 }
 0x578   : > { %v6094_v47 = vpop.eup %4736  ;;  %v3130_v13 = vrot.slane %v3129_v27, 2  ;;  %v3145_v23 = vadd.f32 %v6085_v1, %v3144_v41  ;;  %v4513_v11 = vpack.c.bf16 %v3180_v56, %v3172_v53  ;;  %4510 = vmatprep.subr.bf16.mxu1 %v4509_v24 }
 0x579   : > { %v6097_v3 = vpop.eup %4738  ;;  %v3134_v30 = vadd.f32 %v6094_v47, %v6090_v61  ;;  %v4517_v28 = vpack.c.bf16 %v3196_v45, %v3188_v59 }
 0x57a   : > { %v6103_v37 = vpop.eup %4740  ;;  %v3131_v54 = vadd.f32 %v3130_v13, %v3129_v27  ;;  %v3146_v15 = vrot.slane %v3145_v23, 4  ;;  %4514 = vmatprep.subr.bf16.mxu0 %v4513_v11 }
 0x57b   : > { %v6105_v38 = vpop.eup %4742  ;;  %v3135_v4 = vadd.f32 %v6097_v3, %v3134_v30  ;;  %4516 = vmatpush1.bf16.msra.mxu0 %v4515_v34  ;;  %4512 = vmatpush1.bf16.msra.mxu1 %v4511_v8 }
 0x57c   : > { %v6108_v51 = vpop.eup %4744  ;;  %v3132_v42 = vrot.slane %v3131_v54, 1  ;;  %v3147_v35 = vadd.f32 %v3146_v15, %v3145_v23  ;;  %4518 = vmatprep.subr.bf16.mxu0 %v4517_v28 }
 0x57d   : > { %v3136_v39 = vadd.f32 %v6103_v37, %v3135_v4  ;;  %v3152_v52 = vadd.f32 %v6108_v51, %v6105_v38  ;;  %v4747_v18 = vpop.eup %4746 }
 0x57e   : > { %v3133_v50 = vadd.f32 %v3132_v42, %v3131_v54  ;;  %v3148_v0 = vrot.slane %v3147_v35, 2  ;;  %4088 = vmatmul.mubr.msk.f32.vlgmr.msra.gmra.mrb[48].mxu1 %vm1766_vm2, %v6101_v16  ;;  %v4749_v43 = vpop.eup %4748 }
 0x57f   : > { %v3137_v14 = vrot.slane %v3136_v39, 4  ;;  %v3153_v21 = vadd.f32 %v4747_v18, %v3152_v52  ;;  %4520 = vmatpush1.bf16.msra.mxu0 %v4519_v25  ;;  %3309 = vmatprep.mubr.f32.mxu1 %v6206_v20  ;;  %v3547_v52 = vld [vmem:[%s5637_s21] sm:$0x7] }
 0x580   : > { %4750 = vrcp.f32 %v3133_v50  ;;  %v3149_v63 = vadd.f32 %v3148_v0, %v3147_v35 }
 0x581   : > { %v3138_v48 = vadd.f32 %v3137_v14, %v3136_v39  ;;  %v3154_v40 = vadd.f32 %v4749_v43, %v3153_v21 }
 0x582   : > { %v3150_v57 = vrot.slane %v3149_v63, 1  ;;  %4090 = vmatmul.mubr.msk.f32.vlgmr.msra.gmra.mrb[56].mxu0 %vm1766_vm2, %v6101_v16  ;;  %4089 = vmatmul.mubr.msk.f32.gmra.mrb[50].mxu1 %vm1766_vm2, %v6115_v33 }
 0x583   : > { %v3139_v44 = vrot.slane %v3138_v48, 2  ;;  %v3155_v17 = vrot.slane %v3154_v40, 4  ;;  %3386 = vmatprep.mubr.f32.mxu0 %v6206_v20  ;;  %3457 = vmatprep.mubr.f32.mxu1 %v6206_v20 }
 0x584   : > { %v3151_v46 = vadd.f32 %v3150_v57, %v3149_v63 }
 0x585   : > { %v3140_v26 = vadd.f32 %v3139_v44, %v3138_v48  ;;  %v3156_v34 = vadd.f32 %v3155_v17, %v3154_v40 }
 0x586   : > { %4752 = vrcp.f32 %v3151_v46  ;;  %4091 = vmatmul.mubr.msk.f32.gmra.mrb[58].mxu0 %vm1766_vm2, %v6115_v33 }
 0x587   : > { %v3141_v5 = vrot.slane %v3140_v26, 1  ;;  %v3157_v9 = vrot.slane %v3156_v34, 2  ;;  %3534 = vmatprep.mubr.f32.mxu0 %v6206_v20 }
 0x589   : > { %v3142_v12 = vadd.f32 %v3141_v5, %v3140_v26  ;;  %v3158_v19 = vadd.f32 %v3157_v9, %v3156_v34 }
 0x58a   : > { %v4751_v2 = vpop.eup %4750 }
 0x58b   : > { %4754 = vrcp.f32 %v3142_v12  ;;  %v3159_v29 = vrot.slane %v3158_v19, 1  ;;  %v3173_v60 = vmul.f32 %v4751_v2, %v6051_v22  ;;  %v3181_v8 = vmul.f32 %v4751_v2, %v6056_v58 }
 0x58c   : > { %v3189_v10 = vmul.f32 %v4751_v2, %v6061_v49  ;;  %v3197_v7 = vmul.f32 %v4751_v2, %v6065_v36 }
 0x58d   : > { %v3160_v6 = vadd.f32 %v3159_v29, %v3158_v19  ;;  %v4523_v62 = vpack.c.bf16 %v3181_v8, %v3173_v60 }
 0x58e   : > { %v4527_v24 = vpack.c.bf16 %v3197_v7, %v3189_v10 }
 0x58f   : > { %4756 = vrcp.f32 %v3160_v6 }
 0x590   : > { %v4753_v25 = vpop.eup %4752 }
 0x591   : > { %v3175_v27 = vmul.f32 %v4753_v25, %v6072_v31  ;;  %v3183_v41 = vmul.f32 %v4753_v25, %v6077_v55  ;;  %v3191_v53 = vmul.f32 %v4753_v25, %v6081_v32  ;;  %v3199_v56 = vmul.f32 %v4753_v25, %v6085_v1 }
 0x593   : > { %v4531_v22 = vpack.c.bf16 %v3183_v41, %v3175_v27  ;;  %v4535_v59 = vpack.c.bf16 %v3199_v56, %v3191_v53 }
 0x595   : > { %v4755_v58 = vpop.eup %4754 }
 0x596   : > { %v3174_v49 = vmul.f32 %v4755_v58, %v6090_v61  ;;  %v3182_v36 = vmul.f32 %v4755_v58, %v6094_v47  ;;  %v3190_v45 = vmul.f32 %v4755_v58, %v6097_v3  ;;  %v3198_v13 = vmul.f32 %v4755_v58, %v6103_v37  ;;  %v3548_v47 = vld [vmem:[%s5631_s28] sm:$0x7] }
 0x597   : > { %3551 = vperm.xlu1 %4597, %v3548_v47  }
 0x598   : > { %v4521_v23 = vpack.c.bf16 %v3182_v36, %v3174_v49  ;;  %v4525_v11 = vpack.c.bf16 %v3198_v13, %v3190_v45 }
 0x599   : > { %v4757_v31 = vpop.eup %4756 }
 0x59a   : > { %4522 = vmatprep.subr.bf16.mxu1 %v4521_v23  ;;  %v3176_v55 = vmul.f32 %v4757_v31, %v6105_v38  ;;  %v3184_v32 = vmul.f32 %v4757_v31, %v6108_v51  ;;  %v3192_v1 = vmul.f32 %v4757_v31, %v4747_v18  ;;  %v3200_v30 = vmul.f32 %v4757_v31, %v4749_v43 }
 0x59b   : > { %4524 = vmatpush1.bf16.msra.mxu1 %v4523_v62 }
 0x59c   : > { %v4529_v28 = vpack.c.bf16 %v3184_v32, %v3176_v55  ;;  %4526 = vmatprep.subr.bf16.mxu1 %v4525_v11  ;;  %v4533_v61 = vpack.c.bf16 %v3200_v30, %v3192_v1 }
 0x59e   : > { %4530 = vmatprep.subr.bf16.mxu0 %v4529_v28 }
 0x59f   : > { %4532 = vmatpush1.bf16.msra.mxu0 %v4531_v22  ;;  %4528 = vmatpush1.bf16.msra.mxu1 %v4527_v24 }
 0x5a0   : > { %4534 = vmatprep.subr.bf16.mxu0 %v4533_v61 }
 0x5a2   : > { %4092 = vmatmul.mubr.msk.f32.vlgmr.msra.gmra.mrb[52].mxu1 %vm1766_vm2, %v6101_v16 }
 0x5a3   : > { %4536 = vmatpush1.bf16.msra.mxu0 %v4535_v59  ;;  %3463 = vmatprep.mubr.f32.mxu1 %v6206_v20 }
 0x5a6   : > { %4094 = vmatmul.mubr.msk.f32.vlgmr.msra.gmra.mrb[60].mxu0 %vm1766_vm2, %v6101_v16  ;;  %4093 = vmatmul.mubr.msk.f32.gmra.mrb[54].mxu1 %vm1766_vm2, %v6115_v33 }
 0x5a7   : > { %3540 = vmatprep.mubr.f32.mxu0 %v6206_v20  ;;  %3621 = vmatprep.mubr.f32.mxu1 %v6206_v20 }
 0x5aa   : > { %4095 = vmatmul.mubr.msk.f32.gmra.mrb[62].mxu0 %vm1766_vm2, %v6115_v33 }
 0x5ab   : > { %3692 = vmatprep.mubr.f32.mxu0 %v6206_v20 }
 0x651   : > { %v3305_v3 = vpop.f32.mrb[48].mxu1 }
 0x652   : > { %v3307_v37 = vpop.f32.mrb[49].mxu1 }
 0x655   : > { %v3382_v54 = vpop.f32.mrb[56].mxu0  ;;  %v3311_v15 = vpop.f32.mrb[50].mxu1 }
 0x656   : > { %v3384_v16 = vpop.f32.mrb[57].mxu0  ;;  %v4539_v38 = vpack.c.bf16 %v3311_v15, %v3305_v3  ;;  %v3313_v4 = vpop.f32.mrb[51].mxu1 }
 0x657   : > { %v4537_v51 = vpack.c.bf16 %v3313_v4, %v3307_v37 }
 0x659   : > { %v3388_v42 = vpop.f32.mrb[58].mxu0  ;;  %4538 = vmatprep.subr.bf16.mxu1 %v4537_v51 }
 0x65a   : > { %v4543_v35 = vpack.c.bf16 %v3388_v42, %v3382_v54  ;;  %v3390_v39 = vpop.f32.mrb[59].mxu0  ;;  %4540 = vmatpush1.bf16.msra.mxu1 %v4539_v38 }
 0x65b   : > { %v4541_v18 = vpack.c.bf16 %v3390_v39, %v3384_v16 }
 0x65d   : > { %4542 = vmatprep.subr.bf16.mxu0 %v4541_v18  ;;  %4096 = vmatmul.mubr.msk.f32.vlgmr.msra.gmra.mrb[56].mxu1 %vm584_vm0, %v3547_v52 }
 0x65e   : > { %4544 = vmatpush1.bf16.msra.mxu0 %v4543_v35  ;;  %3763 = vmatprep.mubr.f32.mxu1 %v6206_v20 }
 0x661   : > { %4097 = vmatmul.mubr.msk.f32.vlgmr.msra.gmra.mrb[64].mxu0 %vm584_vm0, %v3547_v52 }
 0x662   : > { %3834 = vmatprep.mubr.f32.mxu0 %v6206_v20  ;;  %v3552_v20 = vpop.permute.xlu1 %3551 }
 0x675   : > { %v3459_v50 = vpop.f32.mrb[52].mxu1 }
 0x676   : > { %v3461_v0 = vpop.f32.mrb[53].mxu1 }
 0x679   : > { %v3536_v43 = vpop.f32.mrb[60].mxu0  ;;  %v3465_v14 = vpop.f32.mrb[54].mxu1 }
 0x67a   : > { %v3538_v21 = vpop.f32.mrb[61].mxu0  ;;  %v4547_v33 = vpack.c.bf16 %v3465_v14, %v3459_v50  ;;  %v3467_v63 = vpop.f32.mrb[55].mxu1 }
 0x67b   : > { %v4545_v48 = vpack.c.bf16 %v3467_v63, %v3461_v0 }
 0x67d   : > { %v3542_v40 = vpop.f32.mrb[62].mxu0  ;;  %4546 = vmatprep.subr.bf16.mxu1 %v4545_v48 }
 0x67e   : > { %v4551_v57 = vpack.c.bf16 %v3542_v40, %v3536_v43  ;;  %v3544_v44 = vpop.f32.mrb[63].mxu0  ;;  %4548 = vmatpush1.bf16.msra.mxu1 %v4547_v33 }
 0x67f   : > { %v4549_v17 = vpack.c.bf16 %v3544_v44, %v3538_v21 }
 0x681   : > { %4550 = vmatprep.subr.bf16.mxu0 %v4549_v17  ;;  %4098 = vmatmul.mubr.msk.f32.vlgmr.msra.gmra.mrb[58].mxu1 %vm584_vm0, %v3547_v52 }
 0x682   : > { %4552 = vmatpush1.bf16.msra.mxu0 %v4551_v57 }
 0x685   : > { %4099 = vmatmul.mubr.msk.f32.vlgmr.msra.gmra.mrb[66].mxu0 %vm584_vm0, %v3547_v52 }
 0x730   : > { %v3623_v46 = vpop.f32.mrb[56].mxu1 }
 0x731   : > { %v3624_v26 = vadd.f32 %v3623_v46, %v3552_v20  ;;  %v3625_v34 = vpop.f32.mrb[57].mxu1 }
 0x732   : > { %v3626_v5 = vadd.f32 %v3625_v34, %v3552_v20 }
 0x734   : > { %v3694_v9 = vpop.f32.mrb[64].mxu0  ;;  %v3849_v12 = vcombine.low %v3624_v26, %v3626_v5 }
 0x735   : > { %v3695_v19 = vadd.f32 %v3694_v9, %v3552_v20  ;;  %v3696_v2 = vpop.f32.mrb[65].mxu0 }
 0x736   : > { %4100 = vst [vmem:[%s5832_s30 + $0x20] sm:$0x77] %v3849_v12  ;;  %v3697_v29 = vadd.f32 %v3696_v2, %v3552_v20 }
 0x738   : > { %v3850_v60 = vcombine.low %v3695_v19, %v3697_v29 }
 0x73a   : > { %4101 = vst [vmem:[%s5832_s30 + $0x28] sm:$0x77] %v3850_v60 }
 0x754   : > { %v3765_v8 = vpop.f32.mrb[58].mxu1 }
 0x755   : > { %v3766_v10 = vadd.f32 %v3765_v8, %v3552_v20  ;;  %v3767_v7 = vpop.f32.mrb[59].mxu1 }
 0x756   : > { %v3768_v6 = vadd.f32 %v3767_v7, %v3552_v20 }
 0x758   : > { %v3836_v62 = vpop.f32.mrb[66].mxu0  ;;  %v3851_v24 = vcombine.low %v3766_v10, %v3768_v6 }
 0x759   : > { %v3837_v25 = vadd.f32 %v3836_v62, %v3552_v20  ;;  %v3838_v27 = vpop.f32.mrb[67].mxu0 }
 0x75a   : > { %4102 = vst [vmem:[%s5832_s30 + $0x30] sm:$0x77] %v3851_v24  ;;  %v3839_v41 = vadd.f32 %v3838_v27, %v3552_v20 }
 0x75c   : > { %v3852_v53 = vcombine.low %v3837_v25, %v3839_v41 }
 0x75e   : > { %4103 = vst [vmem:[%s5832_s30 + $0x38] sm:$0x77] %v3852_v53 }
 0x75f PF: > { %p21_p7 = scmp.ge.s32.totalorder %s4913_s22, 4   ;;  %s6216_s17 = smov %s4816_s18 }
 0x760   : > { %s6217_s18 = smov %s4820_s19  ;;  %s6218_s19 = smov %s4923_s25 }
 0x761   : > { %s6219_s20 = smov %s4913_s22  ;;  %23 = sbr.rel (!%p21_p7) target bundleno = 3 (0x3), region = 135 }
 0x768   :  { %3883 = vsyncpa [#allocation3], 1 }
 0x769   :  { %3885 = vsyncpa [#allocation3 + $0x1], 1 }

</bundles_post_ra>
